<compile_context>
chip_gen: v5e
topology: v5e:2x2
jax: 0.10.0
libtpu: 0.0.40
codegen_flags: <defaults>
</compile_context>

<pallas_src>
import functools
import math

import jax
import jax.numpy as jnp
from jax import lax
from jax.experimental import pallas as pl
from jax.experimental.pallas import tpu as pltpu


# --------------------------------------------------------------------------- #
# Kernel 1: per-(batch, head) key statistics, streamed over key tiles.
# --------------------------------------------------------------------------- #
def _key_stats_kernel(x_ref, wk_ref, wv_ref, projt_ref,
                      ksum_ref, ctx_ref,
                      m_sc, s_sc, c_sc, vs_sc,
                      *, n_keys, eps, ratio, compute_dtype):
    h = pl.program_id(1)
    t = pl.program_id(2)

    @pl.when(t == 0)
    def _():
        m_sc[...] = jnp.full_like(m_sc, -1e30)     # running max of k_dash
        s_sc[...] = jnp.zeros_like(s_sc)           # sum_n exp(k_dash - diag - max)
        c_sc[...] = jnp.zeros_like(c_sc)           # exp(...)^T @ v
        vs_sc[...] = jnp.zeros_like(vs_sc)         # sum_n v

    x = x_ref[0].astype(compute_dtype)             # (tkv, D)
    wk = wk_ref[h]                                 # (D, d)  data_normalizer folded in
    wv = wv_ref[h]                                 # (D, d)
    proj_t = projt_ref[...]                        # (d, m)

    # --- key / value projections (MXU, heavy K=D contraction) ---
    k = jnp.dot(x, wk, preferred_element_type=jnp.float32)      # (tkv, d) f32
    v = jnp.dot(x, wv, preferred_element_type=jnp.float32)      # (tkv, d) f32

    # --- FAVOR+ key feature map pieces ---
    k_dash = jnp.dot(k.astype(compute_dtype), proj_t,
                     preferred_element_type=jnp.float32)         # (tkv, m)
    diag_k = 0.5 * jnp.sum(k * k, axis=-1, keepdims=True)        # (tkv, 1)

    # flash-style online rescaling -> effectively the global per-(b,h) key max,
    # matching the reference's amax over (n, m).
    tile_max = jnp.max(jnp.max(k_dash, axis=-1, keepdims=True),
                       axis=0, keepdims=True)                    # (1, 1)
    m_old = m_sc[...]
    m_new = jnp.maximum(m_old, tile_max)
    alpha = jnp.exp(m_old - m_new)                               # (1, 1)

    p = jnp.exp(k_dash - diag_k - m_new)                         # (tkv, m)

    s_sc[...] = alpha * s_sc[...] + jnp.sum(p, axis=0, keepdims=True)
    c_sc[...] = alpha * c_sc[...] + lax.dot_general(
        p.astype(compute_dtype), v.astype(compute_dtype),
        (((0,), (0,)), ((), ())), preferred_element_type=jnp.float32)   # (m, d)
    vs_sc[...] = vs_sc[...] + jnp.sum(v, axis=0, keepdims=True)         # (1, d)
    m_sc[...] = m_new

    @pl.when(t == pl.num_programs(2) - 1)
    def _():
        # k' = ratio * (exp(k_dash - diag - max) + eps); fold eps analytically.
        ksum_ref[0, 0] = ratio * (s_sc[...] + n_keys * eps)             # (1, m)
        ctx_ref[0, 0] = ratio * c_sc[...] + (ratio * eps) * vs_sc[...]  # (m, d)


# --------------------------------------------------------------------------- #
# Kernel 2: query tiles + head-reduced output projection.
# --------------------------------------------------------------------------- #
def _query_out_kernel(x_ref, wq_ref, wo_ref, bo_ref, projt_ref,
                      ksum_ref, ctx_ref, out_ref, acc_ref,
                      *, log_ratio, eps_ratio, compute_dtype, approx_recip):
    h = pl.program_id(2)

    @pl.when(h == 0)
    def _():
        acc_ref[...] = jnp.zeros_like(acc_ref)

    x = x_ref[0].astype(compute_dtype)             # (tq, D)
    wq = wq_ref[h]                                 # (D, d)  data_normalizer folded in
    wo = wo_ref[h]                                 # (d, D)
    proj_t = projt_ref[...]                        # (d, m)
    ksum = ksum_ref[0, 0]                          # (1, m)  f32
    ctx = ctx_ref[0, 0]                            # (m, d)  f32

    q = jnp.dot(x, wq, preferred_element_type=jnp.float32)              # (tq, d)
    q_dash = jnp.dot(q.astype(compute_dtype), proj_t,
                     preferred_element_type=jnp.float32)                # (tq, m)
    diag_q = 0.5 * jnp.sum(q * q, axis=-1, keepdims=True)               # (tq, 1)
    q_max = jnp.max(q_dash, axis=-1, keepdims=True)                     # (tq, 1)

    # ratio folded into the exponent / eps (saves (N, m) VPU multiplies).
    q_prime = jnp.exp(q_dash - diag_q - q_max + log_ratio) + eps_ratio  # (tq, m)

    denom = jnp.sum(q_prime * ksum, axis=-1, keepdims=True)             # (tq, 1)
    d_inv = pl.reciprocal(denom, approx=approx_recip)

    out_h = jnp.dot(q_prime.astype(compute_dtype), ctx.astype(compute_dtype),
                    preferred_element_type=jnp.float32) * d_inv         # (tq, d)

    # this head's contribution to the output projection; accumulate across heads
    acc_ref[...] += jnp.dot(out_h.astype(compute_dtype), wo,
                            preferred_element_type=jnp.float32)         # (tq, D)

    @pl.when(h == pl.num_programs(2) - 1)
    def _():
        # dropout(p=0.0 / eval) is identity
        out_ref[0] = (acc_ref[...] + bo_ref[...]).astype(out_ref.dtype)


# --------------------------------------------------------------------------- #
# Wrapper
# --------------------------------------------------------------------------- #
def _pick_tile(n, target):
    """Largest tile <= target that divides n and is a multiple of 8 (else n)."""
    if n <= target:
        return n
    t = (min(target, n) // 8) * 8
    while t >= 8:
        if n % t == 0:
            return t
        t -= 8
    return n


def _vmem_limit(resident_bytes):
    # 2x for double buffering + 2x headroom; clamp to a v7x-safe scoped limit.
    return int(min(max(4 * resident_bytes, 8 << 20), 64 << 20))


def nattention_forward(x, params, *, heads, dim_head, nb_features, eps=1e-4,
                       tile_q=512, tile_kv=512, mxu_bf16=True):
    """x: (B, N, dim) float32. Returns (B, N, dim); attention weights are None."""
    B, N, D = x.shape
    H, d, m = heads, dim_head, nb_features
    f32 = jnp.float32
    cdt = jnp.bfloat16 if mxu_bf16 else jnp.float32

    data_normalizer = float(d) ** -0.25
    ratio = float(m) ** -0.5

    # Hoist per-head weight re-layout + scalar folding out of the kernel (pure XLA).
    wq_h = (params["wq_t"] * data_normalizer).reshape(D, H, d).transpose(1, 0, 2).astype(cdt)
    wk_h = (params["wk_t"] * data_normalizer).reshape(D, H, d).transpose(1, 0, 2).astype(cdt)
    wv_h = params["wv_t"].reshape(D, H, d).transpose(1, 0, 2).astype(cdt)
    wo_h = params["wo_t"].reshape(H, d, D).astype(cdt)
    proj_t = params["proj"].T.astype(cdt)                     # (d, m)
    bo = params["bo"].astype(f32)                             # (1, D)
    x_c = x.astype(cdt)

    tq = _pick_tile(N, tile_q)
    tkv = _pick_tile(N, tile_kv)
    n_q, n_kv = N // tq, N // tkv
    wb = jnp.dtype(cdt).itemsize

    # ---------------- pass 1: key statistics ----------------
    key_kernel = functools.partial(_key_stats_kernel, n_keys=float(N), eps=eps,
                                   ratio=ratio, compute_dtype=cdt)
    blk1 = (tkv * D * wb + 2 * H * D * d * wb + d * m * wb
            + m * 4 + m * d * 4) + (1 + m + m * d + d) * 4
    ksum, ctx = pl.pallas_call(
        key_kernel,
        out_shape=(jax.ShapeDtypeStruct((B, H, 1, m), f32),
                   jax.ShapeDtypeStruct((B, H, m, d), f32)),
        grid=(B, H, n_kv),
        in_specs=[
            pl.BlockSpec((1, tkv, D), lambda b, h, t: (b, t, 0)),   # x key tiles
            pl.BlockSpec((H, D, d), lambda b, h, t: (0, 0, 0)),     # wk (resident)
            pl.BlockSpec((H, D, d), lambda b, h, t: (0, 0, 0)),     # wv (resident)
            pl.BlockSpec((d, m), lambda b, h, t: (0, 0)),           # proj^T (resident)
        ],
        out_specs=(pl.BlockSpec((1, 1, 1, m), lambda b, h, t: (b, h, 0, 0)),
                   pl.BlockSpec((1, 1, m, d), lambda b, h, t: (b, h, 0, 0))),
        scratch_shapes=[pltpu.VMEM((1, 1), f32),     # running key max
                        pltpu.VMEM((1, m), f32),     # sum_n exp(...)
                        pltpu.VMEM((m, d), f32),     # exp(...)^T @ v
                        pltpu.VMEM((1, d), f32)],    # sum_n v
        compiler_params=pltpu.CompilerParams(
            dimension_semantics=("parallel", "parallel", "arbitrary"),
            vmem_limit_bytes=_vmem_limit(blk1)),
    )(x_c, wk_h, wv_h, proj_t)

    # ---------------- pass 2: query tiles + output projection ----------------
    out_kernel = functools.partial(_query_out_kernel, log_ratio=math.log(ratio),
                                   eps_ratio=ratio * eps, compute_dtype=cdt,
                                   approx_recip=mxu_bf16)
    blk2 = (tq * D * wb + 2 * H * D * d * wb + D * 4 + d * m * wb
            + m * 4 + m * d * 4 + tq * D * 4) + tq * D * 4
    out = pl.pallas_call(
        out_kernel,
        out_shape=jax.ShapeDtypeStruct((B, N, D), f32),
        grid=(B, n_q, H),
        in_specs=[
            pl.BlockSpec((1, tq, D), lambda b, t, h: (b, t, 0)),    # x query tile (resident across heads)
            pl.BlockSpec((H, D, d), lambda b, t, h: (0, 0, 0)),     # wq (resident)
            pl.BlockSpec((H, d, D), lambda b, t, h: (0, 0, 0)),     # wo (resident)
            pl.BlockSpec((1, D), lambda b, t, h: (0, 0)),           # out-proj bias
            pl.BlockSpec((d, m), lambda b, t, h: (0, 0)),           # proj^T (resident)
            pl.BlockSpec((1, 1, 1, m), lambda b, t, h: (b, h, 0, 0)),  # key sums
            pl.BlockSpec((1, 1, m, d), lambda b, t, h: (b, h, 0, 0)),  # context
        ],
        out_specs=pl.BlockSpec((1, tq, D), lambda b, t, h: (b, t, 0)),
        scratch_shapes=[pltpu.VMEM((tq, D), f32)],
        compiler_params=pltpu.CompilerParams(
            dimension_semantics=("parallel", "parallel", "arbitrary"),
            vmem_limit_bytes=_vmem_limit(blk2)),
    )(x_c, wq_h, wo_h, bo, proj_t, ksum, ctx)
    return out


# --------------------------------------------------------------------------- #
# Parameters & pure-JAX reference (eval mode, default path)
# --------------------------------------------------------------------------- #
def init_params(key, *, dim, heads, dim_head, nb_features):
    inner = heads * dim_head
    ks = jax.random.split(key, 6)
    rnd = lambda k, shape, s: (s * jax.random.normal(k, shape)).astype(jnp.float32)
    return {
        # to_q/to_k/to_v: nn.Linear(dim, inner, bias=False); stored as W.T so x @ W.T
        "wq_t": rnd(ks[0], (dim, inner), 0.1),
        "wk_t": rnd(ks[1], (dim, inner), 0.1),
        "wv_t": rnd(ks[2], (dim, inner), 0.1),
        # to_out: nn.Linear(inner, dim, bias=True)
        "wo_t": rnd(ks[3], (inner, dim), 0.1),
        "bo":   rnd(ks[4], (1, dim), 0.01),
        # FAVOR+ projection matrix (any fixed (m, d) matrix exercises the math)
        "proj": jax.random.normal(ks[5], (nb_features, dim_head)).astype(jnp.float32),
    }


def reference_forward(x, params, *, heads, dim_head, nb_features, eps=1e-4):
    """Pure-JAX reference matching the PyTorch forward (eval mode, default path)."""
    B, N, D = x.shape
    h, d, m = heads, dim_head, nb_features
    q = x @ params["wq_t"]
    k = x @ params["wk_t"]
    v = x @ params["wv_t"]

    def split(t):  # (B, N, h*d) -> (B, h, N, d)
        return t.reshape(B, N, h, d).transpose(0, 2, 1, 3)

    qh, kh, vh = split(q), split(k), split(v)
    proj = params["proj"]                      # (m, d)
    norm = float(d) ** -0.25
    ratio = float(m) ** -0.5

    def feature_map(t, is_query):
        dash = jnp.einsum("bhnd,md->bhnm", t * norm, proj)
        diag = 0.5 * (norm ** 2) * jnp.sum(t * t, axis=-1, keepdims=True)
        if is_query:
            mx = jnp.max(dash, axis=-1, keepdims=True)
        else:
            mx = jnp.max(dash, axis=(-1, -2), keepdims=True)
        return ratio * (jnp.exp(dash - diag - mx) + eps)

    qp = feature_map(qh, True)
    kp = feature_map(kh, False)

    k_sum = jnp.sum(kp, axis=-2)                                     # (B, h, m)
    d_inv = 1.0 / jnp.einsum("bhnm,bhm->bhn", qp, k_sum)
    context = jnp.einsum("bhnm,bhnd->bhmd", kp, vh)
    out = jnp.einsum("bhnm,bhmd->bhnd", qp, context) * d_inv[..., None]
    out = out.transpose(0, 2, 1, 3).reshape(B, N, h * d)
    return out @ params["wo_t"] + params["bo"]


if __name__ == "__main__":
    # Keep f32 matmuls (reference and exact kernel path) at full f32 precision so
    # the strict correctness check is meaningful.
    jax.config.update("jax_default_matmul_precision", "highest")

    B, N, DIM, H = 2, 256, 128, 4
    DIM_HEAD = DIM // H            # 32
    NB_FEATURES = 128              # lane-dense feature count (m is the lane dim)

    key = jax.random.PRNGKey(0)
    kx, kp = jax.random.split(key)
    x = jax.random.normal(kx, (B, N, DIM), dtype=jnp.float32)
    params = init_params(kp, dim=DIM, heads=H, dim_head=DIM_HEAD,
                         nb_features=NB_FEATURES)

    ref = reference_forward(x, params, heads=H, dim_head=DIM_HEAD,
                            nb_features=NB_FEATURES)

    # Exact path (f32 MXU operands, exact reciprocal): strict validation.
    out_f32 = nattention_forward(x, params, heads=H, dim_head=DIM_HEAD,
                                 nb_features=NB_FEATURES,
                                 tile_q=128, tile_kv=128, mxu_bf16=False)
    out_f32 = jax.block_until_ready(out_f32)
    assert out_f32.shape == (B, N, DIM)
    assert jnp.allclose(out_f32, ref, rtol=1e-3, atol=1e-3), "f32 path mismatch"

    # Fast path (bf16 MXU operands with f32 accumulation, approx reciprocal):
    # validated at bf16-level tolerance.
    out_bf16 = nattention_forward(x, params, heads=H, dim_head=DIM_HEAD,
                                  nb_features=NB_FEATURES,
                                  tile_q=128, tile_kv=128, mxu_bf16=True)
    out_bf16 = jax.block_until_ready(out_bf16)
    assert out_bf16.shape == (B, N, DIM)
    assert jnp.allclose(out_bf16, ref, rtol=1e-1, atol=1e-1), "bf16 path mismatch"

    print("KERNEL_OK")
</pallas_src>

<mosaic_0001>
module attributes {stable_mosaic.version = 11 : i64} {
  func.func @_key_stats_kernel(%arg0: i32, %arg1: i32, %arg2: i32, %arg3: memref<1x128x128xf32, #tpu.memory_space<vmem>>, %arg4: memref<4x128x32xf32, #tpu.memory_space<vmem>>, %arg5: memref<4x128x32xf32, #tpu.memory_space<vmem>>, %arg6: memref<32x128xf32, #tpu.memory_space<vmem>>, %arg7: memref<1x1x1x128xf32, #tpu.memory_space<vmem>>, %arg8: memref<1x1x128x32xf32, #tpu.memory_space<vmem>>, %arg9: memref<1x1xf32, #tpu.memory_space<vmem>>, %arg10: memref<1x128xf32, #tpu.memory_space<vmem>>, %arg11: memref<128x32xf32, #tpu.memory_space<vmem>>, %arg12: memref<1x32xf32, #tpu.memory_space<vmem>>) attributes {dimension_semantics = [#tpu.dimension_semantics<parallel>, #tpu.dimension_semantics<parallel>, #tpu.dimension_semantics<arbitrary>], iteration_bounds = array<i64: 2, 4, 2>, scalar_prefetch = 0 : i64, scratch_operands = 4 : i64, tpu.core_type = #tpu.core_type<tc>, window_params = [{transform_indices = @transform_0, window_bounds = array<i64: 1, 128, 128>}, {pipeline_mode = #tpu.pipeline_mode<synchronous>, transform_indices = @transform_1, window_bounds = array<i64: 4, 128, 32>}, {pipeline_mode = #tpu.pipeline_mode<synchronous>, transform_indices = @transform_2, window_bounds = array<i64: 4, 128, 32>}, {pipeline_mode = #tpu.pipeline_mode<synchronous>, transform_indices = @transform_3, window_bounds = array<i64: 32, 128>}, {transform_indices = @transform_4, window_bounds = array<i64: 1, 1, 1, 128>}, {transform_indices = @transform_5, window_bounds = array<i64: 1, 1, 128, 32>}]} {
    %c0_i32 = arith.constant 0 : i32
    %0 = arith.cmpi eq, %arg2, %c0_i32 : i32
    %1 = arith.extui %0 : i1 to i32
    %c0_i32_0 = arith.constant 0 : i32
    %2 = arith.cmpi ne, %1, %c0_i32_0 : i32
    scf.if %2 {
      %cst_35 = arith.constant -1.000000e+30 : f32
      %55 = vector.broadcast %cst_35 : f32 to vector<1x1xf32>
      %c0_36 = arith.constant 0 : index
      %c0_37 = arith.constant 0 : index
      %56 = vector.load %arg9[%c0_36, %c0_37] : memref<1x1xf32, #tpu.memory_space<vmem>>, vector<1x1xf32>
      tpu.vector_store %arg9[%c0_36, %c0_37], %55 {strides = array<i32>} : memref<1x1xf32, #tpu.memory_space<vmem>>, vector<1x1xf32>,
      %cst_38 = arith.constant 0.000000e+00 : f32
      %57 = vector.broadcast %cst_38 : f32 to vector<1x128xf32>
      %c0_39 = arith.constant 0 : index
      %c0_40 = arith.constant 0 : index
      %58 = vector.load %arg10[%c0_39, %c0_40] : memref<1x128xf32, #tpu.memory_space<vmem>>, vector<1x128xf32>
      tpu.vector_store %arg10[%c0_39, %c0_40], %57 {strides = array<i32>} : memref<1x128xf32, #tpu.memory_space<vmem>>, vector<1x128xf32>,
      %cst_41 = arith.constant 0.000000e+00 : f32
      %59 = vector.broadcast %cst_41 : f32 to vector<128x32xf32>
      %c0_42 = arith.constant 0 : index
      %c0_43 = arith.constant 0 : index
      %60 = vector.load %arg11[%c0_42, %c0_43] : memref<128x32xf32, #tpu.memory_space<vmem>>, vector<128x32xf32>
      tpu.vector_store %arg11[%c0_42, %c0_43], %59 {strides = array<i32>} : memref<128x32xf32, #tpu.memory_space<vmem>>, vector<128x32xf32>,
      %cst_44 = arith.constant 0.000000e+00 : f32
      %61 = vector.broadcast %cst_44 : f32 to vector<1x32xf32>
      %c0_45 = arith.constant 0 : index
      %c0_46 = arith.constant 0 : index
      %62 = vector.load %arg12[%c0_45, %c0_46] : memref<1x32xf32, #tpu.memory_space<vmem>>, vector<1x32xf32>
      tpu.vector_store %arg12[%c0_45, %c0_46], %61 {strides = array<i32>} : memref<1x32xf32, #tpu.memory_space<vmem>>, vector<1x32xf32>,
    } else {
    }
    %c0 = arith.constant 0 : index
    %c0_1 = arith.constant 0 : index
    %c0_2 = arith.constant 0 : index
    %3 = vector.load %arg3[%c0, %c0_1, %c0_2] : memref<1x128x128xf32, #tpu.memory_space<vmem>>, vector<1x128x128xf32>
    %4 = vector.shape_cast %3 : vector<1x128x128xf32> to vector<128x128xf32>
    %5 = arith.index_cast %arg1 : i32 to index
    %c0_3 = arith.constant 0 : index
    %c0_4 = arith.constant 0 : index
    %6 = vector.load %arg4[%5, %c0_3, %c0_4] : memref<4x128x32xf32, #tpu.memory_space<vmem>>, vector<1x128x32xf32>
    %7 = vector.shape_cast %6 : vector<1x128x32xf32> to vector<128x32xf32>
    %8 = arith.index_cast %arg1 : i32 to index
    %c0_5 = arith.constant 0 : index
    %c0_6 = arith.constant 0 : index
    %9 = vector.load %arg5[%8, %c0_5, %c0_6] : memref<4x128x32xf32, #tpu.memory_space<vmem>>, vector<1x128x32xf32>
    %10 = vector.shape_cast %9 : vector<1x128x32xf32> to vector<128x32xf32>
    %c0_7 = arith.constant 0 : index
    %c0_8 = arith.constant 0 : index
    %11 = vector.load %arg6[%c0_7, %c0_8] : memref<32x128xf32, #tpu.memory_space<vmem>>, vector<32x128xf32>
    %cst = arith.constant dense<0.000000e+00> : vector<128x32xf32>
    %12 = tpu.matmul %4, %7, %cst {dimension_numbers = #tpu.dot_dimension_numbers<[1], [0], [0], [1], [0, 0, 1, 1], [], []>, precision = #tpu.contract_precision<fp32>} : vector<128x128xf32>, vector<128x32xf32>, vector<128x32xf32> -> vector<128x32xf32>
    %cst_9 = arith.constant dense<0.000000e+00> : vector<128x32xf32>
    %13 = tpu.matmul %4, %10, %cst_9 {dimension_numbers = #tpu.dot_dimension_numbers<[1], [0], [0], [1], [0, 0, 1, 1], [], []>, precision = #tpu.contract_precision<fp32>} : vector<128x128xf32>, vector<128x32xf32>, vector<128x32xf32> -> vector<128x32xf32>
    %cst_10 = arith.constant dense<0.000000e+00> : vector<128x128xf32>
    %14 = tpu.matmul %12, %11, %cst_10 {dimension_numbers = #tpu.dot_dimension_numbers<[1], [0], [0], [1], [0, 0, 1, 1], [], []>, precision = #tpu.contract_precision<fp32>} : vector<128x32xf32>, vector<32x128xf32>, vector<128x128xf32> -> vector<128x128xf32>
    %15 = arith.mulf %12, %12 : vector<128x32xf32>
    %cst_11 = arith.constant dense<0.000000e+00> : vector<128xf32>
    %16 = vector.multi_reduction <add>, %15, %cst_11 [1] : vector<128x32xf32> to vector<128xf32>
    %17 = vector.shape_cast %16 : vector<128xf32> to vector<128x1xf32>
    %cst_12 = arith.constant 5.000000e-01 : f32
    %18 = vector.broadcast %cst_12 : f32 to vector<128x1xf32>
    %19 = arith.mulf %18, %17 : vector<128x1xf32>
    %cst_13 = arith.constant dense<0xFF800000> : vector<128xf32>
    %20 = vector.multi_reduction <maximumf>, %14, %cst_13 [1] : vector<128x128xf32> to vector<128xf32>
    %21 = vector.shape_cast %20 : vector<128xf32> to vector<128x1xf32>
    %cst_14 = arith.constant dense<0xFF800000> : vector<1xf32>
    %22 = vector.multi_reduction <maximumf>, %21, %cst_14 [0] : vector<128x1xf32> to vector<1xf32>
    %23 = vector.shape_cast %22 : vector<1xf32> to vector<1x1xf32>
    %c0_15 = arith.constant 0 : index
    %c0_16 = arith.constant 0 : index
    %24 = vector.load %arg9[%c0_15, %c0_16] : memref<1x1xf32, #tpu.memory_space<vmem>>, vector<1x1xf32>
    %25 = arith.maximumf %24, %23 : vector<1x1xf32>
    %26 = arith.subf %24, %25 : vector<1x1xf32>
    %27 = math.exp %26 : vector<1x1xf32>
    %28 = vector.broadcast %19 : vector<128x1xf32> to vector<128x128xf32>
    %29 = arith.subf %14, %28 : vector<128x128xf32>
    %30 = vector.broadcast %25 : vector<1x1xf32> to vector<128x128xf32>
    %31 = arith.subf %29, %30 : vector<128x128xf32>
    %32 = math.exp %31 : vector<128x128xf32>
    %c0_17 = arith.constant 0 : index
    %c0_18 = arith.constant 0 : index
    %33 = vector.load %arg10[%c0_17, %c0_18] : memref<1x128xf32, #tpu.memory_space<vmem>>, vector<1x128xf32>
    %34 = vector.broadcast %27 : vector<1x1xf32> to vector<1x128xf32>
    %35 = arith.mulf %34, %33 : vector<1x128xf32>
    %cst_19 = arith.constant dense<0.000000e+00> : vector<128xf32>
    %36 = vector.multi_reduction <add>, %32, %cst_19 [0] : vector<128x128xf32> to vector<128xf32>
    %37 = vector.shape_cast %36 : vector<128xf32> to vector<1x128xf32>
    %38 = arith.addf %35, %37 : vector<1x128xf32>
    %c0_20 = arith.constant 0 : index
    %c0_21 = arith.constant 0 : index
    %39 = vector.load %arg10[%c0_20, %c0_21] : memref<1x128xf32, #tpu.memory_space<vmem>>, vector<1x128xf32>
    tpu.vector_store %arg10[%c0_20, %c0_21], %38 {strides = array<i32>} : memref<1x128xf32, #tpu.memory_space<vmem>>, vector<1x128xf32>,
    %c0_22 = arith.constant 0 : index
    %c0_23 = arith.constant 0 : index
    %40 = vector.load %arg11[%c0_22, %c0_23] : memref<128x32xf32, #tpu.memory_space<vmem>>, vector<128x32xf32>
    %41 = vector.broadcast %27 : vector<1x1xf32> to vector<128x32xf32>
    %42 = arith.mulf %41, %40 : vector<128x32xf32>
    %cst_24 = arith.constant dense<0.000000e+00> : vector<128x32xf32>
    %43 = tpu.matmul %32, %13, %cst_24 {dimension_numbers = #tpu.dot_dimension_numbers<[0], [0], [1], [1], [0, 1, 1, 1], [], []>, precision = #tpu.contract_precision<fp32>} : vector<128x128xf32>, vector<128x32xf32>, vector<128x32xf32> -> vector<128x32xf32>
    %44 = arith.addf %42, %43 : vector<128x32xf32>
    %c0_25 = arith.constant 0 : index
    %c0_26 = arith.constant 0 : index
    %45 = vector.load %arg11[%c0_25, %c0_26] : memref<128x32xf32, #tpu.memory_space<vmem>>, vector<128x32xf32>
    tpu.vector_store %arg11[%c0_25, %c0_26], %44 {strides = array<i32>} : memref<128x32xf32, #tpu.memory_space<vmem>>, vector<128x32xf32>,
    %c0_27 = arith.constant 0 : index
    %c0_28 = arith.constant 0 : index
    %46 = vector.load %arg12[%c0_27, %c0_28] : memref<1x32xf32, #tpu.memory_space<vmem>>, vector<1x32xf32>
    %cst_29 = arith.constant dense<0.000000e+00> : vector<32xf32>
    %47 = vector.multi_reduction <add>, %13, %cst_29 [0] : vector<128x32xf32> to vector<32xf32>
    %48 = vector.shape_cast %47 : vector<32xf32> to vector<1x32xf32>
    %49 = arith.addf %46, %48 : vector<1x32xf32>
    %c0_30 = arith.constant 0 : index
    %c0_31 = arith.constant 0 : index
    %50 = vector.load %arg12[%c0_30, %c0_31] : memref<1x32xf32, #tpu.memory_space<vmem>>, vector<1x32xf32>
    tpu.vector_store %arg12[%c0_30, %c0_31], %49 {strides = array<i32>} : memref<1x32xf32, #tpu.memory_space<vmem>>, vector<1x32xf32>,
    %c0_32 = arith.constant 0 : index
    %c0_33 = arith.constant 0 : index
    %51 = vector.load %arg9[%c0_32, %c0_33] : memref<1x1xf32, #tpu.memory_space<vmem>>, vector<1x1xf32>
    tpu.vector_store %arg9[%c0_32, %c0_33], %25 {strides = array<i32>} : memref<1x1xf32, #tpu.memory_space<vmem>>, vector<1x1xf32>,
    %c1_i32 = arith.constant 1 : i32
    %52 = arith.cmpi eq, %arg2, %c1_i32 : i32
    %53 = arith.extui %52 : i1 to i32
    %c0_i32_34 = arith.constant 0 : i32
    %54 = arith.cmpi ne, %53, %c0_i32_34 : i32
    scf.if %54 {
      %c0_35 = arith.constant 0 : index
      %c0_36 = arith.constant 0 : index
      %55 = vector.load %arg10[%c0_35, %c0_36] : memref<1x128xf32, #tpu.memory_space<vmem>>, vector<1x128xf32>
      %cst_37 = arith.constant 2.560000e-02 : f32
      %56 = vector.broadcast %cst_37 : f32 to vector<1x128xf32>
      %57 = arith.addf %55, %56 : vector<1x128xf32>
      %cst_38 = arith.constant 0.0883883461 : f32
      %58 = vector.broadcast %cst_38 : f32 to vector<1x128xf32>
      %59 = arith.mulf %58, %57 : vector<1x128xf32>
      %c0_39 = arith.constant 0 : index
      %c0_40 = arith.constant 0 : index
      %c0_41 = arith.constant 0 : index
      %c0_42 = arith.constant 0 : index
      %60 = vector.load %arg7[%c0_39, %c0_40, %c0_41, %c0_42] : memref<1x1x1x128xf32, #tpu.memory_space<vmem>>, vector<1x1x1x128xf32>
      %61 = vector.shape_cast %60 : vector<1x1x1x128xf32> to vector<1x128xf32>
      %62 = vector.shape_cast %59 : vector<1x128xf32> to vector<1x1x1x128xf32>
      tpu.vector_store %arg7[%c0_39, %c0_40, %c0_41, %c0_42], %62 {strides = array<i32>} : memref<1x1x1x128xf32, #tpu.memory_space<vmem>>, vector<1x1x1x128xf32>,
      %c0_43 = arith.constant 0 : index
      %c0_44 = arith.constant 0 : index
      %63 = vector.load %arg11[%c0_43, %c0_44] : memref<128x32xf32, #tpu.memory_space<vmem>>, vector<128x32xf32>
      %cst_45 = arith.constant 0.0883883461 : f32
      %64 = vector.broadcast %cst_45 : f32 to vector<128x32xf32>
      %65 = arith.mulf %64, %63 : vector<128x32xf32>
      %c0_46 = arith.constant 0 : index
      %c0_47 = arith.constant 0 : index
      %66 = vector.load %arg12[%c0_46, %c0_47] : memref<1x32xf32, #tpu.memory_space<vmem>>, vector<1x32xf32>
      %cst_48 = arith.constant 8.83883513E-6 : f32
      %67 = vector.broadcast %cst_48 : f32 to vector<1x32xf32>
      %68 = arith.mulf %67, %66 : vector<1x32xf32>
      %69 = vector.broadcast %68 : vector<1x32xf32> to vector<128x32xf32>
      %70 = arith.addf %65, %69 : vector<128x32xf32>
      %c0_49 = arith.constant 0 : index
      %c0_50 = arith.constant 0 : index
      %c0_51 = arith.constant 0 : index
      %c0_52 = arith.constant 0 : index
      %71 = vector.load %arg8[%c0_49, %c0_50, %c0_51, %c0_52] : memref<1x1x128x32xf32, #tpu.memory_space<vmem>>, vector<1x1x128x32xf32>
      %72 = vector.shape_cast %71 : vector<1x1x128x32xf32> to vector<128x32xf32>
      %73 = vector.shape_cast %70 : vector<128x32xf32> to vector<1x1x128x32xf32>
      tpu.vector_store %arg8[%c0_49, %c0_50, %c0_51, %c0_52], %73 {strides = array<i32>} : memref<1x1x128x32xf32, #tpu.memory_space<vmem>>, vector<1x1x128x32xf32>,
    } else {
    }
    return
  }
  func.func @transform_0(%arg0: i32, %arg1: i32, %arg2: i32) -> (i32, i32, i32) {
    %c0_i32 = arith.constant 0 : i32
    %c0_i32_0 = arith.constant 0 : i32
    return %arg0, %arg2, %c0_i32 : i32, i32, i32
  }
  func.func @transform_1(%arg0: i32, %arg1: i32, %arg2: i32) -> (i32, i32, i32) {
    %c0_i32 = arith.constant 0 : i32
    %c0_i32_0 = arith.constant 0 : i32
    %c0_i32_1 = arith.constant 0 : i32
    %c0_i32_2 = arith.constant 0 : i32
    return %c0_i32, %c0_i32_0, %c0_i32_1 : i32, i32, i32
  }
  func.func @transform_2(%arg0: i32, %arg1: i32, %arg2: i32) -> (i32, i32, i32) {
    %c0_i32 = arith.constant 0 : i32
    %c0_i32_0 = arith.constant 0 : i32
    %c0_i32_1 = arith.constant 0 : i32
    %c0_i32_2 = arith.constant 0 : i32
    return %c0_i32, %c0_i32_0, %c0_i32_1 : i32, i32, i32
  }
  func.func @transform_3(%arg0: i32, %arg1: i32, %arg2: i32) -> (i32, i32) {
    %c0_i32 = arith.constant 0 : i32
    %c0_i32_0 = arith.constant 0 : i32
    %c0_i32_1 = arith.constant 0 : i32
    return %c0_i32, %c0_i32_0 : i32, i32
  }
  func.func @transform_4(%arg0: i32, %arg1: i32, %arg2: i32) -> (i32, i32, i32, i32) {
    %c0_i32 = arith.constant 0 : i32
    %c0_i32_0 = arith.constant 0 : i32
    %c0_i32_1 = arith.constant 0 : i32
    return %arg0, %arg1, %c0_i32, %c0_i32_0 : i32, i32, i32, i32
  }
  func.func @transform_5(%arg0: i32, %arg1: i32, %arg2: i32) -> (i32, i32, i32, i32) {
    %c0_i32 = arith.constant 0 : i32
    %c0_i32_0 = arith.constant 0 : i32
    %c0_i32_1 = arith.constant 0 : i32
    return %arg0, %arg1, %c0_i32, %c0_i32_0 : i32, i32, i32, i32
  }
}

</mosaic_0001>

<bundles_post_ra>
// kernel: tpu_custom_call.1
= control target key start
LH: loop header
LB: loop body
LE: loop exit
PB: predicated region body
PF: predicated region fallthrough
CT: control target
= control target key end

     0   :  { %11 = vsyncpa [#allocation7], 0  ;;  %s6636_s0 = inlined_call_operand.vmem [shape: f32[2,256,128], index: 0, kind: input, shape index: {}]   ;;  %s6637_s1 = inlined_call_operand.vmem [shape: f32[4,128,32], index: 1, kind: input, shape index: {}]   ;;  %s6638_s2 = inlined_call_operand.vmem [shape: f32[4,128,32], index: 2, kind: input, shape index: {}]   ;;  %s6639_s3 = inlined_call_operand.vmem [shape: f32[32,128], index: 3, kind: input, shape index: {}]   ;;  %s6640_s4 = inlined_call_operand.hbm [shape: f32[2,4,1,128], index: 4, kind: output, shape index: {0}]   ;;  %s6641_s5 = inlined_call_operand.vmem [shape: f32[2,4,128,32], index: 5, kind: output, shape index: {1}]  }
   0x1   :  { %13 = vsyncpa [#allocation7 + $0x1], 0  ;;  %s4380_s18 = smov 0   ;;  %s4382_s19 = smov 0  }
   0x2   :  { %s4384_s20 = smov 0   ;;  %s4386_s21 = smov 0  }
   0x3   :  { %s4388_s22 = smov 0   ;;  %s4390_s23 = smov 0  }
   0x4   :  { %s4392_s24 = smov 0   ;;  %s4394_s25 = smov 0  }
   0x5   :  { %s4396_s26 = smov 0   ;;  %s4398_s27 = smov 0  }
   0x6 LB: > { %6725 = sst [smem:[#allocation9_spill]] %s4317_s20  ;;  %s4092_s28 = sadd.s32 4294967295, %s4345_s27   ;;  %s4345_s27 = sphi %s4398_s27, %s19_s27   ;;  %s4341_s26 = sphi %s4396_s26, %s6928_s26   ;;  %s4337_s25 = sphi %s4394_s25, %s6927_s25   ;;  %s4333_s24 = sphi %s4392_s24, %s6926_s24   ;;  %s4329_s23 = sphi %s4390_s23, %s6925_s23   ;;  %s4325_s22 = sphi %s4388_s22, %s6924_s22   ;;  %s4321_s21 = sphi %s4386_s21, %s6923_s21   ;;  %s4317_s20 = sphi %s4384_s20, %s6922_s20   ;;  %s4313_s19 = sphi %s4382_s19, %s6930_s19   ;;  %s4309_s18 = sphi %s4380_s18, %s6929_s18  }
   0x7   : > { %6726 = sst [smem:[#allocation10_spill]] %s4333_s24  ;;  %s4093_s29 = sadd.s32 4294967294, %s4345_s27  }
   0x8   : > { %6727 = sst [smem:[#allocation11_spill]] %s4337_s25  ;;  %s31_s30 = sadd.s32 1, %s4333_s24 }
   0x9   : > { %6728 = sst [smem:[#allocation12_spill]] %s4341_s26  ;;  %p32_p0 = scmp.ge.s32.totalorder %s31_s30, 2 }
   0xa   : > { %s34_s6 = sadd.s32 1, %s4337_s25  ;;  %s38_s7 = sadd.s32 1, %s4341_s26 }
   0xb   : > { %p148_p1 = scmp.ne.s32.totalorder %s4317_s20, %s4313_s19  ;;  %s6932_s30 = smov (%p32_p0, %s31_s30), 0 }
   0xc   : > { %6729 = sst [smem:[#allocation13_spill]] %s6932_s30  ;;  %s6934_s6 = smov (!%p32_p0, %s34_s6), %s4337_s25 }
   0xd   : > { %p149_p2 = scmp.eq.s32.totalorder %s4092_s28, 15  ;;  %p154_p3 = scmp.ne.s32.totalorder %s4313_s19, %s4309_s18 }
   0xe   : > { %p36_p4 = scmp.ge.s32.totalorder %s6934_s6, 4  ;;  %p155_p5 = scmp.eq.s32.totalorder %s4093_s29, 15 }
   0xf   : > { %p4442_p6 = por %p149_p2, %p148_p1  ;;  %p4096_p8 = scmp.ge.s32.totalorder %s4345_s27, 1 }
  0x10   : > { %s6936_s6 = smov (%p36_p4, %s6934_s6), 0  ;;  %s6938_s7 = smov (!%p36_p4, %s38_s7), %s4341_s26 }
  0x11   : > { %6731 = sst [smem:[#allocation14_spill]] %s6936_s6  ;;  %p4449_p7 = por %p155_p5, %p154_p3 }
  0x12   : > { %p40_p9 = scmp.ge.s32.totalorder %s6938_s7, 2  ;;  %p223_p10 = scmp.lt.s32.totalorder %s4345_s27, 17 }
  0x13   : > { %s6732_s9 = scalar_select %p4449_p7, 1, 0 }
  0x14   : > { %s134_s10 = ssub.s32 %s4337_s25, %s6936_s6  ;;  %s6940_s7 = smov (%p40_p9, %s6938_s7), 0 }
  0x15   : > { %6733 = sst [smem:[#allocation15_spill]] %s6732_s9  ;;  %p224_p11 = pnand %p4096_p8, %p223_p10 }
  0x16   : > { %6734 = sst [smem:[#allocation16_spill]] %s6940_s7  ;;  %s133_s11 = ssub.s32 %s4341_s26, %s6940_s7 }
  0x17   : > { %s135_s12 = sor.u32 %s134_s10, %s133_s11  ;;  %s138_s13 = sadd.s32 1, %s4317_s20 }
  0x18   : > { %p136_p12 = scmp.eq.s32.totalorder %s135_s12, 0  ;;  %227 = sbr.rel (%p224_p11) target bundleno = 1728 (0x6c0), region = 36 }
  0x1a   : > { %s4463_s14 = scalar_select %p136_p12, %s4317_s20, %s138_s13  }
  0x1c   : > { %6735 = sst [smem:[#allocation17_spill]] %s4463_s14 }
  0x1d   : > { %s4097_s16 = sshll.u32 %s4321_s21, 4  ;;  %p264_p13 = scmp.lt.s32.totalorder %s4329_s23, 1 }
  0x1e   : > { %p266_p0 = scmp.lt.s32.totalorder %s4097_s16, 31  ;;  %p275_p1 = scmp.lt.s32.totalorder %s4325_s22, 3 }
  0x1f   : > { %s265_s17 = scalar_select %p264_p13, %s4329_s23, 1 }
  0x20   : > { %s6942_s16 = smov (!%p266_p0, %s4097_s16), 31  ;;  %s6736_s20 = sand.u32 1, %s4313_s19  }
  0x21   : > { %s4098_s28 = sshll.u32 %s265_s17, 5  ;;  %s4101_s7 = sshll.u32 %s265_s17, 6 }
  0x22   : > { %s269_s29 = sadd.s32 %s4098_s28, %s6942_s16  ;;  %s4483_s9 = scalar_lea.vmem [#allocation6], %s6736_s20 }
  0x23   : > { %s4099_s10 = sshll.u32 %s269_s29, 3  ;;  %p4103_p2 = scmp.ne.s32.totalorder %s4321_s21, 0 }
  0x24   : > { %s4473_s13 = scalar_lea.vmem %s6636_s0, %s4099_s10 }
  0x25   : > { %s276_s6 = scalar_select %p275_p1, %s4325_s22, 3 }
  0x26   : > { %285 = sbr.rel (%p4103_p2) target bundleno = 63 (0x3f), region = 40 }
  0x27   : > { %s4100_s30 = sshll.u32 %s276_s6, 4 }
  0x28   : > { %s279_s26 = sadd.s32 %s4101_s7, %s4100_s30 }
  0x29   : > { %s4102_s15 = sshll.u32 %s279_s26, 3 }
  0x2a   : > { %s4479_s14 = scalar_lea.vmem %s6641_s5, %s4102_s15 }
  0x2b   : > { %vm286_vm0 = vcmask 0   ;;  %vm289_vm1 = vcmask 261120   ;;  %v4347_v0 = vmov -1e+30   ;;  %v4348_v1 = vmov 0.0  }
  0x2c   : > { %287 = vst.msk [vmem:[#allocation2] sm:$0x1] %vm286_vm0, %v4347_v0  ;;  %vm306_vm2 = vcmask 253952  }
  0x2d   : > { %288 = vst [vmem:[#allocation3] sm:$0x1] %v4348_v1 }
  0x2e   : > { %290 = vst.msk [vmem:[#allocation4] sm:$0xff] %vm289_vm1, %v4348_v1 }
  0x2f   : > { %291 = vst.msk [vmem:[#allocation4 + $0x8] sm:$0xff] %vm289_vm1, %v4348_v1 }
  0x30   : > { %292 = vst.msk [vmem:[#allocation4 + $0x10] sm:$0xff] %vm289_vm1, %v4348_v1 }
  0x31   : > { %293 = vst.msk [vmem:[#allocation4 + $0x18] sm:$0xff] %vm289_vm1, %v4348_v1 }
  0x32   : > { %294 = vst.msk [vmem:[#allocation4 + $0x20] sm:$0xff] %vm289_vm1, %v4348_v1 }
  0x33   : > { %295 = vst.msk [vmem:[#allocation4 + $0x28] sm:$0xff] %vm289_vm1, %v4348_v1 }
  0x34   : > { %296 = vst.msk [vmem:[#allocation4 + $0x30] sm:$0xff] %vm289_vm1, %v4348_v1 }
  0x35   : > { %297 = vst.msk [vmem:[#allocation4 + $0x38] sm:$0xff] %vm289_vm1, %v4348_v1 }
  0x36   : > { %298 = vst.msk [vmem:[#allocation4 + $0x40] sm:$0xff] %vm289_vm1, %v4348_v1 }
  0x37   : > { %299 = vst.msk [vmem:[#allocation4 + $0x48] sm:$0xff] %vm289_vm1, %v4348_v1 }
  0x38   : > { %300 = vst.msk [vmem:[#allocation4 + $0x50] sm:$0xff] %vm289_vm1, %v4348_v1 }
  0x39   : > { %301 = vst.msk [vmem:[#allocation4 + $0x58] sm:$0xff] %vm289_vm1, %v4348_v1 }
  0x3a   : > { %302 = vst.msk [vmem:[#allocation4 + $0x60] sm:$0xff] %vm289_vm1, %v4348_v1 }
  0x3b   : > { %303 = vst.msk [vmem:[#allocation4 + $0x68] sm:$0xff] %vm289_vm1, %v4348_v1 }
  0x3c   : > { %304 = vst.msk [vmem:[#allocation4 + $0x70] sm:$0xff] %vm289_vm1, %v4348_v1 }
  0x3d   : > { %305 = vst.msk [vmem:[#allocation4 + $0x78] sm:$0xff] %vm289_vm1, %v4348_v1 }
  0x3e   : > { %307 = vst.msk [vmem:[#allocation5] sm:$0x1] %vm306_vm2, %v4348_v1 }
  0x3f PF: > { %s4104_s20 = sshll.u32 %s4325_s22, 7  ;;  %v308_v49 = vld [vmem:[%s4473_s13] sm:$0xff]  ;;  %vm1975_vm3 = vcmask 261120   ;;  %vm3859_vm4 = vcmask 253952   ;;  %vm3861_vm5 = vcmask 0   ;;  %p4105_p3 = scmp.ne.s32.totalorder %s4321_s21, 1 }
  0x40   : > { %s4508_s26 = scalar_lea.vmem %s6637_s1, %s4104_s20  ;;  %v4621_v56 = vand.u32 4294901760, %v308_v49  ;;  %s4914_s7 = scalar_lea.vmem %s6638_s2, %s4104_s20 }
  0x41   : > { %v341_v2 = vld [vmem:[%s4508_s26 + $0x78] sm:$0xff]  ;;  %v340_v3 = vld [vmem:[%s4508_s26 + $0x70] sm:$0xff]  ;;  %v339_v4 = vld [vmem:[%s4508_s26 + $0x68] sm:$0xff] }
  0x42   : > { %v4513_v5 = vand.u32 4294901760, %v341_v2  ;;  %v4515_v6 = vand.u32 4294901760, %v340_v3  ;;  %v4517_v7 = vand.u32 4294901760, %v339_v4  ;;  %v338_v8 = vld [vmem:[%s4508_s26 + $0x60] sm:$0xff]  ;;  %v337_v9 = vld [vmem:[%s4508_s26 + $0x58] sm:$0xff]  ;;  %v336_v10 = vld [vmem:[%s4508_s26 + $0x50] sm:$0xff] }
  0x43   : > { %v4522_v11 = vand.u32 4294901760, %v338_v8  ;;  %v4524_v12 = vand.u32 4294901760, %v337_v9  ;;  %v4526_v13 = vand.u32 4294901760, %v336_v10  ;;  %v335_v14 = vld [vmem:[%s4508_s26 + $0x48] sm:$0xff]  ;;  %v334_v15 = vld [vmem:[%s4508_s26 + $0x40] sm:$0xff]  ;;  %v333_v23 = vld [vmem:[%s4508_s26 + $0x38] sm:$0xff] }
  0x44   : > { %364 = vmatpush.msra.mxu0 %v4513_v5  ;;  %815 = vmatpush.msra.mxu3 %v4513_v5  ;;  %v4533_v16 = vsub.f32 %v341_v2, %v4513_v5  ;;  %v4536_v17 = vsub.f32 %v340_v3, %v4515_v6  ;;  %v4539_v18 = vsub.f32 %v339_v4, %v4517_v7  ;;  %v4541_v19 = vand.u32 4294901760, %v335_v14  ;;  %v332_v31 = vld [vmem:[%s4508_s26 + $0x30] sm:$0xff]  ;;  %v331_v38 = vld [vmem:[%s4508_s26 + $0x28] sm:$0xff]  ;;  %v330_v44 = vld [vmem:[%s4508_s26 + $0x20] sm:$0xff] }
  0x45   : > { %v4544_v20 = vsub.f32 %v338_v8, %v4522_v11  ;;  %v4547_v21 = vsub.f32 %v337_v9, %v4524_v12  ;;  %v4549_v22 = vand.u32 4294901760, %v334_v15  ;;  %v4558_v27 = vsub.f32 %v336_v10, %v4526_v13  ;;  %v329_v55 = vld [vmem:[%s4508_s26 + $0x18] sm:$0xff]  ;;  %v328_v61 = vld [vmem:[%s4508_s26 + $0x10] sm:$0xff]  ;;  %v327_v3 = vld [vmem:[%s4508_s26 + $0x8] sm:$0xff] }
  0x46   : > { %366 = vmatpush.msra.mxu0 %v4515_v6  ;;  %687 = vmatpush.msra.mxu2 %v4533_v16  ;;  %v526_v24 = vand.u32 4294901760, %v4533_v16  ;;  %v532_v25 = vand.u32 4294901760, %v4536_v17  ;;  %v538_v26 = vand.u32 4294901760, %v4539_v18  ;;  %v4563_v29 = vsub.f32 %v335_v14, %v4541_v19  ;;  %v326_v14 = vld [vmem:[%s4508_s26] sm:$0xff] }
  0x47   : > { %817 = vmatpush.msra.mxu3 %v4515_v6  ;;  %v544_v28 = vand.u32 4294901760, %v4544_v20  ;;  %v550_v30 = vand.u32 4294901760, %v4547_v21  ;;  %v4578_v35 = vand.u32 4294901760, %v333_v23  ;;  %v4585_v37 = vsub.f32 %v334_v15, %v4549_v22 }
  0x48   : > { %368 = vmatpush.msra.mxu0 %v4517_v7  ;;  %690 = vmatpush.msra.mxu2 %v4536_v17  ;;  %v527_v32 = vsub.f32 %v4533_v16, %v526_v24  ;;  %v533_v33 = vsub.f32 %v4536_v17, %v532_v25  ;;  %v539_v34 = vsub.f32 %v4539_v18, %v538_v26  ;;  %v4590_v41 = vand.u32 4294901760, %v332_v31 }
  0x49   : > { %819 = vmatpush.msra.mxu3 %v4517_v7  ;;  %v545_v36 = vsub.f32 %v4544_v20, %v544_v28  ;;  %v556_v42 = vand.u32 4294901760, %v4558_v27  ;;  %v551_v43 = vsub.f32 %v4547_v21, %v550_v30  ;;  %v4600_v46 = vsub.f32 %v333_v23, %v4578_v35 }
  0x4a   : > { %370 = vmatpush.msra.mxu0 %v4522_v11  ;;  %693 = vmatpush.msra.mxu2 %v4539_v18  ;;  %v528_v39 = vand.u32 4294901760, %v527_v32  ;;  %v534_v40 = vand.u32 4294901760, %v533_v33  ;;  %v540_v45 = vand.u32 4294901760, %v539_v34  ;;  %v4602_v47 = vand.u32 4294901760, %v331_v38  ;;  %v309_v32 = vld [vmem:[%s4473_s13 + $0x8] sm:$0xff] }
  0x4b   : > { %821 = vmatpush.msra.mxu3 %v4522_v11  ;;  %v562_v48 = vand.u32 4294901760, %v4563_v29  ;;  %v546_v50 = vand.u32 4294901760, %v545_v36  ;;  %v557_v51 = vsub.f32 %v4558_v27, %v556_v42  ;;  %v4613_v52 = vsub.f32 %v332_v31, %v4590_v41 }
  0x4c   : > { %372 = vmatpush.msra.mxu0 %v4524_v12  ;;  %529 = vmatpush.msra.mxu1 %v528_v39  ;;  %v4615_v53 = vand.u32 4294901760, %v330_v44  ;;  %v568_v54 = vand.u32 4294901760, %v4585_v37  ;;  %v552_v57 = vand.u32 4294901760, %v551_v43  ;;  %v4628_v59 = vsub.f32 %v331_v38, %v4602_v47 }
  0x4d   : > { %696 = vmatpush.msra.mxu2 %v4544_v20  ;;  %823 = vmatpush.msra.mxu3 %v4524_v12  ;;  %v563_v58 = vsub.f32 %v4563_v29, %v562_v48  ;;  %v574_v60 = vand.u32 4294901760, %v4600_v46  ;;  %v4634_v62 = vand.u32 4294901760, %v329_v55  ;;  %v558_v63 = vand.u32 4294901760, %v557_v51  ;;  %v313_v20 = vld [vmem:[%s4473_s13 + $0x28] sm:$0xff] }
  0x4e   : > { %374 = vmatpush.msra.mxu0 %v4526_v13  ;;  %535 = vmatpush.msra.mxu1 %v534_v40  ;;  %v569_v0 = vsub.f32 %v4585_v37, %v568_v54  ;;  %v4641_v1 = vsub.f32 %v330_v44, %v4615_v53  ;;  %v580_v2 = vand.u32 4294901760, %v4613_v52  ;;  %v4647_v4 = vand.u32 4294901760, %v328_v61 }
  0x4f   : > { %699 = vmatpush.msra.mxu2 %v4547_v21  ;;  %825 = vmatpush.msra.mxu3 %v4526_v13  ;;  %v564_v8 = vand.u32 4294901760, %v563_v58  ;;  %v575_v9 = vsub.f32 %v4600_v46, %v574_v60  ;;  %v586_v10 = vand.u32 4294901760, %v4628_v59  ;;  %v4656_v15 = vsub.f32 %v308_v49, %v4621_v56 }
  0x50   : > { %376 = vmatpush.msra.mxu0 %v4541_v19  ;;  %541 = vmatpush.msra.mxu1 %v540_v45  ;;  %v4661_v23 = vsub.f32 %v329_v55, %v4634_v62  ;;  %v4663_v31 = vand.u32 4294901760, %v327_v3  ;;  %v570_v33 = vand.u32 4294901760, %v569_v0  ;;  %v581_v34 = vsub.f32 %v4613_v52, %v580_v2 }
  0x51   : > { %702 = vmatpush.msra.mxu2 %v4558_v27  ;;  %827 = vmatpush.msra.mxu3 %v4541_v19  ;;  %6737 = vst [vmem:[#allocation18_spill] sm:$0xff] %v4656_v15  ;;  %v592_v36 = vand.u32 4294901760, %v4641_v1  ;;  %v4674_v38 = vsub.f32 %v328_v61, %v4647_v4  ;;  %v4676_v39 = vand.u32 4294901760, %v326_v14  ;;  %v576_v40 = vand.u32 4294901760, %v575_v9  ;;  %v310_v9 = vld [vmem:[%s4473_s13 + $0x10] sm:$0xff] }
  0x52   : > { %378 = vmatpush.msra.mxu0 %v4549_v22  ;;  %547 = vmatpush.msra.mxu1 %v546_v50  ;;  %v587_v43 = vsub.f32 %v4628_v59, %v586_v10  ;;  %v4683_v44 = vand.u32 4294901760, %v4656_v15  ;;  %v4685_v45 = vand.u32 4294901760, %v309_v32  ;;  %v4690_v49 = vsub.f32 %v327_v3, %v4663_v31  ;;  %v314_v27 = vld [vmem:[%s4473_s13 + $0x30] sm:$0xff] }
  0x53   : > { %705 = vmatpush.msra.mxu2 %v4563_v29  ;;  %829 = vmatpush.msra.mxu3 %v4549_v22  ;;  %v598_v50 = vand.u32 4294901760, %v4661_v23  ;;  %v582_v51 = vand.u32 4294901760, %v581_v34  ;;  %v593_v55 = vsub.f32 %v4641_v1, %v592_v36  ;;  %v6650_v58 = vand.u32 4294901760, %v4674_v38 }
  0x54   : > { %380 = vmatpush.msra.mxu0 %v4578_v35  ;;  %553 = vmatpush.msra.mxu1 %v552_v57  ;;  %6738 = vst [vmem:[#allocation19_spill] sm:$0xff] %v4683_v44  ;;  %v4700_v57 = vsub.f32 %v326_v14, %v4676_v39  ;;  %v588_v61 = vand.u32 4294901760, %v587_v43  ;;  %v4707_v0 = vsub.f32 %v309_v32, %v4685_v45  ;;  %v4729_v43 = vand.u32 4294901760, %v310_v9 }
  0x55   : > { %708 = vmatpush.msra.mxu2 %v4585_v37  ;;  %831 = vmatpush.msra.mxu3 %v4578_v35  ;;  %v599_v3 = vsub.f32 %v4661_v23, %v598_v50  ;;  %v594_v14 = vand.u32 4294901760, %v593_v55  ;;  %v605_v32 = vsub.f32 %v4674_v38, %v6650_v58  ;;  %v311_v58 = vld [vmem:[%s4473_s13 + $0x18] sm:$0xff]  ;;  %v4811_v21 = vand.u32 4294901760, %v313_v20 }
  0x56   : > { %382 = vmatpush.msra.mxu0 %v4590_v41  ;;  %559 = vmatpush.msra.mxu1 %v558_v63  ;;  %v398_v63 = vsub.f32 %v4656_v15, %v4683_v44  ;;  %6739 = vst [vmem:[#allocation20_spill] sm:$0xff] %v4707_v0  ;;  %v6751_v37 = vand.u32 4294901760, %v4674_v38 }
  0x57   : > { %711 = vmatpush.msra.mxu2 %v4600_v46  ;;  %833 = vmatpush.msra.mxu3 %v4590_v41 }
  0x58   : > { %384 = vmatpush.msra.mxu0 %v4602_v47  ;;  %565 = vmatpush.msra.mxu1 %v564_v8  ;;  %v6649_v8 = vand.u32 4294901760, %v4690_v49  ;;  %v4724_v34 = vand.u32 4294901760, %v398_v63 }
  0x59   : > { %714 = vmatpush.msra.mxu2 %v4613_v52  ;;  %835 = vmatpush.msra.mxu3 %v4602_v47 }
  0x5a   : > { %386 = vmatpush.msra.mxu0 %v4615_v53  ;;  %571 = vmatpush.msra.mxu1 %v570_v33  ;;  %v6651_v33 = vand.u32 4294901760, %v4700_v57  ;;  %v611_v55 = vsub.f32 %v4690_v49, %v6649_v8  ;;  %v4747_v8 = vsub.f32 %v310_v9, %v4729_v43 }
  0x5b   : > { %717 = vmatpush.msra.mxu2 %v4628_v59  ;;  %837 = vmatpush.msra.mxu3 %v4615_v53 }
  0x5c   : > { %388 = vmatpush.msra.mxu0 %v4634_v62  ;;  %577 = vmatpush.msra.mxu1 %v576_v40  ;;  %v4727_v40 = vand.u32 4294901760, %v4707_v0  ;;  %v617_v63 = vsub.f32 %v4700_v57, %v6651_v33  ;;  %6741 = vst [vmem:[#allocation22_spill] sm:$0xff] %v4747_v8  ;;  %v4759_v9 = vand.u32 4294901760, %v4747_v8 }
  0x5d   : > { %720 = vmatpush.msra.mxu2 %v4641_v1  ;;  %839 = vmatpush.msra.mxu3 %v4634_v62 }
  0x5e   : > { %390 = vmatpush.msra.mxu0 %v4647_v4  ;;  %583 = vmatpush.msra.mxu1 %v582_v51  ;;  %6740 = vst [vmem:[#allocation21_spill] sm:$0xff] %v4727_v40  ;;  %v600_v51 = vand.u32 4294901760, %v599_v3  ;;  %v406_v3 = vsub.f32 %v4707_v0, %v4727_v40  ;;  %v414_v16 = vsub.f32 %v4747_v8, %v4759_v9 }
  0x5f   : > { %723 = vmatpush.msra.mxu2 %v4661_v23  ;;  %841 = vmatpush.msra.mxu3 %v4647_v4  ;;  %6742 = vst [vmem:[#allocation23_spill] sm:$0xff] %v4759_v9 }
  0x60   : > { %392 = vmatpush.msra.mxu0 %v4663_v31  ;;  %589 = vmatpush.msra.mxu1 %v588_v61  ;;  %v606_v61 = vand.u32 4294901760, %v605_v32  ;;  %v618_v32 = vand.u32 4294901760, %v617_v63  ;;  %v4754_v33 = vand.u32 4294901760, %v406_v3  ;;  %v4779_v18 = vand.u32 4294901760, %v414_v16  ;;  %v356_v3 = vld [vmem:[%s4914_s7 + $0x68] sm:$0xff] }
  0x61   : > { %726 = vmatpush.msra.mxu2 %v4674_v38  ;;  %843 = vmatpush.msra.mxu3 %v4663_v31  ;;  %v358_v38 = vld [vmem:[%s4914_s7 + $0x78] sm:$0xff] }
  0x62   : > { %394 = vmatpush.msra.mxu0 %v4676_v39  ;;  %595 = vmatpush.msra.mxu1 %v594_v14  ;;  %v612_v14 = vand.u32 4294901760, %v611_v55 }
  0x63   : > { %729 = vmatpush.msra.mxu2 %v4690_v49  ;;  %845 = vmatpush.msra.mxu3 %v4676_v39 }
  0x64   : > { %400 = vmatmul.f32.vlgmr.msra.gmra.mxu0 %v4724_v34  ;;  %849 = vmatmul.f32.vlgmr.msra.gmra.mxu3 %v4683_v44 }
  0x65   : > { %601 = vmatpush.msra.mxu1 %v600_v51  ;;  %732 = vmatpush.msra.mxu2 %v4700_v57  ;;  %v4761_v51 = vand.u32 4294901760, %v311_v58 }
  0x66   : > { %735 = vmatmul.f32.vlgmr.msra.gmra.mxu2 %v4656_v15  ;;  %946 = vmatpush.msrb.mxu0 %v526_v24  ;;  %v312_v24 = vld [vmem:[%s4473_s13 + $0x20] sm:$0xff] }
  0x67   : > { %607 = vmatpush.msra.mxu1 %v606_v61  ;;  %v4770_v17 = vsub.f32 %v311_v58, %v4761_v51 }
  0x68   : > { %950 = vmatpush.msrb.mxu0 %v532_v25 }
  0x69   : > { %613 = vmatpush.msra.mxu1 %v612_v14  ;;  %6743 = vst [vmem:[#allocation24_spill] sm:$0xff] %v4770_v17  ;;  %v4782_v25 = vand.u32 4294901760, %v4770_v17 }
  0x6a   : > { %954 = vmatpush.msrb.mxu0 %v538_v26  ;;  %v4784_v26 = vand.u32 4294901760, %v312_v24 }
  0x6b   : > { %619 = vmatpush.msra.mxu1 %v618_v32  ;;  %6744 = vst [vmem:[#allocation25_spill] sm:$0xff] %v4782_v25 }
  0x6c   : > { %408 = vmatmul.f32.gmra.mxu0 %v4754_v33  ;;  %621 = vmatmul.f32.vlgmr.msra.gmra.mxu1 %v4621_v56 }
  0x6d   : > { %855 = vmatmul.f32.gmra.mxu3 %v4727_v40  ;;  %1073 = vmatpush.msrb.mxu1 %v4513_v5  ;;  %v422_v5 = vsub.f32 %v4770_v17, %v4782_v25  ;;  %v347_v40 = vld [vmem:[%s4914_s7 + $0x20] sm:$0xff] }
  0x6e   : > { %740 = vmatmul.f32.gmra.mxu2 %v4707_v0  ;;  %958 = vmatpush.msrb.mxu0 %v544_v28  ;;  %v4838_v28 = vand.u32 4294901760, %v314_v27 }
  0x6f   : > { %1075 = vmatpush.msrb.mxu1 %v4515_v6  ;;  %v4797_v6 = vsub.f32 %v312_v24, %v4784_v26  ;;  %v4949_v24 = vand.u32 4294901760, %v356_v3 }
  0x70   : > { %962 = vmatpush.msrb.mxu0 %v550_v30  ;;  %6749 = vst [vmem:[#allocation30_spill] sm:$0xff] %v4838_v28  ;;  %v4851_v30 = vsub.f32 %v314_v27, %v4838_v28 }
  0x71   : > { %1077 = vmatpush.msrb.mxu1 %v4517_v7  ;;  %6745 = vst [vmem:[#allocation26_spill] sm:$0xff] %v4797_v6  ;;  %v4806_v7 = vand.u32 4294901760, %v422_v5  ;;  %v355_v5 = vld [vmem:[%s4914_s7 + $0x60] sm:$0xff]  ;;  %v4960_v27 = vsub.f32 %v356_v3, %v4949_v24 }
  0x72   : > { %966 = vmatpush.msrb.mxu0 %v556_v42  ;;  %6750 = vst [vmem:[#allocation31_spill] sm:$0xff] %v4851_v30  ;;  %v4864_v42 = vand.u32 4294901760, %v4851_v30 }
  0x73   : > { %1079 = vmatpush.msrb.mxu1 %v4522_v11  ;;  %v4809_v11 = vand.u32 4294901760, %v4797_v6 }
  0x74   : > { %416 = vmatmul.f32.gmra.mxu0 %v4779_v18  ;;  %625 = vmatmul.f32.gmra.mxu1 %v4685_v45  ;;  %6752 = vst [vmem:[#allocation32_spill] sm:$0xff] %v4864_v42  ;;  %v446_v52 = vsub.f32 %v4851_v30, %v4864_v42 }
  0x75   : > { %861 = vmatmul.f32.gmra.mxu3 %v4759_v9  ;;  %1081 = vmatpush.msrb.mxu1 %v4524_v12  ;;  %6746 = vst [vmem:[#allocation27_spill] sm:$0xff] %v4809_v11  ;;  %v430_v12 = vsub.f32 %v4797_v6, %v4809_v11 }
  0x76   : > { %745 = vmatmul.f32.gmra.mxu2 %v4747_v8  ;;  %970 = vmatpush.msrb.mxu0 %v562_v48  ;;  %v6755_v48 = vand.u32 4294901760, %v4700_v57  ;;  %v4885_v59 = vand.u32 4294901760, %v446_v52  ;;  %v357_v57 = vld [vmem:[%s4914_s7 + $0x70] sm:$0xff]  ;;  %v5093_v8 = vand.u32 4294901760, %v347_v40 }
  0x77   : > { %1083 = vmatpush.msrb.mxu1 %v4526_v13  ;;  %v4824_v13 = vsub.f32 %v313_v20, %v4811_v21  ;;  %v4933_v55 = vand.u32 4294901760, %v357_v57 }
  0x78   : > { %974 = vmatpush.msrb.mxu0 %v568_v54  ;;  %v316_v54 = vld [vmem:[%s4473_s13 + $0x40] sm:$0xff]  ;;  %6757 = vst [vmem:[#allocation35_spill] sm:$0xff] %v4885_v59  ;;  %v5109_v0 = vsub.f32 %v347_v40, %v5093_v8 }
  0x79   : > { %1085 = vmatpush.msrb.mxu1 %v4541_v19  ;;  %6747 = vst [vmem:[#allocation28_spill] sm:$0xff] %v4824_v13  ;;  %v4833_v19 = vand.u32 4294901760, %v430_v12  ;;  %v4947_v16 = vsub.f32 %v357_v57, %v4933_v55 }
  0x7a   : > { %978 = vmatpush.msrb.mxu0 %v574_v60 }
  0x7b   : > { %1087 = vmatpush.msrb.mxu1 %v4549_v22  ;;  %v4836_v22 = vand.u32 4294901760, %v4824_v13  ;;  %v6652_v12 = vand.u32 4294901760, %v4947_v16 }
  0x7c   : > { %424 = vmatmul.f32.gmra.mxu0 %v4806_v7  ;;  %629 = vmatmul.f32.gmra.mxu1 %v4729_v43 }
  0x7d   : > { %867 = vmatmul.f32.gmra.mxu3 %v4782_v25  ;;  %1089 = vmatpush.msrb.mxu1 %v4578_v35  ;;  %6748 = vst [vmem:[#allocation29_spill] sm:$0xff] %v4836_v22  ;;  %v438_v29 = vsub.f32 %v4824_v13, %v4836_v22  ;;  %v315_v35 = vld [vmem:[%s4473_s13 + $0x38] sm:$0xff] }
  0x7e   : > { %750 = vmatmul.f32.gmra.mxu2 %v4770_v17  ;;  %982 = vmatpush.msrb.mxu0 %v580_v2  ;;  %v4866_v46 = vand.u32 4294901760, %v315_v35 }
  0x7f   : > { %1091 = vmatpush.msrb.mxu1 %v4590_v41  ;;  %v4861_v41 = vand.u32 4294901760, %v438_v29  ;;  %v4962_v29 = vand.u32 4294901760, %v355_v5 }
  0x80   : > { %986 = vmatpush.msrb.mxu0 %v586_v10  ;;  %6753 = vst [vmem:[#allocation33_spill] sm:$0xff] %v4866_v46 }
  0x81   : > { %1093 = vmatpush.msrb.mxu1 %v4602_v47  ;;  %v6754_v47 = vand.u32 4294901760, %v4690_v49  ;;  %v318_v49 = vld [vmem:[%s4473_s13 + $0x50] sm:$0xff] }
  0x82   : > { %990 = vmatpush.msrb.mxu0 %v592_v36  ;;  %v4939_v63 = vand.u32 4294901760, %v318_v49 }
  0x83   : > { %1095 = vmatpush.msrb.mxu1 %v4615_v53  ;;  %v4879_v53 = vsub.f32 %v315_v35, %v4866_v46 }
  0x84   : > { %432 = vmatmul.f32.gmra.mxu0 %v4833_v19  ;;  %633 = vmatmul.f32.gmra.mxu1 %v4761_v51  ;;  %6766 = vst [vmem:[#allocation44_spill] sm:$0xff] %v4939_v63 }
  0x85   : > { %873 = vmatmul.f32.gmra.mxu3 %v4809_v11  ;;  %994 = vmatpush.msrb.mxu0 %v598_v50  ;;  %6756 = vst [vmem:[#allocation34_spill] sm:$0xff] %v4879_v53  ;;  %v4888_v60 = vand.u32 4294901760, %v4879_v53  ;;  %v4925_v50 = vand.u32 4294901760, %v358_v38 }
  0x86   : > { %755 = vmatmul.f32.gmra.mxu2 %v4797_v6  ;;  %1097 = vmatpush.msrb.mxu1 %v4634_v62  ;;  %v4890_v62 = vand.u32 4294901760, %v316_v54 }
  0x87   : > { %998 = vmatpush.msrb.mxu0 %v6751_v37  ;;  %6758 = vst [vmem:[#allocation36_spill] sm:$0xff] %v4888_v60  ;;  %v454_v1 = vsub.f32 %v4879_v53, %v4888_v60  ;;  %v4931_v58 = vsub.f32 %v358_v38, %v4925_v50  ;;  %1170 = vmatpush.msrb.mxu2 %v4925_v50 }
  0x88   : > { %1099 = vmatpush.msrb.mxu1 %v4647_v4  ;;  %6759 = vst [vmem:[#allocation37_spill] sm:$0xff] %v4890_v62  ;;  %v4897_v2 = vsub.f32 %v316_v54, %v4890_v62  ;;  %v317_v4 = vld [vmem:[%s4473_s13 + $0x48] sm:$0xff]  ;;  %v4969_v37 = vsub.f32 %v318_v49, %v4939_v63  ;;  %v1339_v54 = vsub.f32 %v4947_v16, %v6652_v12 }
  0x89   : > { %1002 = vmatpush.msrb.mxu0 %v6754_v47  ;;  %v4902_v10 = vand.u32 4294901760, %v317_v4  ;;  %v4904_v23 = vand.u32 4294901760, %v454_v1  ;;  %v6653_v32 = vand.u32 4294901760, %v4931_v58  ;;  %1172 = vmatpush.msrb.mxu2 %v4933_v55  ;;  %v354_v47 = vld [vmem:[%s4914_s7 + $0x58] sm:$0xff]  ;;  %v6655_v1 = vand.u32 4294901760, %v4960_v27 }
  0x8a   : > { %1101 = vmatpush.msrb.mxu1 %v4663_v31  ;;  %6760 = vst [vmem:[#allocation38_spill] sm:$0xff] %v4897_v2  ;;  %v4907_v31 = vand.u32 4294901760, %v4897_v2  ;;  %v4985_v38 = vand.u32 4294901760, %v354_v47  ;;  %v1340_v49 = vand.u32 4294901760, %v1339_v54  ;;  %v4998_v12 = vand.u32 4294901760, %v4969_v37 }
  0x8b   : > { %1006 = vmatpush.msrb.mxu0 %v6755_v48  ;;  %6761 = vst [vmem:[#allocation39_spill] sm:$0xff] %v4902_v10  ;;  %v4917_v36 = vsub.f32 %v317_v4, %v4902_v10  ;;  %v1333_v20 = vsub.f32 %v4931_v58, %v6653_v32  ;;  %1174 = vmatpush.msrb.mxu2 %v4949_v24  ;;  %v319_v48 = vld [vmem:[%s4473_s13 + $0x58] sm:$0xff] }
  0x8c   : > { %440 = vmatmul.f32.gmra.mxu0 %v4861_v41  ;;  %637 = vmatmul.f32.gmra.mxu1 %v4784_v26  ;;  %6762 = vst [vmem:[#allocation40_spill] sm:$0xff] %v4904_v23  ;;  %v4981_v4 = vsub.f32 %v355_v5, %v4962_v29  ;;  %v1345_v57 = vsub.f32 %v4960_v27, %v6655_v1  ;;  %v5000_v32 = vand.u32 4294901760, %v319_v48 }
  0x8d   : > { %879 = vmatmul.f32.gmra.mxu3 %v4836_v22  ;;  %1103 = vmatpush.msrb.mxu1 %v4676_v39  ;;  %6763 = vst [vmem:[#allocation41_spill] sm:$0xff] %v4907_v31  ;;  %v462_v39 = vsub.f32 %v4897_v2, %v4907_v31  ;;  %v4937_v61 = vand.u32 4294901760, %v4917_v36  ;;  %v1334_v52 = vand.u32 4294901760, %v1333_v20 }
  0x8e   : > { %760 = vmatmul.f32.gmra.mxu2 %v4824_v13  ;;  %6764 = vst [vmem:[#allocation42_spill] sm:$0xff] %v4917_v36  ;;  %1493 = vmatpush.msra.mxu0 %v4931_v58  ;;  %v6658_v3 = vand.u32 4294901760, %v4981_v4  ;;  %v1346_v54 = vand.u32 4294901760, %v1345_v57  ;;  %v349_v13 = vld [vmem:[%s4914_s7 + $0x30] sm:$0xff] }
  0x8f   : > { %1621 = vmatpush.msra.mxu1 %v4925_v50  ;;  %6765 = vst [vmem:[#allocation43_spill] sm:$0xff] %v4937_v61  ;;  %v4943_v14 = vand.u32 4294901760, %v462_v39  ;;  %v470_v35 = vsub.f32 %v4917_v36, %v4937_v61  ;;  %1176 = vmatpush.msrb.mxu2 %v4962_v29  ;;  %v353_v39 = vld [vmem:[%s4914_s7 + $0x50] sm:$0xff] }
  0x90   : > { %1496 = vmatpush.msra.mxu0 %v4947_v16  ;;  %6768 = vst [vmem:[#allocation46_spill] sm:$0xff] %v4969_v37  ;;  %1335 = vmatpush.msrb.mxu3 %v1334_v52  ;;  %v4993_v5 = vand.u32 4294901760, %v353_v39  ;;  %v352_v52 = vld [vmem:[%s4914_s7 + $0x48] sm:$0xff] }
  0x91   : > { %6767 = vst [vmem:[#allocation45_spill] sm:$0xff] %v4943_v14  ;;  %1623 = vmatpush.msra.mxu1 %v4933_v55  ;;  %v4995_v20 = vand.u32 4294901760, %v470_v35  ;;  %1178 = vmatpush.msrb.mxu2 %v4985_v38  ;;  %v1351_v35 = vsub.f32 %v4981_v4, %v6658_v3 }
  0x92   : > { %6770 = vst [vmem:[#allocation48_spill] sm:$0xff] %v4998_v12  ;;  %1499 = vmatpush.msra.mxu0 %v4960_v27  ;;  %1341 = vmatpush.msrb.mxu3 %v1340_v49  ;;  %v5012_v1 = vsub.f32 %v353_v39, %v4993_v5 }
  0x93   : > { %1625 = vmatpush.msra.mxu1 %v4949_v24  ;;  %6769 = vst [vmem:[#allocation47_spill] sm:$0xff] %v4995_v20  ;;  %1180 = vmatpush.msrb.mxu2 %v4993_v5  ;;  %v1352_v49 = vand.u32 4294901760, %v1351_v35  ;;  %v350_v35 = vld [vmem:[%s4914_s7 + $0x38] sm:$0xff] }
  0x94   : > { %448 = vmatmul.f32.gmra.mxu0 %v4885_v59  ;;  %641 = vmatmul.f32.gmra.mxu1 %v4811_v21  ;;  %v6666_v57 = vand.u32 4294901760, %v5012_v1 }
  0x95   : > { %885 = vmatmul.f32.gmra.mxu3 %v4864_v42  ;;  %1627 = vmatpush.msra.mxu1 %v4962_v29  ;;  %v5031_v42 = vsub.f32 %v319_v48, %v5000_v32 }
  0x96   : > { %765 = vmatmul.f32.gmra.mxu2 %v4851_v30  ;;  %1502 = vmatpush.msra.mxu0 %v4981_v4  ;;  %v1363_v22 = vsub.f32 %v5012_v1, %v6666_v57 }
  0x97   : > { %1347 = vmatpush.msrb.mxu3 %v1346_v54  ;;  %1629 = vmatpush.msra.mxu1 %v4985_v38  ;;  %6771 = vst [vmem:[#allocation49_spill] sm:$0xff] %v5031_v42 }
  0x98   : > { %v1364_v25 = vand.u32 4294901760, %v1363_v22  ;;  %v348_v22 = vld [vmem:[%s4914_s7 + $0x28] sm:$0xff] }
  0x99   : > { %1353 = vmatpush.msrb.mxu3 %v1352_v49  ;;  %v5078_v9 = vand.u32 4294901760, %v348_v22  ;;  %1631 = vmatpush.msra.mxu1 %v4993_v5 }
  0x9c   : > { %456 = vmatmul.f32.gmra.mxu0 %v4904_v23  ;;  %645 = vmatmul.f32.gmra.mxu1 %v4838_v28  ;;  %v6781_v28 = vand.u32 4294901760, %v4931_v58 }
  0x9d   : > { %891 = vmatmul.f32.gmra.mxu3 %v4888_v60  ;;  %v5014_v60 = vand.u32 4294901760, %v352_v52 }
  0x9e   : > { %770 = vmatmul.f32.gmra.mxu2 %v4879_v53 }
  0x9f   : > { %v5023_v39 = vsub.f32 %v352_v52, %v5014_v60  ;;  %1182 = vmatpush.msrb.mxu2 %v5014_v60  ;;  %v320_v52 = vld [vmem:[%s4473_s13 + $0x60] sm:$0xff]  ;;  %1633 = vmatpush.msra.mxu1 %v5014_v60 }
  0xa1   : > { %v6670_v48 = vand.u32 4294901760, %v5023_v39 }
  0xa3   : > { %v1369_v57 = vsub.f32 %v5023_v39, %v6670_v48 }
  0xa4   : > { %464 = vmatmul.f32.gmra.mxu0 %v4943_v14  ;;  %649 = vmatmul.f32.gmra.mxu1 %v4866_v46  ;;  %v343_v14 = vld [vmem:[%s4914_s7] sm:$0xff] }
  0xa5   : > { %897 = vmatmul.f32.gmra.mxu3 %v4907_v31  ;;  %v5003_v31 = vsub.f32 %v354_v47, %v4985_v38  ;;  %v478_v47 = vsub.f32 %v4969_v37, %v4998_v12 }
  0xa6   : > { %775 = vmatmul.f32.gmra.mxu2 %v4897_v2  ;;  %v351_v2 = vld [vmem:[%s4914_s7 + $0x40] sm:$0xff] }
  0xa7   : > { %v5025_v3 = vand.u32 4294901760, %v351_v2  ;;  %v6772_v53 = vand.u32 4294901760, %v5003_v31  ;;  %1505 = vmatpush.msra.mxu0 %v5003_v31  ;;  %v5072_v49 = vand.u32 4294901760, %v478_v47 }
  0xa9   : > { %v1357_v54 = vsub.f32 %v5003_v31, %v6772_v53  ;;  %v5047_v30 = vsub.f32 %v351_v2, %v5025_v3  ;;  %v5049_v53 = vand.u32 4294901760, %v350_v35  ;;  %1184 = vmatpush.msrb.mxu2 %v5025_v3  ;;  %1508 = vmatpush.msra.mxu0 %v5012_v1  ;;  %6774 = vst [vmem:[#allocation51_spill] sm:$0xff] %v5072_v49 }
  0xaa   : > { %1635 = vmatpush.msra.mxu1 %v5025_v3 }
  0xab   : > { %v1358_v11 = vand.u32 4294901760, %v1357_v54  ;;  %v6674_v2 = vand.u32 4294901760, %v5047_v30  ;;  %v5060_v6 = vsub.f32 %v350_v35, %v5049_v53  ;;  %v5065_v54 = vand.u32 4294901760, %v320_v52  ;;  %1186 = vmatpush.msrb.mxu2 %v5049_v53  ;;  %1511 = vmatpush.msra.mxu0 %v5023_v39 }
  0xac   : > { %472 = vmatmul.f32.gmra.mxu0 %v4995_v20  ;;  %653 = vmatmul.f32.gmra.mxu1 %v4890_v62  ;;  %v345_v20 = vld [vmem:[%s4914_s7 + $0x10] sm:$0xff] }
  0xad   : > { %903 = vmatmul.f32.gmra.mxu3 %v4937_v61  ;;  %v5063_v61 = vand.u32 4294901760, %v5031_v42  ;;  %v1375_v35 = vsub.f32 %v5047_v30, %v6674_v2  ;;  %v6677_v48 = vand.u32 4294901760, %v5060_v6  ;;  %v5091_v2 = vsub.f32 %v348_v22, %v5078_v9  ;;  %1514 = vmatpush.msra.mxu0 %v5047_v30 }
  0xae   : > { %780 = vmatmul.f32.gmra.mxu2 %v4917_v36  ;;  %v5068_v36 = vand.u32 4294901760, %v349_v13  ;;  %1359 = vmatpush.msrb.mxu3 %v1358_v11  ;;  %v1370_v11 = vand.u32 4294901760, %v1369_v57  ;;  %v5099_v44 = vsub.f32 %v320_v52, %v5065_v54  ;;  %v346_v57 = vld [vmem:[%s4914_s7 + $0x18] sm:$0xff] }
  0xaf   : > { %6773 = vst [vmem:[#allocation50_spill] sm:$0xff] %v5063_v61  ;;  %v1381_v47 = vsub.f32 %v5060_v6, %v6677_v48  ;;  %v1376_v22 = vand.u32 4294901760, %v1375_v35  ;;  %v5111_v52 = vand.u32 4294901760, %v346_v57  ;;  %1517 = vmatpush.msra.mxu0 %v5060_v6  ;;  %1637 = vmatpush.msra.mxu1 %v5049_v53 }
  0xb0   : > { %v5082_v17 = vsub.f32 %v349_v13, %v5068_v36  ;;  %1188 = vmatpush.msrb.mxu2 %v5068_v36  ;;  %1365 = vmatpush.msrb.mxu3 %v1364_v25  ;;  %v486_v13 = vsub.f32 %v5031_v42, %v5063_v61  ;;  %v321_v25 = vld [vmem:[%s4473_s13 + $0x68] sm:$0xff] }
  0xb1   : > { %v1382_v15 = vand.u32 4294901760, %v1381_v47  ;;  %v344_v47 = vld [vmem:[%s4914_s7 + $0x8] sm:$0xff]  ;;  %1639 = vmatpush.msra.mxu1 %v5068_v36 }
  0xb2   : > { %1190 = vmatpush.msrb.mxu2 %v5078_v9  ;;  %1371 = vmatpush.msrb.mxu3 %v1370_v11  ;;  %v6775_v35 = vand.u32 4294901760, %v5082_v17  ;;  %v5133_v11 = vand.u32 4294901760, %v5099_v44 }
  0xb3   : > { %1520 = vmatpush.msra.mxu0 %v5082_v17  ;;  %1641 = vmatpush.msra.mxu1 %v5078_v9 }
  0xb4   : > { %480 = vmatmul.f32.gmra.mxu0 %v5072_v49  ;;  %657 = vmatmul.f32.gmra.mxu1 %v4902_v10  ;;  %v1387_v48 = vsub.f32 %v5082_v17, %v6775_v35  ;;  %v5123_v49 = vsub.f32 %v346_v57, %v5111_v52  ;;  %v5125_v10 = vand.u32 4294901760, %v345_v20  ;;  %v6777_v35 = vand.u32 4294901760, %v5091_v2 }
  0xb5   : > { %909 = vmatmul.f32.gmra.mxu3 %v4998_v12  ;;  %1192 = vmatpush.msrb.mxu2 %v5093_v8  ;;  %v5127_v12 = vand.u32 4294901760, %v486_v13  ;;  %v5145_v13 = vand.u32 4294901760, %v344_v47 }
  0xb6   : > { %785 = vmatmul.f32.gmra.mxu2 %v4969_v37  ;;  %v5135_v37 = vand.u32 4294901760, %v321_v25  ;;  %1377 = vmatpush.msrb.mxu3 %v1376_v22  ;;  %v1393_v57 = vsub.f32 %v5091_v2, %v6777_v35  ;;  %v5141_v40 = vsub.f32 %v345_v20, %v5125_v10  ;;  %v1388_v62 = vand.u32 4294901760, %v1387_v48 }
  0xb7   : > { %6776 = vst [vmem:[#allocation52_spill] sm:$0xff] %v5127_v12  ;;  %1194 = vmatpush.msrb.mxu2 %v5111_v52  ;;  %v6778_v22 = vand.u32 4294901760, %v5109_v0  ;;  %v5153_v20 = vand.u32 4294901760, %v343_v14  ;;  %v5157_v46 = vsub.f32 %v344_v47, %v5145_v13  ;;  %v322_v47 = vld [vmem:[%s4473_s13 + $0x70] sm:$0xff]  ;;  %1523 = vmatpush.msra.mxu0 %v5091_v2 }
  0xb8   : > { %1383 = vmatpush.msrb.mxu3 %v1382_v15  ;;  %v494_v15 = vsub.f32 %v5099_v44, %v5133_v11  ;;  %v5166_v48 = vsub.f32 %v321_v25, %v5135_v37  ;;  %1643 = vmatpush.msra.mxu1 %v5093_v8 }
  0xb9   : > { %1196 = vmatpush.msrb.mxu2 %v5125_v10  ;;  %v1399_v23 = vsub.f32 %v5109_v0, %v6778_v22  ;;  %v1394_v22 = vand.u32 4294901760, %v1393_v57  ;;  %v5178_v25 = vsub.f32 %v343_v14, %v5153_v20  ;;  %1526 = vmatpush.msra.mxu0 %v5109_v0 }
  0xba   : > { %1389 = vmatpush.msrb.mxu3 %v1388_v62  ;;  %v5182_v57 = vand.u32 4294901760, %v494_v15  ;;  %v5185_v35 = vand.u32 4294901760, %v5166_v48  ;;  %v5187_v62 = vand.u32 4294901760, %v322_v47  ;;  %v6782_v15 = vand.u32 4294901760, %v5157_v46  ;;  %1645 = vmatpush.msra.mxu1 %v5111_v52 }
  0xbb   : > { %1198 = vmatpush.msrb.mxu2 %v5145_v13  ;;  %1529 = vmatpush.msra.mxu0 %v5123_v49 }
  0xbc   : > { %488 = vmatmul.f32.gmra.mxu0 %v5127_v12  ;;  %661 = vmatmul.f32.gmra.mxu1 %v4939_v63  ;;  %v1400_v12 = vand.u32 4294901760, %v1399_v23  ;;  %v6779_v63 = vand.u32 4294901760, %v5123_v49  ;;  %v6780_v23 = vand.u32 4294901760, %v5141_v40 }
  0xbd   : > { %915 = vmatmul.f32.gmra.mxu3 %v5063_v61  ;;  %1200 = vmatpush.msrb.mxu2 %v5153_v20  ;;  %v1417_v61 = vsub.f32 %v5157_v46, %v6782_v15  ;;  %v6785_v15 = vand.u32 4294901760, %v4981_v4 }
  0xbe   : > { %790 = vmatmul.f32.gmra.mxu2 %v5031_v42  ;;  %v1405_v59 = vsub.f32 %v5123_v49, %v6779_v63  ;;  %1395 = vmatpush.msrb.mxu3 %v1394_v22  ;;  %v1411_v63 = vsub.f32 %v5141_v40, %v6780_v23  ;;  %v1422_v22 = vand.u32 4294901760, %v5178_v25  ;;  %v6783_v42 = vand.u32 4294901760, %v4947_v16 }
  0xbf   : > { %1752 = vmatpush.msra.mxu2 %v6781_v28  ;;  %v502_v28 = vsub.f32 %v5166_v48, %v5185_v35  ;;  %v1418_v16 = vand.u32 4294901760, %v1417_v61  ;;  %1532 = vmatpush.msra.mxu0 %v5141_v40  ;;  %v6786_v61 = vand.u32 4294901760, %v5003_v31 }
  0xc0   : > { %1401 = vmatpush.msrb.mxu3 %v1400_v12  ;;  %v1406_v14 = vand.u32 4294901760, %v1405_v59  ;;  %v5209_v59 = vsub.f32 %v322_v47, %v5187_v62  ;;  %v1412_v58 = vand.u32 4294901760, %v1411_v63  ;;  %v323_v12 = vld [vmem:[%s4473_s13 + $0x78] sm:$0xff]  ;;  %v1423_v23 = vsub.f32 %v5178_v25, %v1422_v22  ;;  %1647 = vmatpush.msra.mxu1 %v5125_v10 }
  0xc1   : > { %1756 = vmatpush.msra.mxu2 %v6783_v42  ;;  %v6784_v42 = vand.u32 4294901760, %v4960_v27  ;;  %v5222_v47 = vand.u32 4294901760, %v502_v28  ;;  %v5227_v27 = vand.u32 4294901760, %v323_v12  ;;  %1535 = vmatpush.msra.mxu0 %v5157_v46 }
  0xc2   : > { %1407 = vmatpush.msrb.mxu3 %v1406_v14  ;;  %v5225_v63 = vand.u32 4294901760, %v5209_v59  ;;  %v1424_v4 = vand.u32 4294901760, %v1423_v23  ;;  %1649 = vmatpush.msra.mxu1 %v5145_v13  ;;  %v6787_v14 = vand.u32 4294901760, %v5012_v1  ;;  %v6789_v1 = vand.u32 4294901760, %v5047_v30 }
  0xc3   : > { %1760 = vmatpush.msra.mxu2 %v6784_v42  ;;  %1538 = vmatpush.msra.mxu0 %v5178_v25  ;;  %v5242_v31 = vsub.f32 %v323_v12, %v5227_v27  ;;  %v6791_v12 = vand.u32 4294901760, %v5082_v17 }
  0xc4   : > { %496 = vmatmul.f32.gmra.mxu0 %v5182_v57  ;;  %665 = vmatmul.f32.gmra.mxu1 %v5000_v32  ;;  %v510_v28 = vsub.f32 %v5209_v59, %v5225_v63 }
  0xc5   : > { %921 = vmatmul.f32.gmra.mxu3 %v5133_v11  ;;  %1764 = vmatpush.msra.mxu2 %v6785_v15 }
  0xc6   : > { %795 = vmatmul.f32.gmra.mxu2 %v5099_v44  ;;  %1413 = vmatpush.msrb.mxu3 %v1412_v58  ;;  %v6788_v58 = vand.u32 4294901760, %v5023_v39  ;;  %v5251_v42 = vand.u32 4294901760, %v510_v28  ;;  %v6790_v39 = vand.u32 4294901760, %v5060_v6  ;;  %v6793_v6 = vand.u32 4294901760, %v5109_v0 }
  0xc7   : > { %1768 = vmatpush.msra.mxu2 %v6786_v61  ;;  %1651 = vmatpush.msra.mxu1 %v5153_v20  ;;  %v6796_v0 = vand.u32 4294901760, %v5157_v46 }
  0xc8   : > { %1419 = vmatpush.msrb.mxu3 %v1418_v16  ;;  %v5254_v16 = vand.u32 4294901760, %v5242_v31 }
  0xc9   : > { %1772 = vmatpush.msra.mxu2 %v6787_v14 }
  0xca   : > { %1425 = vmatpush.msrb.mxu3 %v1424_v4  ;;  %v518_v30 = vsub.f32 %v5242_v31, %v5254_v16 }
  0xcb   : > { %1776 = vmatpush.msra.mxu2 %v6788_v58 }
  0xcc   : > { %504 = vmatmul.f32.gmra.mxu0 %v5222_v47  ;;  %669 = vmatmul.f32.gmra.mxu1 %v5065_v54  ;;  %v5274_v17 = vand.u32 4294901760, %v518_v30 }
  0xcd   : > { %927 = vmatmul.f32.gmra.mxu3 %v5185_v35  ;;  %1780 = vmatpush.msra.mxu2 %v6789_v1 }
  0xce   : > { %800 = vmatmul.f32.gmra.mxu2 %v5166_v48  ;;  %1879 = vmatpush.msra.mxu3 %v4925_v50  ;;  %v6792_v50 = vand.u32 4294901760, %v5091_v2 }
  0xcf   : > { %1784 = vmatpush.msra.mxu2 %v6790_v39 }
  0xd0   : > { %1881 = vmatpush.msra.mxu3 %v4933_v55  ;;  %v6794_v55 = vand.u32 4294901760, %v5123_v49 }
  0xd1   : > { %1788 = vmatpush.msra.mxu2 %v6791_v12 }
  0xd2   : > { %1883 = vmatpush.msra.mxu3 %v4949_v24  ;;  %v6795_v24 = vand.u32 4294901760, %v5141_v40 }
  0xd3   : > { %1792 = vmatpush.msra.mxu2 %v6792_v50 }
  0xd4   : > { %512 = vmatmul.f32.gmra.mxu0 %v5251_v42  ;;  %673 = vmatmul.f32.gmra.mxu1 %v5135_v37 }
  0xd5   : > { %933 = vmatmul.f32.gmra.mxu3 %v5225_v63  ;;  %1796 = vmatpush.msra.mxu2 %v6793_v6 }
  0xd6   : > { %805 = vmatmul.f32.gmra.mxu2 %v5209_v59  ;;  %1885 = vmatpush.msra.mxu3 %v4962_v29 }
  0xd7   : > { %1800 = vmatpush.msra.mxu2 %v6794_v55 }
  0xd8   : > { %1887 = vmatpush.msra.mxu3 %v4985_v38 }
  0xd9   : > { %1804 = vmatpush.msra.mxu2 %v6795_v24 }
  0xda   : > { %1889 = vmatpush.msra.mxu3 %v4993_v5 }
  0xdb   : > { %1808 = vmatpush.msra.mxu2 %v6796_v0 }
  0xdc   : > { %520 = vmatmul.f32.gmra.mxu0 %v5274_v17  ;;  %677 = vmatmul.f32.gmra.mxu1 %v5187_v62 }
  0xdd   : > { %939 = vmatmul.f32.gmra.mxu3 %v5254_v16  ;;  %1812 = vmatpush.msra.mxu2 %v1422_v22 }
  0xde   : > { %810 = vmatmul.f32.gmra.mxu2 %v5242_v31  ;;  %1891 = vmatpush.msra.mxu3 %v5014_v60 }
  0xe0   : > { %1893 = vmatpush.msra.mxu3 %v5025_v3 }
  0xe1   : > { %v401_v29 = vpop.f32.mrf.mxu0 }
  0xe2   : > { %1895 = vmatpush.msra.mxu3 %v5049_v53 }
  0xe4   : > { %681 = vmatmul.f32.gmra.mxu1 %v5227_v27  ;;  %1008 = vmatmul.f32.vlgmr.msrb.gmra.mxu0 %v4621_v56 }
  0xe5   : > { %1427 = vmatmul.f32.vlgmr.msrb.gmra.mxu3 %v4621_v56 }
  0xe6   : > { %1206 = vmatmul.f32.vlgmr.msrb.gmra.mxu2 %v4724_v34  ;;  %1897 = vmatpush.msra.mxu3 %v5068_v36 }
  0xe7   : > { %v850_v46 = vpop.f32.mrf.mxu3 }
  0xe8   : > { %1899 = vmatpush.msra.mxu3 %v5078_v9 }
  0xe9   : > { %v409_v60 = vpop.f32.mrf.mxu0  ;;  %v622_v38 = vpop.f32.mrf.mxu1 }
  0xea   : > { %v623_v5 = vadd.f32 %v622_v38, %v401_v29  ;;  %v736_v3 = vpop.f32.mrf.mxu2  ;;  %1901 = vmatpush.msra.mxu3 %v5093_v8  ;;  %v6798_v38 = vld [vmem:[#allocation35_spill] sm:$0xff] }
  0xec   : > { %v737_v53 = vadd.f32 %v736_v3, %v623_v5  ;;  %1012 = vmatmul.f32.gmra.mxu0 %v4685_v45  ;;  %1105 = vmatmul.f32.vlgmr.msrb.gmra.mxu1 %v4621_v56 }
  0xed   : > { %1431 = vmatmul.f32.gmra.mxu3 %v4685_v45 }
  0xee   : > { %1214 = vmatmul.f32.gmra.mxu2 %v4754_v33  ;;  %1903 = vmatpush.msra.mxu3 %v5111_v52  ;;  %v5305_v34 = vadd.f32 %v850_v46, %v737_v53 }
  0xf0   : > { %v856_v9 = vpop.f32.mrf.mxu3  ;;  %1905 = vmatpush.msra.mxu3 %v5125_v10 }
  0xf1   : > { %v417_v36 = vpop.f32.mrf.mxu0  ;;  %v626_v2 = vpop.f32.mrf.mxu1 }
  0xf2   : > { %v627_v49 = vadd.f32 %v626_v2, %v409_v60  ;;  %v741_v8 = vpop.f32.mrf.mxu2  ;;  %1907 = vmatpush.msra.mxu3 %v5145_v13  ;;  %v6797_v60 = vld [vmem:[#allocation30_spill] sm:$0xff] }
  0xf4   : > { %v742_v40 = vadd.f32 %v741_v8, %v627_v49  ;;  %1016 = vmatmul.f32.gmra.mxu0 %v4729_v43  ;;  %1109 = vmatmul.f32.gmra.mxu1 %v4685_v45  ;;  %v6799_v49 = vld [vmem:[#allocation33_spill] sm:$0xff]  ;;  %v6800_v8 = vld [vmem:[#allocation40_spill] sm:$0xff] }
  0xf5   : > { %1435 = vmatmul.f32.gmra.mxu3 %v4729_v43 }
  0xf6   : > { %1222 = vmatmul.f32.gmra.mxu2 %v4779_v18  ;;  %1909 = vmatpush.msra.mxu3 %v5153_v20  ;;  %v5314_v33 = vadd.f32 %v856_v9, %v742_v40 }
  0xf8   : > { %v862_v10 = vpop.f32.mrf.mxu3 }
  0xf9   : > { %v425_v52 = vpop.f32.mrf.mxu0  ;;  %v630_v25 = vpop.f32.mrf.mxu1 }
  0xfa   : > { %v631_v22 = vadd.f32 %v630_v25, %v417_v36  ;;  %v746_v23 = vpop.f32.mrf.mxu2 }
  0xfc   : > { %v747_v15 = vadd.f32 %v746_v23, %v631_v22  ;;  %1020 = vmatmul.f32.gmra.mxu0 %v4761_v51  ;;  %1113 = vmatmul.f32.gmra.mxu1 %v4729_v43 }
  0xfd   : > { %1439 = vmatmul.f32.gmra.mxu3 %v4761_v51 }
  0xfe   : > { %1230 = vmatmul.f32.gmra.mxu2 %v4806_v7  ;;  %v5320_v13 = vadd.f32 %v862_v10, %v747_v15 }
 0x100   : > { %v868_v18 = vpop.f32.mrf.mxu3 }
 0x101   : > { %v433_v20 = vpop.f32.mrf.mxu0  ;;  %v634_v61 = vpop.f32.mrf.mxu1 }
 0x102   : > { %v635_v4 = vadd.f32 %v634_v61, %v425_v52  ;;  %v751_v14 = vpop.f32.mrf.mxu2 }
 0x104   : > { %v752_v28 = vadd.f32 %v751_v14, %v635_v4  ;;  %1024 = vmatmul.f32.gmra.mxu0 %v4784_v26  ;;  %1117 = vmatmul.f32.gmra.mxu1 %v4761_v51 }
 0x105   : > { %1443 = vmatmul.f32.gmra.mxu3 %v4784_v26 }
 0x106   : > { %1238 = vmatmul.f32.gmra.mxu2 %v4833_v19  ;;  %v5326_v58 = vadd.f32 %v868_v18, %v752_v28  ;;  %v6801_v18 = vld [vmem:[#allocation37_spill] sm:$0xff] }
 0x108   : > { %v874_v1 = vpop.f32.mrf.mxu3 }
 0x109   : > { %v441_v7 = vpop.f32.mrf.mxu0  ;;  %v638_v39 = vpop.f32.mrf.mxu1 }
 0x10a   : > { %v639_v12 = vadd.f32 %v638_v39, %v433_v20  ;;  %v756_v30 = vpop.f32.mrf.mxu2  ;;  %v6802_v20 = vld [vmem:[#allocation45_spill] sm:$0xff] }
 0x10c   : > { %v757_v50 = vadd.f32 %v756_v30, %v639_v12  ;;  %1028 = vmatmul.f32.gmra.mxu0 %v4811_v21  ;;  %1121 = vmatmul.f32.gmra.mxu1 %v4784_v26  ;;  %v6803_v12 = vld [vmem:[#allocation39_spill] sm:$0xff] }
 0x10d   : > { %1447 = vmatmul.f32.gmra.mxu3 %v4811_v21  ;;  %v6804_v30 = vld [vmem:[#allocation47_spill] sm:$0xff] }
 0x10e   : > { %1246 = vmatmul.f32.gmra.mxu2 %v4861_v41  ;;  %v5332_v6 = vadd.f32 %v874_v1, %v757_v50 }
 0x110   : > { %v880_v55 = vpop.f32.mrf.mxu3 }
 0x111   : > { %v449_v19 = vpop.f32.mrf.mxu0  ;;  %v642_v24 = vpop.f32.mrf.mxu1 }
 0x112   : > { %v643_v0 = vadd.f32 %v642_v24, %v441_v7  ;;  %v761_v29 = vpop.f32.mrf.mxu2 }
 0x114   : > { %v762_v46 = vadd.f32 %v761_v29, %v643_v0  ;;  %1032 = vmatmul.f32.gmra.mxu0 %v6797_v60  ;;  %1125 = vmatmul.f32.gmra.mxu1 %v4811_v21 }
 0x115   : > { %1451 = vmatmul.f32.gmra.mxu3 %v6797_v60 }
 0x116   : > { %1254 = vmatmul.f32.gmra.mxu2 %v6798_v38  ;;  %v5338_v5 = vadd.f32 %v880_v55, %v762_v46  ;;  %v6805_v38 = vld [vmem:[#allocation44_spill] sm:$0xff] }
 0x118   : > { %v886_v3 = vpop.f32.mrf.mxu3 }
 0x119   : > { %v457_v41 = vpop.f32.mrf.mxu0  ;;  %v646_v53 = vpop.f32.mrf.mxu1 }
 0x11a   : > { %v647_v9 = vadd.f32 %v646_v53, %v449_v19  ;;  %v766_v36 = vpop.f32.mrf.mxu2 }
 0x11c   : > { %v767_v2 = vadd.f32 %v766_v36, %v647_v9  ;;  %1036 = vmatmul.f32.gmra.mxu0 %v6799_v49  ;;  %1129 = vmatmul.f32.gmra.mxu1 %v6797_v60 }
 0x11d   : > { %1455 = vmatmul.f32.gmra.mxu3 %v6799_v49 }
 0x11e   : > { %1262 = vmatmul.f32.gmra.mxu2 %v6800_v8  ;;  %v5344_v40 = vadd.f32 %v886_v3, %v767_v2  ;;  %v6806_v3 = vld [vmem:[#allocation51_spill] sm:$0xff] }
 0x120   : > { %v892_v10 = vpop.f32.mrf.mxu3 }
 0x121   : > { %v465_v52 = vpop.f32.mrf.mxu0  ;;  %v650_v25 = vpop.f32.mrf.mxu1 }
 0x122   : > { %v651_v22 = vadd.f32 %v650_v25, %v457_v41  ;;  %v771_v23 = vpop.f32.mrf.mxu2 }
 0x124   : > { %v772_v15 = vadd.f32 %v771_v23, %v651_v22  ;;  %1040 = vmatmul.f32.gmra.mxu0 %v6801_v18  ;;  %1133 = vmatmul.f32.gmra.mxu1 %v6799_v49 }
 0x125   : > { %1459 = vmatmul.f32.gmra.mxu3 %v6801_v18 }
 0x126   : > { %1270 = vmatmul.f32.gmra.mxu2 %v6802_v20  ;;  %v5350_v61 = vadd.f32 %v892_v10, %v772_v15 }
 0x128   : > { %v898_v4 = vpop.f32.mrf.mxu3 }
 0x129   : > { %v473_v14 = vpop.f32.mrf.mxu0  ;;  %v654_v28 = vpop.f32.mrf.mxu1 }
 0x12a   : > { %v655_v1 = vadd.f32 %v654_v28, %v465_v52  ;;  %v776_v7 = vpop.f32.mrf.mxu2  ;;  %v6808_v52 = vld [vmem:[#allocation52_spill] sm:$0xff] }
 0x12c   : > { %v777_v39 = vadd.f32 %v776_v7, %v655_v1  ;;  %1044 = vmatmul.f32.gmra.mxu0 %v6803_v12  ;;  %1137 = vmatmul.f32.gmra.mxu1 %v6801_v18 }
 0x12d   : > { %1463 = vmatmul.f32.gmra.mxu3 %v6803_v12 }
 0x12e   : > { %1278 = vmatmul.f32.gmra.mxu2 %v6804_v30  ;;  %v5356_v50 = vadd.f32 %v898_v4, %v777_v39 }
 0x130   : > { %v904_v55 = vpop.f32.mrf.mxu3 }
 0x131   : > { %v481_v19 = vpop.f32.mrf.mxu0  ;;  %v658_v24 = vpop.f32.mrf.mxu1 }
 0x132   : > { %v659_v0 = vadd.f32 %v658_v24, %v473_v14  ;;  %v781_v29 = vpop.f32.mrf.mxu2 }
 0x134   : > { %v782_v46 = vadd.f32 %v781_v29, %v659_v0  ;;  %1048 = vmatmul.f32.gmra.mxu0 %v6805_v38  ;;  %1141 = vmatmul.f32.gmra.mxu1 %v6803_v12 }
 0x135   : > { %1467 = vmatmul.f32.gmra.mxu3 %v6805_v38 }
 0x136   : > { %1286 = vmatmul.f32.gmra.mxu2 %v6806_v3  ;;  %v5362_v41 = vadd.f32 %v904_v55, %v782_v46 }
 0x138   : > { %6807 = vst [vmem:[#allocation30_spill] sm:$0xff] %v5362_v41  ;;  %v910_v53 = vpop.f32.mrf.mxu3 }
 0x139   : > { %v489_v9 = vpop.f32.mrf.mxu0  ;;  %v662_v36 = vpop.f32.mrf.mxu1 }
 0x13a   : > { %v663_v2 = vadd.f32 %v662_v36, %v481_v19  ;;  %v786_v8 = vpop.f32.mrf.mxu2 }
 0x13c   : > { %v787_v10 = vadd.f32 %v786_v8, %v663_v2  ;;  %1052 = vmatmul.f32.gmra.mxu0 %v5000_v32  ;;  %1145 = vmatmul.f32.gmra.mxu1 %v6805_v38 }
 0x13d   : > { %1471 = vmatmul.f32.gmra.mxu3 %v5000_v32 }
 0x13e   : > { %1294 = vmatmul.f32.gmra.mxu2 %v6808_v52  ;;  %v5368_v25 = vadd.f32 %v910_v53, %v787_v10 }
 0x140   : > { %6809 = vst [vmem:[#allocation35_spill] sm:$0xff] %v5368_v25  ;;  %v916_v22 = vpop.f32.mrf.mxu3 }
 0x141   : > { %v497_v23 = vpop.f32.mrf.mxu0  ;;  %v666_v15 = vpop.f32.mrf.mxu1 }
 0x142   : > { %v667_v20 = vadd.f32 %v666_v15, %v489_v9  ;;  %v791_v4 = vpop.f32.mrf.mxu2  ;;  %v362_v9 = vld [vmem:[%s6639_s3 + $0x18] sm:$0xff] }
 0x144   : > { %v792_v14 = vadd.f32 %v791_v4, %v667_v20  ;;  %1056 = vmatmul.f32.gmra.mxu0 %v5065_v54  ;;  %1149 = vmatmul.f32.gmra.mxu1 %v5000_v32 }
 0x145   : > { %1475 = vmatmul.f32.gmra.mxu3 %v5065_v54 }
 0x146   : > { %1302 = vmatmul.f32.gmra.mxu2 %v5182_v57  ;;  %v5374_v28 = vadd.f32 %v916_v22, %v792_v14 }
 0x148   : > { %6810 = vst [vmem:[#allocation33_spill] sm:$0xff] %v5374_v28  ;;  %v922_v1 = vpop.f32.mrf.mxu3 }
 0x149   : > { %v505_v7 = vpop.f32.mrf.mxu0  ;;  %v670_v39 = vpop.f32.mrf.mxu1 }
 0x14a   : > { %v671_v30 = vadd.f32 %v670_v39, %v497_v23  ;;  %v796_v55 = vpop.f32.mrf.mxu2 }
 0x14c   : > { %v797_v19 = vadd.f32 %v796_v55, %v671_v30  ;;  %1060 = vmatmul.f32.gmra.mxu0 %v5135_v37  ;;  %1153 = vmatmul.f32.gmra.mxu1 %v5065_v54 }
 0x14d   : > { %1479 = vmatmul.f32.gmra.mxu3 %v5135_v37 }
 0x14e   : > { %1310 = vmatmul.f32.gmra.mxu2 %v5222_v47  ;;  %v5380_v24 = vadd.f32 %v922_v1, %v797_v19  ;;  %v5389_v47 = vand.u32 4294901760, %v362_v9 }
 0x150   : > { %6811 = vst [vmem:[#allocation40_spill] sm:$0xff] %v5380_v24  ;;  %v928_v0 = vpop.f32.mrf.mxu3  ;;  %2037 = vmatpush.msrb.mxu0 %v5389_v47  ;;  %v5395_v8 = vsub.f32 %v362_v9, %v5389_v47  ;;  %2392 = vmatpush.msrb.mxu3 %v5389_v47  ;;  %v6816_v9 = vld [vmem:[#allocation20_spill] sm:$0xff] }
 0x151   : > { %v513_v57 = vpop.f32.mrf.mxu0  ;;  %v674_v29 = vpop.f32.mrf.mxu1 }
 0x152   : > { %v675_v46 = vadd.f32 %v674_v29, %v505_v7  ;;  %v801_v3 = vpop.f32.mrf.mxu2  ;;  %v6701_v15 = vand.u32 4294901760, %v5395_v8  ;;  %2288 = vmatpush.msrb.mxu2 %v5395_v8 }
 0x154   : > { %v802_v53 = vadd.f32 %v801_v3, %v675_v46  ;;  %1064 = vmatmul.f32.gmra.mxu0 %v5187_v62  ;;  %1157 = vmatmul.f32.gmra.mxu1 %v5135_v37  ;;  %v2188_v20 = vsub.f32 %v5395_v8, %v6701_v15 }
 0x155   : > { %1483 = vmatmul.f32.gmra.mxu3 %v5187_v62 }
 0x156   : > { %1318 = vmatmul.f32.gmra.mxu2 %v5251_v42  ;;  %v5391_v36 = vadd.f32 %v928_v0, %v802_v53  ;;  %v2189_v4 = vand.u32 4294901760, %v2188_v20  ;;  %v6814_v0 = vld [vmem:[#allocation18_spill] sm:$0xff] }
 0x158   : > { %6812 = vst [vmem:[#allocation37_spill] sm:$0xff] %v5391_v36  ;;  %v934_v2 = vpop.f32.mrf.mxu3  ;;  %2190 = vmatpush.msrb.mxu1 %v2189_v4  ;;  %v6818_v4 = vld [vmem:[#allocation22_spill] sm:$0xff] }
 0x159   : > { %v521_v10 = vpop.f32.mrf.mxu0  ;;  %v678_v52 = vpop.f32.mrf.mxu1 }
 0x15a   : > { %v679_v22 = vadd.f32 %v678_v52, %v513_v57  ;;  %v806_v23 = vpop.f32.mrf.mxu2 }
 0x15c   : > { %v807_v42 = vadd.f32 %v806_v23, %v679_v22  ;;  %1068 = vmatmul.f32.gmra.mxu0 %v5227_v27  ;;  %1161 = vmatmul.f32.gmra.mxu1 %v5187_v62 }
 0x15d   : > { %1487 = vmatmul.f32.gmra.mxu3 %v5227_v27 }
 0x15e   : > { %1326 = vmatmul.f32.gmra.mxu2 %v5274_v17  ;;  %v5407_v14 = vadd.f32 %v934_v2, %v807_v42  ;;  %v6817_v2 = vld [vmem:[#allocation19_spill] sm:$0xff] }
 0x160   : > { %6813 = vst [vmem:[#allocation45_spill] sm:$0xff] %v5407_v14  ;;  %v940_v1 = vpop.f32.mrf.mxu3 }
 0x161   : > { %v682_v7 = vpop.f32.mrf.mxu1  ;;  %v5409_v39 = vpop.f32.mrf.mxu0 }
 0x162   : > { %v683_v30 = vadd.f32 %v682_v7, %v521_v10  ;;  %v811_v55 = vpop.f32.mrf.mxu2 }
 0x164   : > { %v812_v19 = vadd.f32 %v811_v55, %v683_v30  ;;  %1165 = vmatmul.f32.gmra.mxu1 %v5227_v27  ;;  %1541 = vmatmul.f32.vlgmr.msra.gmra.mxu0 %v6814_v0 }
 0x165   : > { %1911 = vmatmul.f32.vlgmr.msra.gmra.mxu3 %v4621_v56 }
 0x166   : > { %1814 = vmatmul.f32.vlgmr.msra.gmra.mxu2 %v4621_v56  ;;  %v5415_v17 = vadd.f32 %v940_v1, %v812_v19  ;;  %v361_v56 = vld [vmem:[%s6639_s3 + $0x10] sm:$0xff]  ;;  %v6819_v1 = vld [vmem:[#allocation21_spill] sm:$0xff] }
 0x167   : > { %v5430_v52 = vand.u32 4294901760, %v361_v56 }
 0x168   : > { %6815 = vst [vmem:[#allocation39_spill] sm:$0xff] %v5415_v17  ;;  %v1428_v57 = vpop.f32.mrf.mxu3 }
 0x169   : > { %v5417_v29 = vpop.f32.mrf.mxu0  ;;  %v5419_v46 = vpop.f32.mrf.mxu1  ;;  %2039 = vmatpush.msrb.mxu0 %v5430_v52  ;;  %v5438_v20 = vsub.f32 %v361_v56, %v5430_v52  ;;  %2394 = vmatpush.msrb.mxu3 %v5430_v52  ;;  %v6821_v56 = vld [vmem:[#allocation23_spill] sm:$0xff] }
 0x16a   : > { %v1207_v3 = vpop.f32.mrf.mxu2 }
 0x16b   : > { %v5421_v53 = vadd.f32 %v1428_v57, %v1207_v3  ;;  %v6700_v7 = vand.u32 4294901760, %v5438_v20  ;;  %2291 = vmatpush.msrb.mxu2 %v5438_v20 }
 0x16c   : > { %1546 = vmatmul.f32.gmra.mxu0 %v6816_v9  ;;  %1655 = vmatmul.f32.vlgmr.msra.gmra.mxu1 %v6817_v2  ;;  %v6820_v2 = vld [vmem:[#allocation24_spill] sm:$0xff] }
 0x16d   : > { %1915 = vmatmul.f32.gmra.mxu3 %v4685_v45  ;;  %v2194_v30 = vsub.f32 %v5438_v20, %v6700_v7  ;;  %v6824_v7 = vld [vmem:[#allocation28_spill] sm:$0xff] }
 0x16e   : > { %1818 = vmatmul.f32.gmra.mxu2 %v4685_v45 }
 0x16f   : > { %v2195_v19 = vand.u32 4294901760, %v2194_v30  ;;  %v6822_v30 = vld [vmem:[#allocation26_spill] sm:$0xff] }
 0x170   : > { %v1432_v10 = vpop.f32.mrf.mxu3 }
 0x171   : > { %v5432_v22 = vpop.f32.mrf.mxu0  ;;  %v5434_v23 = vpop.f32.mrf.mxu1  ;;  %2196 = vmatpush.msrb.mxu1 %v2195_v19 }
 0x172   : > { %v1215_v42 = vpop.f32.mrf.mxu2 }
 0x173   : > { %v5441_v45 = vadd.f32 %v1432_v10, %v1215_v42 }
 0x174   : > { %1551 = vmatmul.f32.gmra.mxu0 %v6818_v4  ;;  %1661 = vmatmul.f32.gmra.mxu1 %v6819_v1 }
 0x175   : > { %1919 = vmatmul.f32.gmra.mxu3 %v4729_v43 }
 0x176   : > { %1822 = vmatmul.f32.gmra.mxu2 %v4729_v43 }
 0x178   : > { %v1436_v55 = vpop.f32.mrf.mxu3 }
 0x179   : > { %v5452_v0 = vpop.f32.mrf.mxu0  ;;  %v5454_v57 = vpop.f32.mrf.mxu1 }
 0x17a   : > { %v1223_v3 = vpop.f32.mrf.mxu2 }
 0x17b   : > { %v5456_v9 = vadd.f32 %v1436_v55, %v1223_v3  ;;  %v6823_v55 = vld [vmem:[#allocation25_spill] sm:$0xff] }
 0x17c   : > { %1556 = vmatmul.f32.gmra.mxu0 %v6820_v2  ;;  %1667 = vmatmul.f32.gmra.mxu1 %v6821_v56 }
 0x17d   : > { %1923 = vmatmul.f32.gmra.mxu3 %v4761_v51 }
 0x17e   : > { %1826 = vmatmul.f32.gmra.mxu2 %v4761_v51 }
 0x180   : > { %v1440_v43 = vpop.f32.mrf.mxu3 }
 0x181   : > { %v5462_v10 = vpop.f32.mrf.mxu0  ;;  %v5464_v42 = vpop.f32.mrf.mxu1 }
 0x182   : > { %v1231_v4 = vpop.f32.mrf.mxu2 }
 0x183   : > { %v5466_v1 = vadd.f32 %v1440_v43, %v1231_v4  ;;  %v6825_v43 = vld [vmem:[#allocation27_spill] sm:$0xff] }
 0x184   : > { %1561 = vmatmul.f32.gmra.mxu0 %v6822_v30  ;;  %1673 = vmatmul.f32.gmra.mxu1 %v6823_v55 }
 0x185   : > { %1927 = vmatmul.f32.gmra.mxu3 %v4784_v26 }
 0x186   : > { %1830 = vmatmul.f32.gmra.mxu2 %v4784_v26  ;;  %v360_v26 = vld [vmem:[%s6639_s3 + $0x8] sm:$0xff] }
 0x187   : > { %v5485_v30 = vand.u32 4294901760, %v360_v26 }
 0x188   : > { %v1444_v19 = vpop.f32.mrf.mxu3 }
 0x189   : > { %v5472_v3 = vpop.f32.mrf.mxu0  ;;  %v5474_v51 = vpop.f32.mrf.mxu1  ;;  %2041 = vmatpush.msrb.mxu0 %v5485_v30  ;;  %2396 = vmatpush.msrb.mxu3 %v5485_v30 }
 0x18a   : > { %v1239_v2 = vpop.f32.mrf.mxu2 }
 0x18b   : > { %v5476_v56 = vadd.f32 %v1444_v19, %v1239_v2 }
 0x18c   : > { %1566 = vmatmul.f32.gmra.mxu0 %v6824_v7  ;;  %1679 = vmatmul.f32.gmra.mxu1 %v6825_v43  ;;  %v2198_v7 = vsub.f32 %v360_v26, %v5485_v30  ;;  %v6828_v43 = vld [vmem:[#allocation29_spill] sm:$0xff] }
 0x18d   : > { %1931 = vmatmul.f32.gmra.mxu3 %v4811_v21 }
 0x18e   : > { %1834 = vmatmul.f32.gmra.mxu2 %v4811_v21  ;;  %v6827_v21 = vld [vmem:[#allocation31_spill] sm:$0xff]  ;;  %v2199_v17 = vand.u32 4294901760, %v2198_v7 }
 0x18f   : > { %2294 = vmatpush.msrb.mxu2 %v2198_v7 }
 0x190   : > { %v1448_v4 = vpop.f32.mrf.mxu3  ;;  %v2200_v14 = vsub.f32 %v2198_v7, %v2199_v17 }
 0x191   : > { %v5487_v55 = vpop.f32.mrf.mxu0  ;;  %v5489_v15 = vpop.f32.mrf.mxu1 }
 0x192   : > { %v1247_v19 = vpop.f32.mrf.mxu2  ;;  %v2201_v24 = vand.u32 4294901760, %v2200_v14 }
 0x193   : > { %v5494_v2 = vadd.f32 %v1448_v4, %v1247_v19  ;;  %v6830_v19 = vld [vmem:[#allocation34_spill] sm:$0xff] }
 0x194   : > { %1571 = vmatmul.f32.gmra.mxu0 %v6827_v21  ;;  %1685 = vmatmul.f32.gmra.mxu1 %v6828_v43  ;;  %v6831_v21 = vld [vmem:[#allocation32_spill] sm:$0xff] }
 0x195   : > { %6826 = vst [vmem:[#allocation47_spill] sm:$0xff] %v5494_v2  ;;  %1935 = vmatmul.f32.gmra.mxu3 %v6797_v60  ;;  %2202 = vmatpush.msrb.mxu1 %v2201_v24  ;;  %v6833_v2 = vld [vmem:[#allocation38_spill] sm:$0xff] }
 0x196   : > { %1838 = vmatmul.f32.gmra.mxu2 %v6797_v60 }
 0x198   : > { %v1452_v36 = vpop.f32.mrf.mxu3 }
 0x199   : > { %v5500_v28 = vpop.f32.mrf.mxu0  ;;  %v5502_v26 = vpop.f32.mrf.mxu1 }
 0x19a   : > { %v1255_v25 = vpop.f32.mrf.mxu2 }
 0x19b   : > { %v5504_v4 = vadd.f32 %v1452_v36, %v1255_v25  ;;  %v6834_v25 = vld [vmem:[#allocation36_spill] sm:$0xff] }
 0x19c   : > { %1576 = vmatmul.f32.gmra.mxu0 %v6830_v19  ;;  %1691 = vmatmul.f32.gmra.mxu1 %v6831_v21 }
 0x19d   : > { %6829 = vst [vmem:[#allocation44_spill] sm:$0xff] %v5504_v4  ;;  %1939 = vmatmul.f32.gmra.mxu3 %v6799_v49  ;;  %v6837_v4 = vld [vmem:[#allocation42_spill] sm:$0xff] }
 0x19e   : > { %1842 = vmatmul.f32.gmra.mxu2 %v6799_v49 }
 0x1a0   : > { %v1456_v60 = vpop.f32.mrf.mxu3 }
 0x1a1   : > { %v5510_v7 = vpop.f32.mrf.mxu0  ;;  %v5512_v14 = vpop.f32.mrf.mxu1 }
 0x1a2   : > { %v1263_v43 = vpop.f32.mrf.mxu2 }
 0x1a3   : > { %v5514_v41 = vadd.f32 %v1456_v60, %v1263_v43  ;;  %v6838_v60 = vld [vmem:[#allocation41_spill] sm:$0xff] }
 0x1a4   : > { %1581 = vmatmul.f32.gmra.mxu0 %v6833_v2  ;;  %1697 = vmatmul.f32.gmra.mxu1 %v6834_v25 }
 0x1a5   : > { %6832 = vst [vmem:[#allocation51_spill] sm:$0xff] %v5514_v41  ;;  %1943 = vmatmul.f32.gmra.mxu3 %v6801_v18 }
 0x1a6   : > { %1846 = vmatmul.f32.gmra.mxu2 %v6801_v18  ;;  %v359_v18 = vld [vmem:[%s6639_s3] sm:$0xff] }
 0x1a7   : > { %v2042_v43 = vand.u32 4294901760, %v359_v18 }
 0x1a8   : > { %v1460_v24 = vpop.f32.mrf.mxu3 }
 0x1a9   : > { %v5520_v36 = vpop.f32.mrf.mxu0  ;;  %v5522_v49 = vpop.f32.mrf.mxu1  ;;  %2043 = vmatpush.msrb.mxu0 %v2042_v43  ;;  %2398 = vmatpush.msrb.mxu3 %v2042_v43 }
 0x1aa   : > { %6835 = vst [vmem:[#allocation52_spill] sm:$0xff] %v5520_v36  ;;  %v1271_v19 = vpop.f32.mrf.mxu2 }
 0x1ab   : > { %v5524_v21 = vadd.f32 %v1460_v24, %v1271_v19  ;;  %v2204_v19 = vsub.f32 %v359_v18, %v2042_v43 }
 0x1ac   : > { %1586 = vmatmul.f32.gmra.mxu0 %v6837_v4  ;;  %1703 = vmatmul.f32.gmra.mxu1 %v6838_v60  ;;  %v6841_v60 = vand.u32 4294901760, %v5395_v8 }
 0x1ad   : > { %6836 = vst [vmem:[#allocation18_spill] sm:$0xff] %v5524_v21  ;;  %1947 = vmatmul.f32.gmra.mxu3 %v6803_v12  ;;  %v6843_v21 = vld [vmem:[#allocation43_spill] sm:$0xff]  ;;  %v2205_v36 = vand.u32 4294901760, %v2204_v19  ;;  %2297 = vmatpush.msrb.mxu2 %v2204_v19 }
 0x1ae   : > { %1850 = vmatmul.f32.gmra.mxu2 %v6803_v12  ;;  %2511 = vmatpush.msra.mxu0 %v6841_v60  ;;  %v6842_v12 = vld [vmem:[#allocation46_spill] sm:$0xff] }
 0x1b0   : > { %v1464_v2 = vpop.f32.mrf.mxu3 }
 0x1b1   : > { %v5533_v25 = vpop.f32.mrf.mxu0  ;;  %v5535_v41 = vpop.f32.mrf.mxu1 }
 0x1b2   : > { %6839 = vst [vmem:[#allocation20_spill] sm:$0xff] %v5533_v25  ;;  %v1279_v24 = vpop.f32.mrf.mxu2  ;;  %v2206_v25 = vsub.f32 %v2204_v19, %v2205_v36 }
 0x1b3   : > { %6840 = vst [vmem:[#allocation19_spill] sm:$0xff] %v5535_v41  ;;  %v5537_v4 = vadd.f32 %v1464_v2, %v1279_v24  ;;  %v6844_v41 = vand.u32 4294901760, %v5438_v20 }
 0x1b4   : > { %1591 = vmatmul.f32.gmra.mxu0 %v6842_v12  ;;  %1709 = vmatmul.f32.gmra.mxu1 %v6843_v21  ;;  %v2207_v2 = vand.u32 4294901760, %v2206_v25  ;;  %v6845_v12 = vld [vmem:[#allocation49_spill] sm:$0xff]  ;;  %v6847_v25 = vld [vmem:[#allocation50_spill] sm:$0xff] }
 0x1b5   : > { %1951 = vmatmul.f32.gmra.mxu3 %v6805_v38  ;;  %2515 = vmatpush.msra.mxu0 %v6844_v41 }
 0x1b6   : > { %1854 = vmatmul.f32.gmra.mxu2 %v6805_v38  ;;  %2208 = vmatpush.msrb.mxu1 %v2207_v2  ;;  %v6846_v38 = vld [vmem:[#allocation48_spill] sm:$0xff] }
 0x1b7   : > { %2519 = vmatpush.msra.mxu0 %v2199_v17 }
 0x1b8   : > { %v1468_v18 = vpop.f32.mrf.mxu3  ;;  %2602 = vmatpush.msra.mxu1 %v5389_v47 }
 0x1b9   : > { %v5547_v24 = vpop.f32.mrf.mxu0  ;;  %v5549_v8 = vpop.f32.mrf.mxu1  ;;  %2523 = vmatpush.msra.mxu0 %v2205_v36 }
 0x1ba   : > { %v1287_v60 = vpop.f32.mrf.mxu2  ;;  %2604 = vmatpush.msra.mxu1 %v5430_v52  ;;  %v1010_v52 = vadd.f32 %v5409_v39, %v5305_v34 }
 0x1bb   : > { %v5551_v21 = vadd.f32 %v1468_v18, %v1287_v60 }
 0x1bc   : > { %1596 = vmatmul.f32.gmra.mxu0 %v6845_v12  ;;  %1715 = vmatmul.f32.gmra.mxu1 %v6846_v38  ;;  %v5577_v18 = vadd.f32 %v5419_v46, %v1010_v52 }
 0x1bd   : > { %1955 = vmatmul.f32.gmra.mxu3 %v5000_v32  ;;  %2606 = vmatpush.msra.mxu1 %v5485_v30 }
 0x1be   : > { %1858 = vmatmul.f32.gmra.mxu2 %v5000_v32  ;;  %6848 = vst [vmem:[#allocation22_spill] sm:$0xff] %v5577_v18 }
 0x1bf   : > { %2608 = vmatpush.msra.mxu1 %v2042_v43 }
 0x1c0   : > { %v1472_v41 = vpop.f32.mrf.mxu3 }
 0x1c1   : > { %v5560_v17 = vpop.f32.mrf.mxu0  ;;  %v5562_v20 = vpop.f32.mrf.mxu1 }
 0x1c2   : > { %v1295_v36 = vpop.f32.mrf.mxu2 }
 0x1c3   : > { %v5564_v47 = vadd.f32 %v1472_v41, %v1295_v36 }
 0x1c4   : > { %1601 = vmatmul.f32.gmra.mxu0 %v5099_v44  ;;  %1721 = vmatmul.f32.gmra.mxu1 %v6847_v25  ;;  %v1977_v44 = vsel %vm1975_vm3, %v5577_v18, 0 }
 0x1c5   : > { %1959 = vmatmul.f32.gmra.mxu3 %v5065_v54  ;;  %v5593_v60 = vand.u32 4294901760, %v1977_v44 }
 0x1c6   : > { %1862 = vmatmul.f32.gmra.mxu2 %v5065_v54  ;;  %v1014_v54 = vadd.f32 %v5417_v29, %v5314_v33 }
 0x1c8   : > { %v1476_v32 = vpop.f32.mrf.mxu3 }
 0x1c9   : > { %v5572_v30 = vpop.f32.mrf.mxu0  ;;  %v5574_v19 = vpop.f32.mrf.mxu1 }
 0x1ca   : > { %v1303_v43 = vpop.f32.mrf.mxu2 }
 0x1cb   : > { %v5579_v2 = vadd.f32 %v1476_v32, %v1303_v43 }
 0x1cc   : > { %1606 = vmatmul.f32.gmra.mxu0 %v5166_v48  ;;  %1727 = vmatmul.f32.gmra.mxu1 %v5133_v11  ;;  %v5596_v48 = vadd.f32 %v5434_v23, %v1014_v54  ;;  %v1018_v23 = vadd.f32 %v5432_v22, %v5320_v13 }
 0x1cd   : > { %1963 = vmatmul.f32.gmra.mxu3 %v5135_v37 }
 0x1ce   : > { %1866 = vmatmul.f32.gmra.mxu2 %v5135_v37  ;;  %6849 = vst [vmem:[#allocation21_spill] sm:$0xff] %v5596_v48  ;;  %v2045_v37 = vsub.f32 %v1977_v44, %v5593_v60  ;;  %v1980_v33 = vsel %vm1975_vm3, %v5596_v48, 0  ;;  %v5616_v25 = vadd.f32 %v5454_v57, %v1018_v23  ;;  %v1022_v57 = vadd.f32 %v5452_v0, %v5326_v58 }
 0x1cf   : > { %v5609_v38 = vand.u32 4294901760, %v1980_v33 }
 0x1d0   : > { %v1480_v34 = vpop.f32.mrf.mxu3  ;;  %6850 = vst [vmem:[#allocation24_spill] sm:$0xff] %v5616_v25  ;;  %v1983_v22 = vsel %vm1975_vm3, %v5616_v25, 0 }
 0x1d1   : > { %v5589_v39 = vpop.f32.mrf.mxu0  ;;  %v5591_v46 = vpop.f32.mrf.mxu1 }
 0x1d2   : > { %v1311_v11 = vpop.f32.mrf.mxu2 }
 0x1d3   : > { %v5598_v12 = vadd.f32 %v1480_v34, %v1311_v11  ;;  %v5634_v11 = vadd.f32 %v5464_v42, %v1022_v57 }
 0x1d4   : > { %1611 = vmatmul.f32.gmra.mxu0 %v5209_v59  ;;  %1733 = vmatmul.f32.gmra.mxu1 %v5185_v35  ;;  %v2046_v35 = vand.u32 4294901760, %v2045_v37 }
 0x1d5   : > { %1967 = vmatmul.f32.gmra.mxu3 %v5187_v62  ;;  %6851 = vst [vmem:[#allocation23_spill] sm:$0xff] %v5634_v11  ;;  %v1986_v0 = vsel %vm1975_vm3, %v5634_v11, 0 }
 0x1d6   : > { %1870 = vmatmul.f32.gmra.mxu2 %v5187_v62  ;;  %v2053_v62 = vsub.f32 %v1980_v33, %v5609_v38  ;;  %v2047_v13 = vsub.f32 %v2045_v37, %v2046_v35  ;;  %v5645_v57 = vand.u32 4294901760, %v1986_v0 }
 0x1d8   : > { %v1484_v29 = vpop.f32.mrf.mxu3  ;;  %v2048_v54 = vand.u32 4294901760, %v2047_v13 }
 0x1d9   : > { %v5611_v41 = vpop.f32.mrf.mxu0  ;;  %v5613_v59 = vpop.f32.mrf.mxu1 }
 0x1da   : > { %v1319_v36 = vpop.f32.mrf.mxu2 }
 0x1db   : > { %v5618_v32 = vadd.f32 %v1484_v29, %v1319_v36  ;;  %v1026_v29 = vadd.f32 %v5462_v10, %v5332_v6  ;;  %v2069_v6 = vsub.f32 %v1986_v0, %v5645_v57 }
 0x1dc   : > { %1616 = vmatmul.f32.gmra.mxu0 %v5242_v31  ;;  %1739 = vmatmul.f32.gmra.mxu1 %v5225_v63  ;;  %v2054_v31 = vand.u32 4294901760, %v2053_v62  ;;  %v5631_v63 = vand.u32 4294901760, %v1983_v22 }
 0x1dd   : > { %1971 = vmatmul.f32.gmra.mxu3 %v5227_v27 }
 0x1de   : > { %1874 = vmatmul.f32.gmra.mxu2 %v5227_v27  ;;  %v2055_v27 = vsub.f32 %v2053_v62, %v2054_v31  ;;  %v2061_v58 = vsub.f32 %v1983_v22, %v5631_v63 }
 0x1e0   : > { %v1488_v52 = vpop.f32.mrf.mxu3 }
 0x1e1   : > { %v5629_v43 = vpop.f32.mrf.mxu1  ;;  %v1542_v44 = vpop.f32.mrf.mxu0 }
 0x1e2   : > { %v1327_v34 = vpop.f32.mrf.mxu2  ;;  %v1543_v23 = vadd.f32 %v1542_v44, %v5421_v53 }
 0x1e3   : > { %v5636_v33 = vadd.f32 %v1488_v52, %v1327_v34  ;;  %v2056_v52 = vand.u32 4294901760, %v2055_v27  ;;  %v1030_v27 = vadd.f32 %v5472_v3, %v5338_v5 }
 0x1e4   : > { %1745 = vmatmul.f32.gmra.mxu1 %v5254_v16  ;;  %2049 = vmatmul.f32.vlgmr.msrb.gmra.mxu0 %v2048_v54  ;;  %v5648_v16 = vadd.f32 %v5474_v51, %v1026_v29 }
 0x1e5   : > { %2402 = vmatmul.f32.vlgmr.msrb.gmra.mxu3 %v2046_v35 }
 0x1e6   : > { %2300 = vmatmul.f32.vlgmr.msrb.gmra.mxu2 %v2045_v37  ;;  %6852 = vst [vmem:[#allocation26_spill] sm:$0xff] %v5648_v16  ;;  %v2062_v37 = vand.u32 4294901760, %v2061_v58  ;;  %v1989_v53 = vsel %vm1975_vm3, %v5648_v16, 0 }
 0x1e7   : > { %v5659_v29 = vand.u32 4294901760, %v1989_v53 }
 0x1e8   : > { %v1912_v42 = vpop.f32.mrf.mxu3  ;;  %v2063_v44 = vsub.f32 %v2061_v58, %v2062_v37 }
 0x1e9   : > { %v1547_v36 = vpop.f32.mrf.mxu0  ;;  %v1656_v13 = vpop.f32.mrf.mxu1 }
 0x1ea   : > { %v1657_v35 = vadd.f32 %v1656_v13, %v1543_v23  ;;  %v1815_v22 = vpop.f32.mrf.mxu2  ;;  %v1548_v51 = vadd.f32 %v1547_v36, %v5441_v45  ;;  %v2064_v0 = vand.u32 4294901760, %v2063_v44  ;;  %v2077_v45 = vsub.f32 %v1989_v53, %v5659_v29 }
 0x1eb   : > { %v1034_v53 = vadd.f32 %v5487_v55, %v5344_v40 }
 0x1ec   : > { %v1816_v54 = vadd.f32 %v1815_v22, %v1657_v35  ;;  %2057 = vmatmul.f32.gmra.mxu0 %v2056_v52  ;;  %2210 = vmatmul.f32.vlgmr.msrb.gmra.mxu1 %v5593_v60  ;;  %v2070_v35 = vand.u32 4294901760, %v2069_v6  ;;  %v5662_v22 = vadd.f32 %v5489_v15, %v1030_v27 }
 0x1ed   : > { %2408 = vmatmul.f32.gmra.mxu3 %v2054_v31 }
 0x1ee   : > { %v5654_v10 = vadd.f32 %v1912_v42, %v1816_v54  ;;  %2305 = vmatmul.f32.gmra.mxu2 %v2053_v62  ;;  %6853 = vst [vmem:[#allocation25_spill] sm:$0xff] %v5662_v22  ;;  %v2071_v5 = vsub.f32 %v2069_v6, %v2070_v35  ;;  %v1992_v3 = vsel %vm1975_vm3, %v5662_v22, 0 }
 0x1ef   : > { %v5677_v27 = vand.u32 4294901760, %v1992_v3 }
 0x1f0   : > { %v1916_v34 = vpop.f32.mrf.mxu3  ;;  %v3821_v36 = vsel %vm1975_vm3, %v5654_v10, 0.0 }
 0x1f1   : > { %v1552_v23 = vpop.f32.mrf.mxu0  ;;  %v1662_v13 = vpop.f32.mrf.mxu1  ;;  %v2085_v40 = vsub.f32 %v1992_v3, %v5677_v27 }
 0x1f2   : > { %v1663_v31 = vadd.f32 %v1662_v13, %v1548_v51  ;;  %v1819_v52 = vpop.f32.mrf.mxu2  ;;  %v1553_v15 = vadd.f32 %v1552_v23, %v5456_v9 }
 0x1f4   : > { %v1820_v42 = vadd.f32 %v1819_v52, %v1663_v31  ;;  %2065 = vmatmul.f32.gmra.mxu0 %v2064_v0  ;;  %2214 = vmatmul.f32.gmra.mxu1 %v5609_v38  ;;  %v2072_v52 = vand.u32 4294901760, %v2071_v5  ;;  %v5680_v0 = vadd.f32 %v5502_v26, %v1034_v53 }
 0x1f5   : > { %2414 = vmatmul.f32.gmra.mxu3 %v2062_v37 }
 0x1f6   : > { %v5666_v62 = vadd.f32 %v1916_v34, %v1820_v42  ;;  %2310 = vmatmul.f32.gmra.mxu2 %v2061_v58  ;;  %v2078_v58 = vand.u32 4294901760, %v2077_v45  ;;  %6854 = vst [vmem:[#allocation28_spill] sm:$0xff] %v5680_v0  ;;  %v1995_v42 = vsel %vm1975_vm3, %v5680_v0, 0 }
 0x1f7   : > { %v5693_v3 = vand.u32 4294901760, %v1995_v42 }
 0x1f8   : > { %v3822_v54 = vsel %vm1975_vm3, %v5666_v62, 0.0  ;;  %v1920_v44 = vpop.f32.mrf.mxu3  ;;  %v2079_v23 = vsub.f32 %v2077_v45, %v2078_v58 }
 0x1f9   : > { %v3823_v37 = vadd.f32 %v3822_v54, %v3821_v36  ;;  %v1557_v51 = vpop.f32.mrf.mxu0  ;;  %v1668_v34 = vpop.f32.mrf.mxu1 }
 0x1fa   : > { %v1669_v13 = vadd.f32 %v1668_v34, %v1553_v15  ;;  %v1823_v31 = vpop.f32.mrf.mxu2  ;;  %v1558_v36 = vadd.f32 %v1557_v51, %v5466_v1  ;;  %v1038_v15 = vadd.f32 %v5500_v28, %v5350_v61  ;;  %v2080_v34 = vand.u32 4294901760, %v2079_v23 }
 0x1fb   : > { %v2093_v61 = vsub.f32 %v1995_v42, %v5693_v3 }
 0x1fc   : > { %v1824_v9 = vadd.f32 %v1823_v31, %v1669_v13  ;;  %2073 = vmatmul.f32.gmra.mxu0 %v2072_v52  ;;  %2218 = vmatmul.f32.gmra.mxu1 %v5631_v63  ;;  %v2086_v31 = vand.u32 4294901760, %v2085_v40  ;;  %v5697_v1 = vadd.f32 %v5512_v14, %v1038_v15  ;;  %v1042_v14 = vadd.f32 %v5510_v7, %v5356_v50 }
 0x1fd   : > { %2420 = vmatmul.f32.gmra.mxu3 %v2070_v35 }
 0x1fe   : > { %v5684_v55 = vadd.f32 %v1920_v44, %v1824_v9  ;;  %2315 = vmatmul.f32.gmra.mxu2 %v2069_v6  ;;  %6855 = vst [vmem:[#allocation27_spill] sm:$0xff] %v5697_v1 }
 0x200   : > { %v3824_v26 = vsel %vm1975_vm3, %v5684_v55, 0.0  ;;  %v1924_v5 = vpop.f32.mrf.mxu3 }
 0x201   : > { %v3825_v54 = vadd.f32 %v3824_v26, %v3823_v37  ;;  %v1562_v35 = vpop.f32.mrf.mxu0  ;;  %v1674_v53 = vpop.f32.mrf.mxu1  ;;  %v2087_v37 = vsub.f32 %v2085_v40, %v2086_v31 }
 0x202   : > { %v1563_v6 = vadd.f32 %v1562_v35, %v5476_v56  ;;  %v1675_v44 = vadd.f32 %v1674_v53, %v1558_v36  ;;  %v1827_v13 = vpop.f32.mrf.mxu2  ;;  %v1998_v56 = vsel %vm1975_vm3, %v5697_v1, 0  ;;  %v5712_v35 = vadd.f32 %v5522_v49, %v1042_v14 }
 0x203   : > { %v2088_v15 = vand.u32 4294901760, %v2087_v37  ;;  %v6859_v37 = vld [vmem:[#allocation52_spill] sm:$0xff] }
 0x204   : > { %v1828_v51 = vadd.f32 %v1827_v13, %v1675_v44  ;;  %2081 = vmatmul.f32.gmra.mxu0 %v2080_v34  ;;  %2222 = vmatmul.f32.gmra.mxu1 %v5645_v57  ;;  %6856 = vst [vmem:[#allocation31_spill] sm:$0xff] %v5712_v35 }
 0x205   : > { %2426 = vmatmul.f32.gmra.mxu3 %v2078_v58  ;;  %v5709_v58 = vand.u32 4294901760, %v1998_v56 }
 0x206   : > { %v5701_v28 = vadd.f32 %v1924_v5, %v1828_v51  ;;  %2320 = vmatmul.f32.gmra.mxu2 %v2077_v45  ;;  %v2094_v45 = vand.u32 4294901760, %v2093_v61  ;;  %v6858_v51 = vld [vmem:[#allocation30_spill] sm:$0xff] }
 0x207   : > { %v2101_v34 = vsub.f32 %v1998_v56, %v5709_v58 }
 0x208   : > { %v3826_v52 = vsel %vm1975_vm3, %v5701_v28, 0.0  ;;  %v1928_v9 = vpop.f32.mrf.mxu3  ;;  %v2095_v7 = vsub.f32 %v2093_v61, %v2094_v45 }
 0x209   : > { %v3827_v23 = vadd.f32 %v3826_v52, %v3825_v54  ;;  %v1567_v36 = vpop.f32.mrf.mxu0  ;;  %v1680_v26 = vpop.f32.mrf.mxu1  ;;  %v2001_v54 = vsel %vm1975_vm3, %v5712_v35, 0  ;;  %v1046_v52 = vadd.f32 %v6859_v37, %v6858_v51 }
 0x20a   : > { %v1681_v42 = vadd.f32 %v1680_v26, %v1563_v6  ;;  %v1831_v5 = vpop.f32.mrf.mxu2  ;;  %v6857_v6 = vld [vmem:[#allocation47_spill] sm:$0xff]  ;;  %v5725_v56 = vand.u32 4294901760, %v2001_v54 }
 0x20b   : > { %v1568_v44 = vadd.f32 %v1567_v36, %v6857_v6 }
 0x20c   : > { %v1832_v53 = vadd.f32 %v1831_v5, %v1681_v42  ;;  %2089 = vmatmul.f32.gmra.mxu0 %v2088_v15  ;;  %2226 = vmatmul.f32.gmra.mxu1 %v5659_v29  ;;  %v2096_v42 = vand.u32 4294901760, %v2095_v7  ;;  %v2102_v5 = vand.u32 4294901760, %v2101_v34  ;;  %v6860_v15 = vld [vmem:[#allocation19_spill] sm:$0xff]  ;;  %v2109_v6 = vsub.f32 %v2001_v54, %v5725_v56 }
 0x20d   : > { %2432 = vmatmul.f32.gmra.mxu3 %v2086_v31 }
 0x20e   : > { %v5716_v50 = vadd.f32 %v1928_v9, %v1832_v53  ;;  %2325 = vmatmul.f32.gmra.mxu2 %v2085_v40  ;;  %v5728_v53 = vadd.f32 %v6860_v15, %v1046_v52  ;;  %v2110_v35 = vand.u32 4294901760, %v2109_v6 }
 0x210   : > { %v3828_v49 = vsel %vm1975_vm3, %v5716_v50, 0.0  ;;  %v1932_v13 = vpop.f32.mrf.mxu3  ;;  %6861 = vst [vmem:[#allocation29_spill] sm:$0xff] %v5728_v53 }
 0x211   : > { %v3829_v14 = vadd.f32 %v3828_v49, %v3827_v23  ;;  %v1572_v31 = vpop.f32.mrf.mxu0  ;;  %v1686_v26 = vpop.f32.mrf.mxu1  ;;  %v2103_v23 = vsub.f32 %v2101_v34, %v2102_v5  ;;  %v6862_v49 = vld [vmem:[#allocation44_spill] sm:$0xff] }
 0x212   : > { %v1687_v9 = vadd.f32 %v1686_v26, %v1568_v44  ;;  %v1835_v40 = vpop.f32.mrf.mxu2  ;;  %v2004_v44 = vsel %vm1975_vm3, %v5728_v53, 0  ;;  %v1573_v7 = vadd.f32 %v1572_v31, %v6862_v49  ;;  %v6863_v26 = vld [vmem:[#allocation35_spill] sm:$0xff] }
 0x213   : > { %v5741_v54 = vand.u32 4294901760, %v2004_v44 }
 0x214   : > { %v1836_v36 = vadd.f32 %v1835_v40, %v1687_v9  ;;  %2097 = vmatmul.f32.gmra.mxu0 %v2096_v42  ;;  %2230 = vmatmul.f32.gmra.mxu1 %v5677_v27  ;;  %v6864_v9 = vld [vmem:[#allocation20_spill] sm:$0xff] }
 0x215   : > { %2438 = vmatmul.f32.gmra.mxu3 %v2094_v45  ;;  %v1050_v40 = vadd.f32 %v6864_v9, %v6863_v26  ;;  %v2117_v49 = vsub.f32 %v2004_v44, %v5741_v54 }
 0x216   : > { %v5732_v51 = vadd.f32 %v1932_v13, %v1836_v36  ;;  %2330 = vmatmul.f32.gmra.mxu2 %v2093_v61  ;;  %v2104_v36 = vand.u32 4294901760, %v2103_v23 }
 0x217   : > { %v5744_v53 = vadd.f32 %v5549_v8, %v1050_v40  ;;  %v6867_v40 = vld [vmem:[#allocation33_spill] sm:$0xff] }
 0x218   : > { %v3830_v37 = vsel %vm1975_vm3, %v5732_v51, 0.0  ;;  %v1936_v52 = vpop.f32.mrf.mxu3 }
 0x219   : > { %v3831_v42 = vadd.f32 %v3830_v37, %v3829_v14  ;;  %v1577_v45 = vpop.f32.mrf.mxu0  ;;  %v1692_v15 = vpop.f32.mrf.mxu1  ;;  %6865 = vst [vmem:[#allocation34_spill] sm:$0xff] %v5744_v53  ;;  %v2111_v14 = vsub.f32 %v2109_v6, %v2110_v35  ;;  %v6866_v37 = vld [vmem:[#allocation51_spill] sm:$0xff] }
 0x21a   : > { %v1693_v13 = vadd.f32 %v1692_v15, %v1573_v7  ;;  %v1839_v61 = vpop.f32.mrf.mxu2  ;;  %v2007_v7 = vsel %vm1975_vm3, %v5744_v53, 0  ;;  %v1578_v23 = vadd.f32 %v1577_v45, %v6866_v37  ;;  %v1054_v15 = vadd.f32 %v5547_v24, %v6867_v40 }
 0x21b   : > { %v5757_v44 = vand.u32 4294901760, %v2007_v7 }
 0x21c   : > { %v1840_v31 = vadd.f32 %v1839_v61, %v1693_v13  ;;  %2105 = vmatmul.f32.gmra.mxu0 %v2104_v36  ;;  %2234 = vmatmul.f32.gmra.mxu1 %v5693_v3  ;;  %v2112_v36 = vand.u32 4294901760, %v2111_v14  ;;  %v5760_v53 = vadd.f32 %v5562_v20, %v1054_v15  ;;  %v6870_v15 = vld [vmem:[#allocation40_spill] sm:$0xff] }
 0x21d   : > { %2444 = vmatmul.f32.gmra.mxu3 %v2102_v5  ;;  %v2125_v37 = vsub.f32 %v2007_v7, %v5757_v44 }
 0x21e   : > { %v5748_v26 = vadd.f32 %v1936_v52, %v1840_v31  ;;  %2335 = vmatmul.f32.gmra.mxu2 %v2101_v34  ;;  %v2118_v31 = vand.u32 4294901760, %v2117_v49  ;;  %6868 = vst [vmem:[#allocation32_spill] sm:$0xff] %v5760_v53 }
 0x220   : > { %v3832_v8 = vsel %vm1975_vm3, %v5748_v26, 0.0  ;;  %v1940_v9 = vpop.f32.mrf.mxu3 }
 0x221   : > { %v3833_v13 = vadd.f32 %v3832_v8, %v3831_v42  ;;  %v1582_v5 = vpop.f32.mrf.mxu0  ;;  %v1698_v61 = vpop.f32.mrf.mxu1  ;;  %v2119_v42 = vsub.f32 %v2117_v49, %v2118_v31  ;;  %v6869_v8 = vld [vmem:[#allocation18_spill] sm:$0xff] }
 0x222   : > { %v1699_v52 = vadd.f32 %v1698_v61, %v1578_v23  ;;  %v1843_v34 = vpop.f32.mrf.mxu2  ;;  %v2010_v23 = vsel %vm1975_vm3, %v5760_v53, 0  ;;  %v1583_v14 = vadd.f32 %v1582_v5, %v6869_v8  ;;  %v1058_v61 = vadd.f32 %v5560_v17, %v6870_v15  ;;  %v6872_v15 = vld [vmem:[#allocation37_spill] sm:$0xff] }
 0x223   : > { %v5773_v7 = vand.u32 4294901760, %v2010_v23 }
 0x224   : > { %v1844_v45 = vadd.f32 %v1843_v34, %v1699_v52  ;;  %2113 = vmatmul.f32.gmra.mxu0 %v2112_v36  ;;  %2238 = vmatmul.f32.gmra.mxu1 %v5709_v58  ;;  %v2120_v36 = vand.u32 4294901760, %v2119_v42  ;;  %v5776_v53 = vadd.f32 %v5574_v19, %v1058_v61  ;;  %v1062_v61 = vadd.f32 %v5572_v30, %v6872_v15  ;;  %v6874_v15 = vld [vmem:[#allocation45_spill] sm:$0xff] }
 0x225   : > { %2450 = vmatmul.f32.gmra.mxu3 %v2110_v35  ;;  %v2133_v8 = vsub.f32 %v2010_v23, %v5773_v7 }
 0x226   : > { %v5764_v24 = vadd.f32 %v1940_v9, %v1844_v45  ;;  %2340 = vmatmul.f32.gmra.mxu2 %v2109_v6  ;;  %v2126_v45 = vand.u32 4294901760, %v2125_v37  ;;  %6871 = vst [vmem:[#allocation38_spill] sm:$0xff] %v5776_v53 }
 0x228   : > { %v3834_v20 = vsel %vm1975_vm3, %v5764_v24, 0.0  ;;  %v1944_v40 = vpop.f32.mrf.mxu3 }
 0x229   : > { %v3835_v52 = vadd.f32 %v3834_v20, %v3833_v13  ;;  %v1587_v35 = vpop.f32.mrf.mxu0  ;;  %v1704_v34 = vpop.f32.mrf.mxu1  ;;  %v2127_v13 = vsub.f32 %v2125_v37, %v2126_v45 }
 0x22a   : > { %v1705_v9 = vadd.f32 %v1704_v34, %v1583_v14  ;;  %v1847_v6 = vpop.f32.mrf.mxu2  ;;  %v2013_v14 = vsel %vm1975_vm3, %v5776_v53, 0  ;;  %v1588_v42 = vadd.f32 %v1587_v35, %v5537_v4 }
 0x22b   : > { %v5789_v23 = vand.u32 4294901760, %v2013_v14 }
 0x22c   : > { %v1848_v5 = vadd.f32 %v1847_v6, %v1705_v9  ;;  %2121 = vmatmul.f32.gmra.mxu0 %v2120_v36  ;;  %2242 = vmatmul.f32.gmra.mxu1 %v5725_v56  ;;  %v2128_v6 = vand.u32 4294901760, %v2127_v13  ;;  %v2134_v36 = vand.u32 4294901760, %v2133_v8 }
 0x22d   : > { %2456 = vmatmul.f32.gmra.mxu3 %v2118_v31  ;;  %v2141_v35 = vsub.f32 %v2013_v14, %v5789_v23 }
 0x22e   : > { %v5780_v17 = vadd.f32 %v1944_v40, %v1848_v5  ;;  %2345 = vmatmul.f32.gmra.mxu2 %v2117_v49  ;;  %v5792_v5 = vadd.f32 %v5591_v46, %v1062_v61  ;;  %v1066_v61 = vadd.f32 %v5589_v39, %v6874_v15  ;;  %v6876_v15 = vld [vmem:[#allocation39_spill] sm:$0xff] }
 0x230   : > { %v3836_v19 = vsel %vm1975_vm3, %v5780_v17, 0.0  ;;  %v1948_v20 = vpop.f32.mrf.mxu3  ;;  %6873 = vst [vmem:[#allocation36_spill] sm:$0xff] %v5792_v5 }
 0x231   : > { %v3837_v34 = vadd.f32 %v3836_v19, %v3835_v52  ;;  %v1592_v31 = vpop.f32.mrf.mxu0  ;;  %v1710_v9 = vpop.f32.mrf.mxu1  ;;  %v2135_v52 = vsub.f32 %v2133_v8, %v2134_v36 }
 0x232   : > { %v1711_v40 = vadd.f32 %v1710_v9, %v1588_v42  ;;  %v1851_v49 = vpop.f32.mrf.mxu2  ;;  %v2016_v42 = vsel %vm1975_vm3, %v5792_v5, 0  ;;  %v1593_v13 = vadd.f32 %v1592_v31, %v5551_v21 }
 0x233   : > { %v5805_v14 = vand.u32 4294901760, %v2016_v42 }
 0x234   : > { %v1852_v4 = vadd.f32 %v1851_v49, %v1711_v40  ;;  %2129 = vmatmul.f32.gmra.mxu0 %v2128_v6  ;;  %2246 = vmatmul.f32.gmra.mxu1 %v5741_v54  ;;  %v2136_v49 = vand.u32 4294901760, %v2135_v52  ;;  %v2142_v6 = vand.u32 4294901760, %v2141_v35 }
 0x235   : > { %2462 = vmatmul.f32.gmra.mxu3 %v2126_v45  ;;  %v2149_v31 = vsub.f32 %v2016_v42, %v5805_v14 }
 0x236   : > { %v5796_v30 = vadd.f32 %v1948_v20, %v1852_v4  ;;  %2350 = vmatmul.f32.gmra.mxu2 %v2125_v37  ;;  %v5808_v4 = vadd.f32 %v5613_v59, %v1066_v61  ;;  %v1070_v61 = vadd.f32 %v5611_v41, %v6876_v15 }
 0x238   : > { %v3838_v46 = vsel %vm1975_vm3, %v5796_v30, 0.0  ;;  %v1952_v19 = vpop.f32.mrf.mxu3  ;;  %6875 = vst [vmem:[#allocation42_spill] sm:$0xff] %v5808_v4 }
 0x239   : > { %v3839_v9 = vadd.f32 %v3838_v46, %v3837_v34  ;;  %v1597_v45 = vpop.f32.mrf.mxu0  ;;  %v1716_v40 = vpop.f32.mrf.mxu1  ;;  %v2143_v34 = vsub.f32 %v2141_v35, %v2142_v6 }
 0x23a   : > { %v1717_v20 = vadd.f32 %v1716_v40, %v1593_v13  ;;  %v1855_v37 = vpop.f32.mrf.mxu2  ;;  %v2019_v13 = vsel %vm1975_vm3, %v5808_v4, 0  ;;  %v1598_v52 = vadd.f32 %v1597_v45, %v5564_v47 }
 0x23b   : > { %v5821_v42 = vand.u32 4294901760, %v2019_v13 }
 0x23c   : > { %v1856_v21 = vadd.f32 %v1855_v37, %v1717_v20  ;;  %2137 = vmatmul.f32.gmra.mxu0 %v2136_v49  ;;  %2250 = vmatmul.f32.gmra.mxu1 %v5757_v44  ;;  %v2144_v37 = vand.u32 4294901760, %v2143_v34  ;;  %v2150_v49 = vand.u32 4294901760, %v2149_v31 }
 0x23d   : > { %2468 = vmatmul.f32.gmra.mxu3 %v2134_v36  ;;  %v2157_v45 = vsub.f32 %v2019_v13, %v5821_v42 }
 0x23e   : > { %v5812_v39 = vadd.f32 %v1952_v19, %v1856_v21  ;;  %2355 = vmatmul.f32.gmra.mxu2 %v2133_v8  ;;  %v5824_v21 = vadd.f32 %v5629_v43, %v1070_v61 }
 0x240   : > { %v3840_v59 = vsel %vm1975_vm3, %v5812_v39, 0.0  ;;  %v1956_v46 = vpop.f32.mrf.mxu3  ;;  %6877 = vst [vmem:[#allocation41_spill] sm:$0xff] %v5824_v21 }
 0x241   : > { %v3841_v40 = vadd.f32 %v3840_v59, %v3839_v9  ;;  %v1602_v36 = vpop.f32.mrf.mxu0  ;;  %v1722_v20 = vpop.f32.mrf.mxu1  ;;  %v2151_v9 = vsub.f32 %v2149_v31, %v2150_v49 }
 0x242   : > { %v1723_v19 = vadd.f32 %v1722_v20, %v1598_v52  ;;  %v1859_v8 = vpop.f32.mrf.mxu2  ;;  %v2022_v52 = vsel %vm1975_vm3, %v5824_v21, 0  ;;  %v1603_v34 = vadd.f32 %v1602_v36, %v5579_v2 }
 0x244   : > { %v1860_v47 = vadd.f32 %v1859_v8, %v1723_v19  ;;  %2145 = vmatmul.f32.gmra.mxu0 %v2144_v37  ;;  %2254 = vmatmul.f32.gmra.mxu1 %v5773_v7  ;;  %v5835_v19 = vand.u32 4294901760, %v2022_v52  ;;  %v2158_v8 = vand.u32 4294901760, %v2157_v45 }
 0x245   : > { %2474 = vmatmul.f32.gmra.mxu3 %v2142_v6 }
 0x246   : > { %v5828_v41 = vadd.f32 %v1956_v46, %v1860_v47  ;;  %2360 = vmatmul.f32.gmra.mxu2 %v2141_v35  ;;  %v2152_v46 = vand.u32 4294901760, %v2151_v9  ;;  %v2165_v2 = vsub.f32 %v2022_v52, %v5835_v19  ;;  %v2159_v37 = vsub.f32 %v2157_v45, %v2158_v8 }
 0x248   : > { %v3842_v43 = vsel %vm1975_vm3, %v5828_v41, 0.0  ;;  %v1960_v59 = vpop.f32.mrf.mxu3  ;;  %v2166_v53 = vand.u32 4294901760, %v2165_v2 }
 0x249   : > { %v3843_v15 = vadd.f32 %v3842_v43, %v3841_v40  ;;  %v1607_v61 = vpop.f32.mrf.mxu0  ;;  %v1728_v20 = vpop.f32.mrf.mxu1 }
 0x24a   : > { %v1729_v6 = vadd.f32 %v1728_v20, %v1603_v34  ;;  %v1863_v13 = vpop.f32.mrf.mxu2  ;;  %v1608_v40 = vadd.f32 %v1607_v61, %v5598_v12  ;;  %v2167_v52 = vsub.f32 %v2165_v2, %v2166_v53 }
 0x24c   : > { %v1864_v35 = vadd.f32 %v1863_v13, %v1729_v6  ;;  %2153 = vmatmul.f32.gmra.mxu0 %v2152_v46  ;;  %2258 = vmatmul.f32.gmra.mxu1 %v5789_v23  ;;  %v2160_v46 = vand.u32 4294901760, %v2159_v37 }
 0x24d   : > { %2480 = vmatmul.f32.gmra.mxu3 %v2150_v49 }
 0x24e   : > { %v5839_v36 = vadd.f32 %v1960_v59, %v1864_v35  ;;  %2365 = vmatmul.f32.gmra.mxu2 %v2149_v31 }
 0x250   : > { %v3844_v47 = vsel %vm1975_vm3, %v5839_v36, 0.0  ;;  %v1964_v34 = vpop.f32.mrf.mxu3 }
 0x251   : > { %v3845_v43 = vadd.f32 %v3844_v47, %v3843_v15  ;;  %v1612_v9 = vpop.f32.mrf.mxu0  ;;  %v1734_v20 = vpop.f32.mrf.mxu1 }
 0x252   : > { %v1735_v6 = vadd.f32 %v1734_v20, %v1608_v40  ;;  %v1867_v13 = vpop.f32.mrf.mxu2  ;;  %v1613_v12 = vadd.f32 %v1612_v9, %v5618_v32  ;;  %v2168_v20 = vand.u32 4294901760, %v2167_v52 }
 0x254   : > { %v1868_v49 = vadd.f32 %v1867_v13, %v1735_v6  ;;  %2161 = vmatmul.f32.gmra.mxu0 %v2160_v46  ;;  %2262 = vmatmul.f32.gmra.mxu1 %v5805_v14 }
 0x255   : > { %2486 = vmatmul.f32.gmra.mxu3 %v2158_v8 }
 0x256   : > { %v1965_v31 = vadd.f32 %v1964_v34, %v1868_v49  ;;  %2370 = vmatmul.f32.gmra.mxu2 %v2157_v45 }
 0x258   : > { %v3846_v59 = vsel %vm1975_vm3, %v1965_v31, 0.0  ;;  %v1968_v37 = vpop.f32.mrf.mxu3 }
 0x259   : > { %v3847_v61 = vadd.f32 %v3846_v59, %v3845_v43  ;;  %v1617_v15 = vpop.f32.mrf.mxu0  ;;  %v1740_v35 = vpop.f32.mrf.mxu1  ;;  %v5865_v59 = vand.u32 4294901760, %v5839_v36 }
 0x25a   : > { %v1741_v47 = vadd.f32 %v1740_v35, %v1613_v12  ;;  %v1871_v40 = vpop.f32.mrf.mxu2  ;;  %v1618_v45 = vadd.f32 %v1617_v15, %v5636_v33 }
 0x25c   : > { %v1872_v21 = vadd.f32 %v1871_v40, %v1741_v47  ;;  %2169 = vmatmul.f32.gmra.mxu0 %v2168_v20  ;;  %2266 = vmatmul.f32.gmra.mxu1 %v5821_v42  ;;  %v5880_v20 = vand.u32 4294901760, %v5828_v41 }
 0x25d   : > { %2492 = vmatmul.f32.gmra.mxu3 %v2166_v53 }
 0x25e   : > { %v1969_v8 = vadd.f32 %v1968_v37, %v1872_v21  ;;  %2375 = vmatmul.f32.gmra.mxu2 %v2165_v2  ;;  %v5856_v2 = vand.u32 4294901760, %v1965_v31 }
 0x260   : > { %v3848_v32 = vsel %vm1975_vm3, %v1969_v8, 0.0  ;;  %v5854_v49 = vand.u32 4294901760, %v1969_v8  ;;  %v1972_v53 = vpop.f32.mrf.mxu3  ;;  %v5877_v40 = vsub.f32 %v1965_v31, %v5856_v2  ;;  %v5893_v31 = vand.u32 4294901760, %v5812_v39 }
 0x261   : > { %v3849_v34 = vadd.f32 %v3848_v32, %v3847_v61  ;;  %v1746_v9 = vpop.f32.mrf.mxu1  ;;  %v5850_v43 = vpop.f32.mrf.mxu0 }
 0x262   : > { %v1747_v6 = vadd.f32 %v1746_v9, %v1618_v45  ;;  %v1875_v13 = vpop.f32.mrf.mxu2  ;;  %v5862_v12 = vsub.f32 %v1969_v8, %v5854_v49  ;;  %v5887_v45 = vsub.f32 %v5839_v36, %v5865_v59  ;;  %v5901_v36 = vsub.f32 %v5828_v41, %v5880_v20  ;;  %v3820_v41 = vld [vmem:[#allocation5] sm:$0x1] }
 0x263   : > { %v6710_v9 = vand.u32 4294901760, %v5877_v40 }
 0x264   : > { %v1876_v46 = vadd.f32 %v1875_v13, %v1747_v6  ;;  %2270 = vmatmul.f32.gmra.mxu1 %v5835_v19  ;;  %2525 = vmatmul.f32.vlgmr.msra.gmra.mxu0 %v5593_v60  ;;  %v6708_v32 = vand.u32 4294901760, %v5862_v12  ;;  %v5907_v13 = vand.u32 4294901760, %v5796_v30  ;;  %v6879_v1 = vand.u32 4294901760, %v5901_v36 }
 0x266   : > { %v1973_v21 = vadd.f32 %v1972_v53, %v1876_v46  ;;  %v3152_v53 = vsub.f32 %v5862_v12, %v6708_v32 }
 0x268   : > { %v3850_v33 = vsel %vm1975_vm3, %v1973_v21, 0.0  ;;  %v5859_v52 = vand.u32 4294901760, %v1973_v21 }
 0x269   : > { %v3851_v61 = vadd.f32 %v3850_v33, %v3849_v34  ;;  %v5867_v15 = vpop.f32.mrf.mxu0  ;;  %v5869_v35 = vpop.f32.mrf.mxu1 }
 0x26a   : > { %2983 = vmatpush.msra.mxu2 %v5859_v52  ;;  %3434 = vmatpush.msrb.mxu1 %v5859_v52  ;;  %v5874_v47 = vsub.f32 %v1973_v21, %v5859_v52 }
 0x26b   : > { %v3852_v37 = vrot.slane %v3851_v61, 4 }
 0x26c   : > { %2529 = vmatmul.f32.gmra.mxu0 %v5609_v38  ;;  %2610 = vmatmul.f32.vlgmr.msra.gmra.mxu1 %v5593_v60  ;;  %v6709_v8 = vand.u32 4294901760, %v5874_v47 }
 0x26d   : > { %v3853_v34 = vadd.f32 %v3852_v37, %v3851_v61  ;;  %2985 = vmatpush.msra.mxu2 %v5854_v49  ;;  %3306 = vmatpush.msrb.mxu0 %v5874_v47  ;;  %v5922_v37 = vsub.f32 %v5812_v39, %v5893_v31  ;;  %v5936_v39 = vsub.f32 %v5796_v30, %v5907_v13 }
 0x26e   : > { %3436 = vmatpush.msrb.mxu1 %v5854_v49  ;;  %v3146_v60 = vsub.f32 %v5874_v47, %v6709_v8  ;;  %v5939_v8 = vand.u32 4294901760, %v5764_v24 }
 0x26f   : > { %v3854_v6 = vrot.slane %v3853_v34, 2  ;;  %2987 = vmatpush.msra.mxu2 %v5856_v2  ;;  %3309 = vmatpush.msrb.mxu0 %v5862_v12  ;;  %v6714_v5 = vand.u32 4294901760, %v5922_v37 }
 0x270   : > { %3438 = vmatpush.msrb.mxu1 %v5856_v2  ;;  %v3147_v46 = vand.u32 4294901760, %v3146_v60  ;;  %v5925_v60 = vand.u32 4294901760, %v5780_v17 }
 0x271   : > { %v3855_v21 = vadd.f32 %v3854_v6, %v3853_v34  ;;  %2989 = vmatpush.msra.mxu2 %v5865_v59  ;;  %3312 = vmatpush.msrb.mxu0 %v5877_v40  ;;  %v5916_v33 = vpop.f32.mrf.mxu0  ;;  %v5918_v61 = vpop.f32.mrf.mxu1  ;;  %v3158_v34 = vsub.f32 %v5877_v40, %v6710_v9  ;;  %v6878_v9 = vand.u32 4294901760, %v5887_v45 }
 0x272   : > { %3440 = vmatpush.msrb.mxu1 %v5865_v59  ;;  %3148 = vmatpush.msra.mxu3 %v3147_v46  ;;  %v3153_v46 = vand.u32 4294901760, %v3152_v53  ;;  %v5950_v30 = vsub.f32 %v5780_v17, %v5925_v60  ;;  %v5964_v17 = vsub.f32 %v5764_v24, %v5939_v8  ;;  %v3176_v24 = vsub.f32 %v5922_v37, %v6714_v5 }
 0x273   : > { %v3856_v32 = vrot.slane %v3855_v21, 1  ;;  %2991 = vmatpush.msra.mxu2 %v5880_v20  ;;  %3315 = vmatpush.msrb.mxu0 %v5887_v45  ;;  %v3164_v6 = vsub.f32 %v5887_v45, %v6878_v9  ;;  %v3159_v53 = vand.u32 4294901760, %v3158_v34  ;;  %v3170_v9 = vsub.f32 %v5901_v36, %v6879_v1 }
 0x274   : > { %3442 = vmatpush.msrb.mxu1 %v5880_v20  ;;  %2533 = vmatmul.f32.gmra.mxu0 %v5631_v63  ;;  %v5969_v1 = vand.u32 4294901760, %v5732_v51  ;;  %v6880_v0 = vand.u32 4294901760, %v5950_v30  ;;  %v6881_v22 = vand.u32 4294901760, %v5964_v17 }
 0x275   : > { %v3857_v4 = vadd.f32 %v3856_v32, %v3855_v21  ;;  %2614 = vmatmul.f32.gmra.mxu1 %v5609_v38  ;;  %2993 = vmatpush.msra.mxu2 %v5893_v31  ;;  %v5958_v32 = vand.u32 4294901760, %v5748_v26  ;;  %v6716_v21 = vand.u32 4294901760, %v5936_v39  ;;  %v3165_v34 = vand.u32 4294901760, %v3164_v6 }
 0x276   : > { %3154 = vmatpush.msra.mxu3 %v3153_v46  ;;  %3318 = vmatpush.msrb.mxu0 %v5901_v36  ;;  %v3171_v6 = vand.u32 4294901760, %v3170_v9  ;;  %v6001_v9 = vand.u32 4294901760, %v5701_v28  ;;  %v3177_v46 = vand.u32 4294901760, %v3176_v24 }
 0x277   : > { %v3858_v38 = vadd.f32 %v3857_v4, %v3820_v41  ;;  %3444 = vmatpush.msrb.mxu1 %v5893_v31  ;;  %2995 = vmatpush.msra.mxu2 %v5907_v13  ;;  %v3182_v5 = vsub.f32 %v5936_v39, %v6716_v21  ;;  %v3188_v21 = vsub.f32 %v5950_v30, %v6880_v0 }
 0x278   : > { %3160 = vmatpush.msra.mxu3 %v3159_v53  ;;  %3321 = vmatpush.msrb.mxu0 %v5922_v37  ;;  %v5984_v53 = vsub.f32 %v5748_v26, %v5958_v32  ;;  %v5998_v26 = vsub.f32 %v5732_v51, %v5969_v1  ;;  %v3194_v0 = vsub.f32 %v5964_v17, %v6881_v22 }
 0x279   : > { %3860 = vst.msk [vmem:[#allocation5] sm:$0x1] %vm3859_vm4, %v3858_v38  ;;  %3446 = vmatpush.msrb.mxu1 %v5907_v13  ;;  %2997 = vmatpush.msra.mxu2 %v5925_v60  ;;  %v5973_v4 = vpop.f32.mrf.mxu0  ;;  %v5975_v41 = vpop.f32.mrf.mxu1  ;;  %v5987_v38 = vand.u32 4294901760, %v5716_v50  ;;  %v3183_v24 = vand.u32 4294901760, %v3182_v5  ;;  %v3189_v5 = vand.u32 4294901760, %v3188_v21 }
 0x27a   : > { %3166 = vmatpush.msra.mxu3 %v3165_v34  ;;  %3324 = vmatpush.msrb.mxu0 %v5936_v39  ;;  %v6883_v25 = vand.u32 4294901760, %v5998_v26 }
 0x27b   : > { %3448 = vmatpush.msrb.mxu1 %v5925_v60  ;;  %2999 = vmatpush.msra.mxu2 %v5939_v8  ;;  %v6012_v51 = vsub.f32 %v5716_v50, %v5987_v38  ;;  %v6029_v50 = vand.u32 4294901760, %v5666_v62 }
 0x27c   : > { %3172 = vmatpush.msra.mxu3 %v3171_v6  ;;  %3327 = vmatpush.msrb.mxu0 %v5950_v30  ;;  %v6015_v6 = vand.u32 4294901760, %v5684_v55 }
 0x27d   : > { %3450 = vmatpush.msrb.mxu1 %v5939_v8  ;;  %2537 = vmatmul.f32.gmra.mxu0 %v5645_v57  ;;  %v6722_v21 = vand.u32 4294901760, %v6012_v51 }
 0x27e   : > { %2618 = vmatmul.f32.gmra.mxu1 %v5631_v63  ;;  %3001 = vmatpush.msra.mxu2 %v5958_v32  ;;  %v6026_v63 = vsub.f32 %v5701_v28, %v6001_v9  ;;  %v6882_v28 = vand.u32 4294901760, %v5984_v53  ;;  %v6044_v11 = vsub.f32 %v5684_v55, %v6015_v6  ;;  %v6058_v55 = vsub.f32 %v5666_v62, %v6029_v50 }
 0x27f   : > { %3178 = vmatpush.msra.mxu3 %v3177_v46  ;;  %3330 = vmatpush.msrb.mxu0 %v5964_v17  ;;  %v3195_v46 = vand.u32 4294901760, %v3194_v0 }
 0x280   : > { %3452 = vmatpush.msrb.mxu1 %v5958_v32  ;;  %3003 = vmatpush.msra.mxu2 %v5969_v1  ;;  %v3200_v16 = vsub.f32 %v5984_v53, %v6882_v28  ;;  %v3206_v28 = vsub.f32 %v5998_v26, %v6883_v25  ;;  %v6723_v48 = vand.u32 4294901760, %v6026_v63  ;;  %v6886_v18 = vand.u32 4294901760, %v6058_v55 }
 0x281   : > { %3184 = vmatpush.msra.mxu3 %v3183_v24  ;;  %3333 = vmatpush.msrb.mxu0 %v5984_v53  ;;  %v6033_v34 = vpop.f32.mrf.mxu0  ;;  %v6035_v22 = vpop.f32.mrf.mxu1  ;;  %v6047_v24 = vand.u32 4294901760, %v5654_v10 }
 0x282   : > { %3454 = vmatpush.msrb.mxu1 %v5969_v1  ;;  %3005 = vmatpush.msra.mxu2 %v5987_v38  ;;  %v3201_v0 = vand.u32 4294901760, %v3200_v16  ;;  %v3218_v16 = vsub.f32 %v6026_v63, %v6723_v48 }
 0x283   : > { %3190 = vmatpush.msra.mxu3 %v3189_v5  ;;  %3336 = vmatpush.msrb.mxu0 %v5998_v26  ;;  %v3212_v5 = vsub.f32 %v6012_v51, %v6722_v21  ;;  %v6069_v25 = vsub.f32 %v5654_v10, %v6047_v24 }
 0x284   : > { %3456 = vmatpush.msrb.mxu1 %v5987_v38  ;;  %3007 = vmatpush.msra.mxu2 %v6001_v9  ;;  %v3219_v21 = vand.u32 4294901760, %v3218_v16  ;;  %v6889_v16 = vand.u32 4294901760, %v5877_v40  ;;  %v6893_v40 = vand.u32 4294901760, %v5936_v39 }
 0x285   : > { %3196 = vmatpush.msra.mxu3 %v3195_v46  ;;  %3339 = vmatpush.msrb.mxu0 %v6012_v51  ;;  %v3207_v46 = vand.u32 4294901760, %v3206_v28  ;;  %v6885_v28 = vand.u32 4294901760, %v6044_v11  ;;  %v3235_v48 = vand.u32 4294901760, %v6069_v25 }
 0x286   : > { %3458 = vmatpush.msrb.mxu1 %v6001_v9  ;;  %2541 = vmatmul.f32.gmra.mxu0 %v5659_v29 }
 0x287   : > { %2622 = vmatmul.f32.gmra.mxu1 %v5645_v57  ;;  %3009 = vmatpush.msra.mxu2 %v6015_v6  ;;  %v3213_v57 = vand.u32 4294901760, %v3212_v5  ;;  %v6887_v5 = vand.u32 4294901760, %v5874_v47 }
 0x288   : > { %3202 = vmatpush.msra.mxu3 %v3201_v0  ;;  %3342 = vmatpush.msrb.mxu0 %v6026_v63  ;;  %v3224_v0 = vsub.f32 %v6044_v11, %v6885_v28 }
 0x289   : > { %3460 = vmatpush.msrb.mxu1 %v6015_v6  ;;  %3011 = vmatpush.msra.mxu2 %v6029_v50  ;;  %v6081_v10 = vpop.f32.mrf.mxu0  ;;  %v6083_v62 = vpop.f32.mrf.mxu1 }
 0x28a   : > { %6884 = vst [vmem:[#allocation46_spill] sm:$0xff] %v6081_v10  ;;  %3208 = vmatpush.msra.mxu3 %v3207_v46  ;;  %3345 = vmatpush.msrb.mxu0 %v6044_v11  ;;  %v3230_v46 = vsub.f32 %v6058_v55, %v6886_v18  ;;  %v3225_v28 = vand.u32 4294901760, %v3224_v0  ;;  %v3236_v10 = vsub.f32 %v6069_v25, %v3235_v48 }
 0x28b   : > { %3462 = vmatpush.msrb.mxu1 %v6029_v50  ;;  %3013 = vmatpush.msra.mxu2 %v6047_v24 }
 0x28c   : > { %3214 = vmatpush.msra.mxu3 %v3213_v57  ;;  %3348 = vmatpush.msrb.mxu0 %v6058_v55  ;;  %v6888_v57 = vand.u32 4294901760, %v5862_v12  ;;  %v3231_v18 = vand.u32 4294901760, %v3230_v46  ;;  %v3237_v0 = vand.u32 4294901760, %v3236_v10  ;;  %v6891_v12 = vand.u32 4294901760, %v5901_v36 }
 0x28d   : > { %3464 = vmatpush.msrb.mxu1 %v6047_v24  ;;  %3565 = vmatpush.msrb.mxu2 %v6887_v5 }
 0x28e   : > { %3220 = vmatpush.msra.mxu3 %v3219_v21  ;;  %3351 = vmatpush.msrb.mxu0 %v6069_v25  ;;  %v6890_v25 = vand.u32 4294901760, %v5887_v45 }
 0x28f   : > { %3569 = vmatpush.msrb.mxu2 %v6888_v57  ;;  %2545 = vmatmul.f32.gmra.mxu0 %v5677_v27 }
 0x290   : > { %2626 = vmatmul.f32.gmra.mxu1 %v5659_v29  ;;  %3226 = vmatpush.msra.mxu3 %v3225_v28  ;;  %v6892_v29 = vand.u32 4294901760, %v5922_v37 }
 0x291   : > { %3573 = vmatpush.msrb.mxu2 %v6889_v16  ;;  %v6107_v47 = vpop.f32.mrf.mxu0  ;;  %v6109_v21 = vpop.f32.mrf.mxu1  ;;  %v2220_v16 = vadd.f32 %v5975_v41, %v5916_v33 }
 0x292   : > { %3232 = vmatpush.msra.mxu3 %v3231_v18 }
 0x293   : > { %3577 = vmatpush.msrb.mxu2 %v6890_v25 }
 0x294   : > { %3238 = vmatpush.msra.mxu3 %v3237_v0 }
 0x295   : > { %3581 = vmatpush.msrb.mxu2 %v6891_v12 }
 0x296   : > { %3692 = vmatpush.msrb.mxu3 %v5859_v52  ;;  %v6894_v52 = vand.u32 4294901760, %v5950_v30 }
 0x297   : > { %3585 = vmatpush.msrb.mxu2 %v6892_v29  ;;  %2549 = vmatmul.f32.gmra.mxu0 %v5693_v3 }
 0x298   : > { %3694 = vmatpush.msrb.mxu3 %v5854_v49  ;;  %2630 = vmatmul.f32.gmra.mxu1 %v5677_v27  ;;  %v6895_v49 = vand.u32 4294901760, %v5964_v17  ;;  %v6896_v27 = vand.u32 4294901760, %v5984_v53 }
 0x299   : > { %3589 = vmatpush.msrb.mxu2 %v6893_v40  ;;  %v6124_v45 = vpop.f32.mrf.mxu0  ;;  %v6126_v36 = vpop.f32.mrf.mxu1 }
 0x29a   : > { %3696 = vmatpush.msrb.mxu3 %v5856_v2  ;;  %v6897_v2 = vand.u32 4294901760, %v5998_v26 }
 0x29b   : > { %3593 = vmatpush.msrb.mxu2 %v6894_v52  ;;  %v2224_v52 = vadd.f32 %v6035_v22, %v5973_v4 }
 0x29c   : > { %3698 = vmatpush.msrb.mxu3 %v5865_v59 }
 0x29d   : > { %3597 = vmatpush.msrb.mxu2 %v6895_v49 }
 0x29e   : > { %3700 = vmatpush.msrb.mxu3 %v5880_v20  ;;  %v6898_v20 = vand.u32 4294901760, %v6012_v51 }
 0x29f   : > { %3601 = vmatpush.msrb.mxu2 %v6896_v27  ;;  %2553 = vmatmul.f32.gmra.mxu0 %v5709_v58 }
 0x2a0   : > { %3702 = vmatpush.msrb.mxu3 %v5893_v31  ;;  %2634 = vmatmul.f32.gmra.mxu1 %v5693_v3  ;;  %v6899_v31 = vand.u32 4294901760, %v6026_v63  ;;  %v6900_v3 = vand.u32 4294901760, %v6044_v11 }
 0x2a1   : > { %3605 = vmatpush.msrb.mxu2 %v6897_v2  ;;  %v6142_v59 = vpop.f32.mrf.mxu0  ;;  %v6144_v37 = vpop.f32.mrf.mxu1 }
 0x2a2   : > { %3704 = vmatpush.msrb.mxu3 %v5907_v13  ;;  %v6901_v13 = vand.u32 4294901760, %v6058_v55 }
 0x2a3   : > { %3609 = vmatpush.msrb.mxu2 %v6898_v20 }
 0x2a4   : > { %3706 = vmatpush.msrb.mxu3 %v5925_v60 }
 0x2a5   : > { %3613 = vmatpush.msrb.mxu2 %v6899_v31 }
 0x2a6   : > { %3708 = vmatpush.msrb.mxu3 %v5939_v8 }
 0x2a7   : > { %3617 = vmatpush.msrb.mxu2 %v6900_v3  ;;  %2557 = vmatmul.f32.gmra.mxu0 %v5725_v56  ;;  %v2228_v3 = vadd.f32 %v6083_v62, %v6033_v34 }
 0x2a8   : > { %3710 = vmatpush.msrb.mxu3 %v5958_v32  ;;  %2638 = vmatmul.f32.gmra.mxu1 %v5709_v58  ;;  %v2301_v32 = vpop.f32.mrf.mxu2 }
 0x2a9   : > { %3621 = vmatpush.msrb.mxu2 %v6901_v13  ;;  %v6160_v60 = vpop.f32.mrf.mxu0  ;;  %v6162_v39 = vpop.f32.mrf.mxu1 }
 0x2aa   : > { %3712 = vmatpush.msrb.mxu3 %v5969_v1  ;;  %v2403_v1 = vpop.f32.mrf.mxu3 }
 0x2ab   : > { %3625 = vmatpush.msrb.mxu2 %v3235_v48 }
 0x2ac   : > { %3714 = vmatpush.msrb.mxu3 %v5987_v38 }
 0x2ae   : > { %3716 = vmatpush.msrb.mxu3 %v6001_v9 }
 0x2af   : > { %2561 = vmatmul.f32.gmra.mxu0 %v5741_v54 }
 0x2b0   : > { %3718 = vmatpush.msrb.mxu3 %v6015_v6  ;;  %2642 = vmatmul.f32.gmra.mxu1 %v5725_v56  ;;  %v2306_v53 = vpop.f32.mrf.mxu2  ;;  %v2212_v6 = vadd.f32 %v5869_v35, %v5850_v43 }
 0x2b1   : > { %v6170_v11 = vpop.f32.mrf.mxu0  ;;  %v6172_v58 = vpop.f32.mrf.mxu1 }
 0x2b2   : > { %3720 = vmatpush.msrb.mxu3 %v6029_v50  ;;  %v2409_v26 = vpop.f32.mrf.mxu3 }
 0x2b4   : > { %3722 = vmatpush.msrb.mxu3 %v6047_v24  ;;  %v2302_v24 = vadd.f32 %v2301_v32, %v2212_v6 }
 0x2b6   : > { %v2404_v10 = vadd.f32 %v2403_v1, %v2302_v24 }
 0x2b7   : > { %2565 = vmatmul.f32.gmra.mxu0 %v5757_v44 }
 0x2b8   : > { %2646 = vmatmul.f32.gmra.mxu1 %v5741_v54  ;;  %v2311_v51 = vpop.f32.mrf.mxu2 }
 0x2b9   : > { %v6177_v48 = vpop.f32.mrf.mxu0  ;;  %v6179_v8 = vpop.f32.mrf.mxu1  ;;  %v2312_v29 = vadd.f32 %v2311_v51, %v2220_v16  ;;  %v6902_v51 = vld [vmem:[#allocation46_spill] sm:$0xff]  ;;  %v2240_v16 = vadd.f32 %v6144_v37, %v6124_v45 }
 0x2ba   : > { %v2415_v63 = vpop.f32.mrf.mxu3  ;;  %v2232_v6 = vadd.f32 %v6109_v21, %v6902_v51 }
 0x2bb   : > { %v2416_v40 = vadd.f32 %v2415_v63, %v2312_v29 }
 0x2bf   : > { %2569 = vmatmul.f32.gmra.mxu0 %v5773_v7 }
 0x2c0   : > { %2650 = vmatmul.f32.gmra.mxu1 %v5757_v44  ;;  %v2316_v55 = vpop.f32.mrf.mxu2 }
 0x2c1   : > { %v6183_v56 = vpop.f32.mrf.mxu0  ;;  %v6185_v30 = vpop.f32.mrf.mxu1  ;;  %v2317_v33 = vadd.f32 %v2316_v55, %v2224_v52 }
 0x2c2   : > { %v2421_v46 = vpop.f32.mrf.mxu3 }
 0x2c3   : > { %v2422_v41 = vadd.f32 %v2421_v46, %v2317_v33  ;;  %v2236_v46 = vadd.f32 %v6126_v36, %v6107_v47  ;;  %v2248_v33 = vadd.f32 %v6172_v58, %v6160_v60 }
 0x2c7   : > { %2573 = vmatmul.f32.gmra.mxu0 %v5789_v23 }
 0x2c8   : > { %2654 = vmatmul.f32.gmra.mxu1 %v5773_v7 }
 0x2c9   : > { %v6189_v17 = vpop.f32.mrf.mxu0  ;;  %v6191_v54 = vpop.f32.mrf.mxu1 }
 0x2ca   : > { %v2427_v12 = vpop.f32.mrf.mxu3 }
 0x2cf   : > { %2577 = vmatmul.f32.gmra.mxu0 %v5805_v14 }
 0x2d0   : > { %2658 = vmatmul.f32.gmra.mxu1 %v5789_v23 }
 0x2d1   : > { %v6195_v44 = vpop.f32.mrf.mxu0  ;;  %v6197_v38 = vpop.f32.mrf.mxu1 }
 0x2d2   : > { %v2433_v20 = vpop.f32.mrf.mxu3 }
 0x2d7   : > { %2581 = vmatmul.f32.gmra.mxu0 %v5821_v42 }
 0x2d8   : > { %2662 = vmatmul.f32.gmra.mxu1 %v5805_v14  ;;  %v2216_v14 = vadd.f32 %v5918_v61, %v5867_v15 }
 0x2d9   : > { %v6201_v7 = vpop.f32.mrf.mxu0  ;;  %v6203_v9 = vpop.f32.mrf.mxu1 }
 0x2da   : > { %v2307_v57 = vadd.f32 %v2306_v53, %v2216_v14  ;;  %v2439_v22 = vpop.f32.mrf.mxu3 }
 0x2dc   : > { %v2410_v18 = vadd.f32 %v2409_v26, %v2307_v57 }
 0x2df   : > { %2585 = vmatmul.f32.gmra.mxu0 %v5835_v19 }
 0x2e0   : > { %2666 = vmatmul.f32.gmra.mxu1 %v5821_v42  ;;  %v2321_v42 = vpop.f32.mrf.mxu2 }
 0x2e1   : > { %v6209_v23 = vpop.f32.mrf.mxu1  ;;  %v2526_v50 = vpop.f32.mrf.mxu0  ;;  %v2322_v4 = vadd.f32 %v2321_v42, %v2228_v3 }
 0x2e2   : > { %v2527_v5 = vadd.f32 %v2526_v50, %v2404_v10  ;;  %v2445_v62 = vpop.f32.mrf.mxu3 }
 0x2e3   : > { %v2428_v63 = vadd.f32 %v2427_v12, %v2322_v4  ;;  %v2252_v4 = vadd.f32 %v6179_v8, %v6170_v11 }
 0x2e8   : > { %2670 = vmatmul.f32.gmra.mxu1 %v5835_v19  ;;  %v2326_v19 = vpop.f32.mrf.mxu2 }
 0x2e9   : > { %v2530_v28 = vpop.f32.mrf.mxu0  ;;  %v2611_v43 = vpop.f32.mrf.mxu1  ;;  %v2327_v14 = vadd.f32 %v2326_v19, %v2232_v6 }
 0x2ea   : > { %v6214_v35 = vadd.f32 %v2611_v43, %v2527_v5  ;;  %v2531_v0 = vadd.f32 %v2530_v28, %v2410_v18 }
 0x2eb   : > { %v2434_v5 = vadd.f32 %v2433_v20, %v2327_v14 }
 0x2ec   : > { %2754 = vmax.xlane.f32.xlu0 %v6214_v35 }
 0x2f0   : > { %v2331_v13 = vpop.f32.mrf.mxu2 }
 0x2f1   : > { %v2534_v25 = vpop.f32.mrf.mxu0  ;;  %v2332_v42 = vadd.f32 %v2331_v13, %v2236_v46 }
 0x2f2   : > { %v2615_v15 = vpop.f32.mrf.mxu1  ;;  %v2535_v49 = vadd.f32 %v2534_v25, %v2416_v40  ;;  %v2244_v40 = vadd.f32 %v6162_v39, %v6142_v59 }
 0x2f3   : > { %v6219_v61 = vadd.f32 %v2615_v15, %v2531_v0  ;;  %v2451_v0 = vpop.f32.mrf.mxu3  ;;  %v2440_v25 = vadd.f32 %v2439_v22, %v2332_v42 }
 0x2f5   : > { %2756 = vmax.xlane.f32.xlu0 %v6219_v61 }
 0x2f8   : > { %v2336_v50 = vpop.f32.mrf.mxu2 }
 0x2f9   : > { %v2337_v19 = vadd.f32 %v2336_v50, %v2240_v16 }
 0x2fa   : > { %v2538_v27 = vpop.f32.mrf.mxu0 }
 0x2fb   : > { %v2619_v2 = vpop.f32.mrf.mxu1  ;;  %v2539_v32 = vadd.f32 %v2538_v27, %v2422_v41  ;;  %v2446_v52 = vadd.f32 %v2445_v62, %v2337_v19 }
 0x2fc   : > { %v6224_v31 = vadd.f32 %v2619_v2, %v2535_v49  ;;  %v2457_v49 = vpop.f32.mrf.mxu3 }
 0x2fe   : > { %2758 = vmax.xlane.f32.xlu1 %v6224_v31 }
 0x300   : > { %v2341_v21 = vpop.f32.mrf.mxu2 }
 0x301   : > { %v2342_v45 = vadd.f32 %v2341_v21, %v2244_v40 }
 0x303   : > { %v2542_v1 = vpop.f32.mrf.mxu0  ;;  %v2452_v3 = vadd.f32 %v2451_v0, %v2342_v45 }
 0x304   : > { %v2623_v53 = vpop.f32.mrf.mxu1  ;;  %v2543_v24 = vadd.f32 %v2542_v1, %v2428_v63  ;;  %v2463_v59 = vpop.f32.mrf.mxu3 }
 0x305   : > { %v6229_v26 = vadd.f32 %v2623_v53, %v2539_v32 }
 0x307   : > { %2760 = vmax.xlane.f32.xlu1 %v6229_v26 }
 0x308   : > { %v2346_v36 = vpop.f32.mrf.mxu2 }
 0x309   : > { %v2347_v53 = vadd.f32 %v2346_v36, %v2248_v33  ;;  %v2272_v33 = vadd.f32 %v6209_v23, %v6201_v7  ;;  %v6905_v23 = vld [vmem:[#allocation24_spill] sm:$0xff] }
 0x30b   : > { %v2458_v22 = vadd.f32 %v2457_v49, %v2347_v53 }
 0x30c   : > { %v2546_v55 = vpop.f32.mrf.mxu0 }
 0x30d   : > { %v2627_v10 = vpop.f32.mrf.mxu1  ;;  %v2547_v28 = vadd.f32 %v2546_v55, %v2434_v5  ;;  %v2256_v55 = vadd.f32 %v6185_v30, %v6177_v48 }
 0x30e   : > { %v6234_v34 = vadd.f32 %v2627_v10, %v2543_v24  ;;  %v2469_v24 = vpop.f32.mrf.mxu3 }
 0x310   : > { %2762 = vmax.xlane.f32.xlu2 %v6234_v34  ;;  %v2351_v41 = vpop.f32.mrf.mxu2 }
 0x311   : > { %v2352_v60 = vadd.f32 %v2351_v41, %v2252_v4 }
 0x313   : > { %v2464_v10 = vadd.f32 %v2463_v59, %v2352_v60 }
 0x314   : > { %v2550_v43 = vpop.f32.mrf.mxu0 }
 0x315   : > { %v2631_v57 = vpop.f32.mrf.mxu1  ;;  %v2551_v12 = vadd.f32 %v2550_v43, %v2440_v25  ;;  %v2260_v43 = vadd.f32 %v6191_v54, %v6183_v56  ;;  %v2264_v25 = vadd.f32 %v6197_v38, %v6189_v17  ;;  %v2268_v54 = vadd.f32 %v6203_v9, %v6195_v44 }
 0x316   : > { %v6239_v18 = vadd.f32 %v2631_v57, %v2547_v28  ;;  %v2475_v28 = vpop.f32.mrf.mxu3 }
 0x318   : > { %2764 = vmax.xlane.f32.xlu2 %v6239_v18  ;;  %v2356_v51 = vpop.f32.mrf.mxu2 }
 0x319   : > { %v2357_v5 = vadd.f32 %v2356_v51, %v2256_v55 }
 0x31b   : > { %v2470_v57 = vadd.f32 %v2469_v24, %v2357_v5 }
 0x31c   : > { %v2554_v15 = vpop.f32.mrf.mxu0 }
 0x31d   : > { %v2635_v29 = vpop.f32.mrf.mxu1  ;;  %v2555_v27 = vadd.f32 %v2554_v15, %v2446_v52 }
 0x31e   : > { %v6244_v47 = vadd.f32 %v2635_v29, %v2551_v12  ;;  %v2481_v15 = vpop.f32.mrf.mxu3 }
 0x320   : > { %2766 = vmax.xlane.f32.xlu0 %v6244_v47  ;;  %v2361_v8 = vpop.f32.mrf.mxu2 }
 0x321   : > { %v2362_v0 = vadd.f32 %v2361_v8, %v2260_v43  ;;  %v6908_v43 = vld [vmem:[#allocation25_spill] sm:$0xff] }
 0x323   : > { %v2476_v12 = vadd.f32 %v2475_v28, %v2362_v0 }
 0x324   : > { %v2558_v2 = vpop.f32.mrf.mxu0 }
 0x325   : > { %v2639_v20 = vpop.f32.mrf.mxu1  ;;  %v2559_v13 = vadd.f32 %v2558_v2, %v2452_v3  ;;  %v6903_v3 = vld [vmem:[#allocation22_spill] sm:$0xff] }
 0x326   : > { %v6249_v37 = vadd.f32 %v2639_v20, %v2555_v27  ;;  %v2487_v17 = vpop.f32.mrf.mxu3 }
 0x328   : > { %2768 = vmax.xlane.f32.xlu1 %v6249_v37  ;;  %v2366_v30 = vpop.f32.mrf.mxu2 }
 0x329   : > { %v2367_v40 = vadd.f32 %v2366_v30, %v2264_v25  ;;  %v6910_v30 = vld [vmem:[#allocation27_spill] sm:$0xff] }
 0x32a   : > { %v2681_v25 = vmul.f32 %v6910_v30, %v6910_v30 }
 0x32b   : > { %v2482_v52 = vadd.f32 %v2481_v15, %v2367_v40 }
 0x32c   : > { %v2562_v32 = vpop.f32.mrf.mxu0 }
 0x32d   : > { %v2643_v1 = vpop.f32.mrf.mxu1  ;;  %v2563_v6 = vadd.f32 %v2562_v32, %v2458_v22 }
 0x32e   : > { %v6254_v39 = vadd.f32 %v2643_v1, %v2559_v13  ;;  %v2674_v13 = vmul.f32 %v6903_v3, %v6903_v3  ;;  %v2493_v4 = vpop.f32.mrf.mxu3  ;;  %v6916_v3 = vld [vmem:[#allocation42_spill] sm:$0xff] }
 0x330   : > { %2770 = vmax.xlane.f32.xlu2 %v6254_v39  ;;  %v2371_v49 = vpop.f32.mrf.mxu2  ;;  %v2690_v59 = vsel %vm1975_vm3, %v2674_v13, 0.0  ;;  %v2688_v13 = vmul.f32 %v6916_v3, %v6916_v3 }
 0x331   : > { %v2372_v20 = vadd.f32 %v2371_v49, %v2268_v54  ;;  %v6913_v54 = vld [vmem:[#allocation34_spill] sm:$0xff] }
 0x333   : > { %v2488_v41 = vadd.f32 %v2487_v17, %v2372_v20  ;;  %v6915_v17 = vld [vmem:[#allocation36_spill] sm:$0xff] }
 0x334   : > { %v2566_v63 = vpop.f32.mrf.mxu0 }
 0x335   : > { %v2647_v50 = vpop.f32.mrf.mxu1  ;;  %v2567_v14 = vadd.f32 %v2566_v63, %v2464_v10  ;;  %v2676_v63 = vmul.f32 %v6905_v23, %v6905_v23 }
 0x336   : > { %v6259_v58 = vadd.f32 %v2647_v50, %v2563_v6  ;;  %v6904_v6 = vld [vmem:[#allocation21_spill] sm:$0xff] }
 0x337   : > { %v2675_v7 = vmul.f32 %v6904_v6, %v6904_v6  ;;  %v2696_v10 = vsel %vm1975_vm3, %v2676_v63, 0.0 }
 0x338   : > { %2772 = vmax.xlane.f32.xlu0 %v6259_v58  ;;  %v2376_v44 = vpop.f32.mrf.mxu2 }
 0x339   : > { %v2377_v1 = vadd.f32 %v2376_v44, %v2272_v33  ;;  %v2693_v55 = vsel %vm1975_vm3, %v2675_v7, 0.0 }
 0x33b   : > { %v2494_v51 = vadd.f32 %v2493_v4, %v2377_v1 }
 0x33c   : > { %v2570_v62 = vpop.f32.mrf.mxu0 }
 0x33d   : > { %v2651_v46 = vpop.f32.mrf.mxu1  ;;  %v2571_v42 = vadd.f32 %v2570_v62, %v2470_v57  ;;  %v2679_v57 = vmul.f32 %v6908_v43, %v6908_v43 }
 0x33e   : > { %v6264_v11 = vadd.f32 %v2651_v46, %v2567_v14  ;;  %v6906_v14 = vld [vmem:[#allocation23_spill] sm:$0xff]  ;;  %v6907_v46 = vld [vmem:[#allocation26_spill] sm:$0xff] }
 0x33f   : > { %v2677_v62 = vmul.f32 %v6906_v14, %v6906_v14  ;;  %v2678_v5 = vmul.f32 %v6907_v46, %v6907_v46 }
 0x340   : > { %2774 = vmax.xlane.f32.xlu1 %v6264_v11 }
 0x341   : > { %v2699_v8 = vsel %vm1975_vm3, %v2677_v62, 0.0  ;;  %v2702_v28 = vsel %vm1975_vm3, %v2678_v5, 0.0 }
 0x344   : > { %v2574_v21 = vpop.f32.mrf.mxu0 }
 0x345   : > { %v2655_v16 = vpop.f32.mrf.mxu1  ;;  %v2575_v29 = vadd.f32 %v2574_v21, %v2476_v12  ;;  %v6911_v12 = vld [vmem:[#allocation31_spill] sm:$0xff] }
 0x346   : > { %v6269_v48 = vadd.f32 %v2655_v16, %v2571_v42  ;;  %v6909_v42 = vld [vmem:[#allocation28_spill] sm:$0xff]  ;;  %v2705_v16 = vsel %vm1975_vm3, %v2679_v57, 0.0  ;;  %v2682_v15 = vmul.f32 %v6911_v12, %v6911_v12 }
 0x347   : > { %v2680_v21 = vmul.f32 %v6909_v42, %v6909_v42 }
 0x348   : > { %2776 = vmax.xlane.f32.xlu2 %v6269_v48 }
 0x349   : > { %v2708_v0 = vsel %vm1975_vm3, %v2680_v21, 0.0 }
 0x34c   : > { %v2578_v19 = vpop.f32.mrf.mxu0 }
 0x34d   : > { %v2659_v36 = vpop.f32.mrf.mxu1  ;;  %v2579_v27 = vadd.f32 %v2578_v19, %v2482_v52  ;;  %v2714_v19 = vsel %vm1975_vm3, %v2682_v15, 0.0  ;;  %v2684_v52 = vmul.f32 %v6913_v54, %v6913_v54 }
 0x34e   : > { %v6274_v56 = vadd.f32 %v2659_v36, %v2575_v29  ;;  %v2711_v29 = vsel %vm1975_vm3, %v2681_v25, 0.0  ;;  %v6912_v36 = vld [vmem:[#allocation29_spill] sm:$0xff] }
 0x34f   : > { %v2683_v40 = vmul.f32 %v6912_v36, %v6912_v36 }
 0x350   : > { %2778 = vmax.xlane.f32.xlu0 %v6274_v56 }
 0x351   : > { %v2717_v49 = vsel %vm1975_vm3, %v2683_v40, 0.0 }
 0x354   : > { %v2582_v38 = vpop.f32.mrf.mxu0 }
 0x355   : > { %v2663_v2 = vpop.f32.mrf.mxu1  ;;  %v2583_v32 = vadd.f32 %v2582_v38, %v2488_v41  ;;  %v2687_v38 = vmul.f32 %v6915_v17, %v6915_v17 }
 0x356   : > { %v6279_v45 = vadd.f32 %v2663_v2, %v2579_v27  ;;  %v2720_v27 = vsel %vm1975_vm3, %v2684_v52, 0.0  ;;  %v6914_v2 = vld [vmem:[#allocation32_spill] sm:$0xff] }
 0x357   : > { %v2685_v20 = vmul.f32 %v6914_v2, %v6914_v2  ;;  %v2729_v41 = vsel %vm1975_vm3, %v2687_v38, 0.0 }
 0x358   : > { %2780 = vmax.xlane.f32.xlu1 %v6279_v45 }
 0x359   : > { %v2723_v33 = vsel %vm1975_vm3, %v2685_v20, 0.0  ;;  %v2807_v20 = vld [vmem:[#allocation2] sm:$0x1] }
 0x35c   : > { %v2586_v22 = vpop.f32.mrf.mxu0 }
 0x35d   : > { %v2667_v9 = vpop.f32.mrf.mxu1  ;;  %v2587_v50 = vadd.f32 %v2586_v22, %v2494_v51 }
 0x35e   : > { %v6286_v53 = vadd.f32 %v2667_v9, %v2583_v32  ;;  %v6917_v32 = vld [vmem:[#allocation41_spill] sm:$0xff]  ;;  %v2732_v9 = vsel %vm1975_vm3, %v2688_v13, 0.0 }
 0x35f   : > { %v2689_v44 = vmul.f32 %v6917_v32, %v6917_v32 }
 0x360   : > { %2782 = vmax.xlane.f32.xlu2 %v6286_v53  ;;  %2691 = vadd.xlane.f32.xlu1 %v2690_v59  ;;  %v2755_v59 = vpop.xlane.xlu0 %2754 }
 0x361   : > { %v2735_v1 = vsel %vm1975_vm3, %v2689_v44, 0.0  ;;  %v6918_v44 = vld [vmem:[#allocation38_spill] sm:$0xff] }
 0x365   : > { %v2671_v60 = vpop.f32.mrf.mxu1 }
 0x366   : > { %v6294_v24 = vadd.f32 %v2671_v60, %v2587_v50 }
 0x368   : > { %2694 = vadd.xlane.f32.xlu2 %v2693_v55  ;;  %2697 = vadd.xlane.f32.xlu1 %v2696_v10  ;;  %v2757_v51 = vpop.xlane.xlu0 %2756  ;;  %v4349_v55 = vmov 0  }
 0x369   : > { %2784 = vmax.xlane.f32.xlu0 %v6294_v24  ;;  %4200 = vset.pattern.permute.xlu1 %v4349_v55 }
 0x36a   : > { %4199 = vset.pattern.permute.xlu0 %v4349_v55 }
 0x370   : > { %2700 = vadd.xlane.f32.xlu2 %v2699_v8  ;;  %2703 = vadd.xlane.f32.xlu1 %v2702_v28 }
 0x371   : > { %v2759_v4 = vpop.xlane.xlu1 %2758 }
 0x378   : > { %2706 = vadd.xlane.f32.xlu2 %v2705_v16  ;;  %2709 = vadd.xlane.f32.xlu1 %v2708_v0 }
 0x37a   : > { %v2761_v6 = vpop.xlane.xlu1 %2760 }
 0x380   : > { %2712 = vadd.xlane.f32.xlu2 %v2711_v29  ;;  %2715 = vadd.xlane.f32.xlu1 %v2714_v19 }
 0x383   : > { %v2763_v22 = vpop.xlane.xlu2 %2762 }
 0x384   : > { %v2786_v8 = vmax.f32 %v2755_v59, %v2763_v22 }
 0x388   : > { %2718 = vadd.xlane.f32.xlu2 %v2717_v49  ;;  %2721 = vadd.xlane.f32.xlu1 %v2720_v27 }
 0x38b   : > { %v2765_v7 = vpop.xlane.xlu2 %2764 }
 0x38c   : > { %v2787_v46 = vmax.f32 %v2757_v51, %v2765_v7 }
 0x390   : > { %2724 = vadd.xlane.f32.xlu2 %v2723_v33  ;;  %2730 = vadd.xlane.f32.xlu1 %v2729_v41 }
 0x393   : > { %v2767_v23 = vpop.xlane.xlu0 %2766 }
 0x394   : > { %v2788_v28 = vmax.f32 %v2759_v4, %v2767_v23 }
 0x398   : > { %2733 = vadd.xlane.f32.xlu2 %v2732_v9  ;;  %2736 = vadd.xlane.f32.xlu1 %v2735_v1  ;;  %v2686_v9 = vmul.f32 %v6918_v44, %v6918_v44 }
 0x39a   : > { %v2726_v1 = vsel %vm1975_vm3, %v2686_v9, 0.0 }
 0x39b   : > { %v2769_v63 = vpop.xlane.xlu1 %2768 }
 0x39c   : > { %v2789_v43 = vmax.f32 %v2761_v6, %v2769_v63 }
 0x3a3   : > { %v2771_v50 = vpop.xlane.xlu2 %2770 }
 0x3a4   : > { %v2790_v21 = vmax.f32 %v2786_v8, %v2771_v50 }
 0x3ab   : > { %v2773_v60 = vpop.xlane.xlu0 %2772 }
 0x3ac   : > { %v2791_v57 = vmax.f32 %v2787_v46, %v2773_v60 }
 0x3b3   : > { %v2775_v10 = vpop.xlane.xlu1 %2774 }
 0x3b4   : > { %v2792_v16 = vmax.f32 %v2788_v28, %v2775_v10 }
 0x3bb   : > { %v2777_v14 = vpop.xlane.xlu2 %2776 }
 0x3bc   : > { %v2793_v0 = vmax.f32 %v2789_v43, %v2777_v14 }
 0x3c3   : > { %v2779_v62 = vpop.xlane.xlu0 %2778 }
 0x3c4   : > { %v2794_v12 = vmax.f32 %v2790_v21, %v2779_v62 }
 0x3cb   : > { %v2781_v5 = vpop.xlane.xlu1 %2780 }
 0x3cc   : > { %v2795_v30 = vmax.f32 %v2791_v57, %v2781_v5 }
 0x3ce   : > { %v2798_v19 = vmax.f32 %v2794_v12, %v2795_v30 }
 0x3d3   : > { %v2783_v42 = vpop.xlane.xlu2 %2782  ;;  %v2692_v59 = vpop.xlane.xlu1 %2691 }
 0x3d4   : > { %v2796_v15 = vmax.f32 %v2792_v16, %v2783_v42  ;;  %v2738_v7 = vmul.f32 0.5, %v2692_v59 }
 0x3d6   : > { %v2812_v50 = vsub.f32 %v6214_v35, %v2738_v7 }
 0x3db   : > { %v2695_v4 = vpop.xlane.xlu2 %2694  ;;  %v2698_v22 = vpop.xlane.xlu1 %2697 }
 0x3dc   : > { %v2785_v25 = vpop.xlane.xlu0 %2784  ;;  %v2739_v23 = vmul.f32 0.5, %v2695_v4  ;;  %v2740_v55 = vmul.f32 0.5, %v2698_v22 }
 0x3dd   : > { %v2797_v29 = vmax.f32 %v2793_v0, %v2785_v25 }
 0x3de   : > { %v2813_v60 = vsub.f32 %v6219_v61, %v2739_v23  ;;  %v2814_v8 = vsub.f32 %v6224_v31, %v2740_v55 }
 0x3df   : > { %v2799_v36 = vmax.f32 %v2796_v15, %v2797_v29 }
 0x3e1   : > { %v2800_v40 = vmax.f32 %v2798_v19, %v2799_v36 }
 0x3e3   : > { %v2801_v54 = vrot.slane %v2800_v40, 4  ;;  %v2701_v51 = vpop.xlane.xlu2 %2700  ;;  %v2704_v6 = vpop.xlane.xlu1 %2703 }
 0x3e4   : > { %v2741_v28 = vmul.f32 0.5, %v2701_v51  ;;  %v2742_v42 = vmul.f32 0.5, %v2704_v6 }
 0x3e5   : > { %v2802_v52 = vmax.f32 %v2800_v40, %v2801_v54 }
 0x3e6   : > { %v2815_v35 = vsub.f32 %v6229_v26, %v2741_v28  ;;  %v2816_v25 = vsub.f32 %v6234_v34, %v2742_v42 }
 0x3e7   : > { %v2803_v49 = vrot.slane %v2802_v52, 2 }
 0x3e9   : > { %v2804_v27 = vmax.f32 %v2802_v52, %v2803_v49 }
 0x3eb   : > { %v2805_v2 = vrot.slane %v2804_v27, 1  ;;  %v2707_v63 = vpop.xlane.xlu2 %2706  ;;  %v2710_v14 = vpop.xlane.xlu1 %2709 }
 0x3ec   : > { %v2743_v12 = vmul.f32 0.5, %v2707_v63  ;;  %v2744_v26 = vmul.f32 0.5, %v2710_v14 }
 0x3ed   : > { %v2806_v17 = vmax.f32 %v2804_v27, %v2805_v2 }
 0x3ee   : > { %v2817_v19 = vsub.f32 %v6239_v18, %v2743_v12  ;;  %v2818_v27 = vsub.f32 %v6244_v47, %v2744_v26 }
 0x3ef   : > { %v2808_v38 = vmax.f32 %v2807_v20, %v2806_v17 }
 0x3f1   : > { %v2829_v33 = vperm.slane %v2808_v38, 0  ;;  %3862 = vst.msk [vmem:[#allocation2] sm:$0x1] %vm3861_vm5, %v2808_v38  ;;  %v2809_v41 = vsub.f32 %v2807_v20, %v2808_v38 }
 0x3f3   : > { %2831 = vperm.xlu0 %4199, %v2829_v33   ;;  %v2810_v3 = vmul.f32 1.442695, %v2809_v41  ;;  %v2713_v61 = vpop.xlane.xlu2 %2712  ;;  %v2716_v30 = vpop.xlane.xlu1 %2715 }
 0x3f4   : > { %v2745_v34 = vmul.f32 0.5, %v2713_v61  ;;  %v2746_v41 = vmul.f32 0.5, %v2716_v30 }
 0x3f5   : > { %4201 = vpow2.f32 %v2810_v3 }
 0x3f6   : > { %v2819_v18 = vsub.f32 %v6249_v37, %v2745_v34  ;;  %v2820_v47 = vsub.f32 %v6254_v39, %v2746_v41 }
 0x3fb   : > { %v4202_v13 = vpop.eup %4201  ;;  %v2719_v40 = vpop.xlane.xlu2 %2718 }
 0x3fc   : > { %2885 = vperm.xlu1 %4200, %v4202_v13   ;;  %v2929_v32 = vperm.slane %v4202_v13, 0  ;;  %v2722_v2 = vpop.xlane.xlu1 %2721  ;;  %v2747_v9 = vmul.f32 0.5, %v2719_v40 }
 0x3fd   : > { %v2748_v7 = vmul.f32 0.5, %v2722_v2 }
 0x3fe   : > { %v2821_v37 = vsub.f32 %v6259_v58, %v2747_v9 }
 0x3ff   : > { %v2822_v39 = vsub.f32 %v6264_v11, %v2748_v7 }
 0x404   : > { %2931 = vperm.xlu1 %4200, %v2929_v32   ;;  %v2731_v51 = vpop.xlane.xlu1 %2730 }
 0x405   : > { %v2751_v28 = vmul.f32 0.5, %v2731_v51 }
 0x41d   : > { %2727 = vadd.xlane.f32.xlu0 %v2726_v1  ;;  %v2725_v1 = vpop.xlane.xlu2 %2724 }
 0x41e   : > { %v2749_v55 = vmul.f32 0.5, %v2725_v1  ;;  %v2882_v1 = vld [vmem:[#allocation3] sm:$0x1] }
 0x420   : > { %v2823_v58 = vsub.f32 %v6269_v48, %v2749_v55 }
 0x465   : > { %v6340_v10 = vpop.permute.xlu0 %2831 }
 0x466   : > { %v2834_v62 = vsub.f32 %v2812_v50, %v6340_v10  ;;  %v2835_v46 = vsub.f32 %v2813_v60, %v6340_v10  ;;  %v2836_v57 = vsub.f32 %v2814_v8, %v6340_v10  ;;  %v2837_v16 = vsub.f32 %v2815_v35, %v6340_v10 }
 0x467   : > { %v2838_v29 = vsub.f32 %v2816_v25, %v6340_v10  ;;  %v2839_v54 = vsub.f32 %v2817_v19, %v6340_v10  ;;  %v2840_v17 = vsub.f32 %v2818_v27, %v6340_v10  ;;  %v2841_v13 = vsub.f32 %v2819_v18, %v6340_v10 }
 0x468   : > { %v2850_v5 = vmul.f32 1.442695, %v2834_v62  ;;  %v2852_v43 = vmul.f32 1.442695, %v2835_v46  ;;  %v2854_v21 = vmul.f32 1.442695, %v2836_v57  ;;  %v2842_v4 = vsub.f32 %v2820_v47, %v6340_v10  ;;  %v2734_v62 = vpop.xlane.xlu2 %2733  ;;  %v2737_v57 = vpop.xlane.xlu1 %2736 }
 0x469   : > { %v2856_v15 = vmul.f32 1.442695, %v2837_v16  ;;  %v2858_v52 = vmul.f32 1.442695, %v2838_v29  ;;  %v2860_v38 = vmul.f32 1.442695, %v2839_v54  ;;  %v2843_v63 = vsub.f32 %v2821_v37, %v6340_v10 }
 0x46a   : > { %4203 = vpow2.f32 %v2850_v5  ;;  %v2862_v32 = vmul.f32 1.442695, %v2840_v17  ;;  %v2864_v22 = vmul.f32 1.442695, %v2841_v13  ;;  %v2866_v50 = vmul.f32 1.442695, %v2842_v4 }
 0x46b   : > { %4205 = vpow2.f32 %v2852_v43  ;;  %v2844_v46 = vsub.f32 %v2822_v39, %v6340_v10  ;;  %v2868_v5 = vmul.f32 1.442695, %v2843_v63  ;;  %v2752_v43 = vmul.f32 0.5, %v2734_v62 }
 0x46c   : > { %4207 = vpow2.f32 %v2854_v21  ;;  %v2845_v42 = vsub.f32 %v2823_v58, %v6340_v10  ;;  %v2825_v16 = vsub.f32 %v6279_v45, %v2751_v28 }
 0x46d   : > { %4209 = vpow2.f32 %v2856_v15  ;;  %v2870_v61 = vmul.f32 1.442695, %v2844_v46  ;;  %v2826_v25 = vsub.f32 %v6286_v53, %v2752_v43 }
 0x46e   : > { %4211 = vpow2.f32 %v2858_v52  ;;  %v2847_v48 = vsub.f32 %v2825_v16, %v6340_v10 }
 0x46f   : > { %4213 = vpow2.f32 %v2860_v38 }
 0x470   : > { %v4204_v0 = vpop.eup %4203  ;;  %4215 = vpow2.f32 %v2862_v32  ;;  %v2876_v40 = vmul.f32 1.442695, %v2847_v48  ;;  %v2886_v32 = vpop.permute.xlu1 %2885 }
 0x471   : > { %2950 = vxpose.xlu2.b32.start [1/16] %v4204_v0, 128  ;;  %v4206_v31 = vpop.eup %4205  ;;  %4217 = vpow2.f32 %v2864_v22  ;;  %v2888_v47 = vperm.slane %v2886_v32, 0 }
 0x472   : > { %v2890_v36 = vadd.f32 %v4206_v31, %v4204_v0  ;;  %v4208_v49 = vpop.eup %4207  ;;  %4219 = vpow2.f32 %v2866_v50  ;;  %v2753_v0 = vmul.f32 0.5, %v2737_v57 }
 0x473   : > { %v4210_v33 = vpop.eup %4209  ;;  %4221 = vpow2.f32 %v2868_v5  ;;  %v2889_v4 = vmul.f32 %v2888_v47, %v2882_v1 }
 0x474   : > { %v2891_v20 = vadd.f32 %v4208_v49, %v2890_v36  ;;  %v4212_v44 = vpop.eup %4211  ;;  %4223 = vpow2.f32 %v2870_v61  ;;  %v2827_v19 = vsub.f32 %v6294_v24, %v2753_v0  ;;  %v2848_v36 = vsub.f32 %v2826_v25, %v6340_v10 }
 0x475   : > { %v4214_v6 = vpop.eup %4213 }
 0x476   : > { %v2892_v3 = vadd.f32 %v4210_v33, %v2891_v20  ;;  %v4216_v60 = vpop.eup %4215  ;;  %v2849_v53 = vsub.f32 %v2827_v19, %v6340_v10 }
 0x477   : > { %v4218_v8 = vpop.eup %4217 }
 0x478   : > { %v2893_v59 = vadd.f32 %v4212_v44, %v2892_v3  ;;  %v4220_v21 = vpop.eup %4219 }
 0x479   : > { %2951 = vxpose.xlu2.b32.cont [2/16] %v4206_v31, 128  ;;  %v2872_v31 = vmul.f32 1.442695, %v2845_v42  ;;  %v4222_v29 = vpop.eup %4221 }
 0x47a   : > { %v2894_v23 = vadd.f32 %v4214_v6, %v2893_v59  ;;  %v4224_v52 = vpop.eup %4223 }
 0x47b   : > { %4225 = vpow2.f32 %v2872_v31 }
 0x47c   : > { %v2895_v14 = vadd.f32 %v4216_v60, %v2894_v23 }
 0x47e   : > { %v2896_v35 = vadd.f32 %v4218_v8, %v2895_v14 }
 0x480   : > { %v2897_v12 = vadd.f32 %v4220_v21, %v2896_v35 }
 0x481   : > { %2952 = vxpose.xlu2.b32.cont [3/16] %v4208_v49, 128  ;;  %v2878_v49 = vmul.f32 1.442695, %v2848_v36  ;;  %v4226_v34 = vpop.eup %4225 }
 0x482   : > { %v2898_v45 = vadd.f32 %v4222_v29, %v2897_v12 }
 0x484   : > { %v2899_v27 = vadd.f32 %v4224_v52, %v2898_v45 }
 0x486   : > { %v2900_v24 = vadd.f32 %v4226_v34, %v2899_v27 }
 0x489   : > { %2953 = vxpose.xlu2.b32.cont [4/16] %v4210_v33, 128 }
 0x490   : > { %v2728_v11 = vpop.xlane.xlu0 %2727 }
 0x491   : > { %v2750_v30 = vmul.f32 0.5, %v2728_v11  ;;  %2954 = vxpose.xlu2.b32.cont [5/16] %v4212_v44, 128 }
 0x493   : > { %v2824_v15 = vsub.f32 %v6274_v56, %v2750_v30  ;;  %v2880_v56 = vmul.f32 1.442695, %v2849_v53 }
 0x495   : > { %v2846_v26 = vsub.f32 %v2824_v15, %v6340_v10 }
 0x497   : > { %v2874_v54 = vmul.f32 1.442695, %v2846_v26 }
 0x499   : > { %4227 = vpow2.f32 %v2874_v54  ;;  %2955 = vxpose.xlu2.b32.cont [6/16] %v4214_v6, 128 }
 0x49a   : > { %4229 = vpow2.f32 %v2876_v40 }
 0x49b   : > { %4231 = vpow2.f32 %v2878_v49 }
 0x49c   : > { %4233 = vpow2.f32 %v2880_v56 }
 0x49f   : > { %v4228_v2 = vpop.eup %4227 }
 0x4a0   : > { %v2901_v20 = vadd.f32 %v4228_v2, %v2900_v24  ;;  %v4230_v17 = vpop.eup %4229 }
 0x4a1   : > { %2956 = vxpose.xlu2.b32.cont [7/16] %v4216_v60, 128  ;;  %v4232_v33 = vpop.eup %4231 }
 0x4a2   : > { %v2902_v38 = vadd.f32 %v4230_v17, %v2901_v20  ;;  %v4234_v41 = vpop.eup %4233 }
 0x4a4   : > { %v2903_v18 = vadd.f32 %v4232_v33, %v2902_v38 }
 0x4a6   : > { %v2904_v10 = vadd.f32 %v4234_v41, %v2903_v18 }
 0x4a8   : > { %v2905_v3 = vrot.slane %v2904_v10, 4 }
 0x4a9   : > { %2957 = vxpose.xlu2.b32.cont [8/16] %v4218_v8, 128 }
 0x4aa   : > { %v2906_v13 = vadd.f32 %v2905_v3, %v2904_v10 }
 0x4ac   : > { %v2907_v44 = vrot.slane %v2906_v13, 2 }
 0x4ae   : > { %v2908_v9 = vadd.f32 %v2907_v44, %v2906_v13 }
 0x4b0   : > { %v2909_v59 = vrot.slane %v2908_v9, 1 }
 0x4b1   : > { %2958 = vxpose.xlu2.b32.cont [9/16] %v4220_v21, 128 }
 0x4b2   : > { %v2910_v22 = vadd.f32 %v2909_v59, %v2908_v9 }
 0x4b4   : > { %v2911_v51 = vadd.f32 %v2910_v22, %v2889_v4 }
 0x4b6   : > { %2912 = vst [vmem:[#allocation3] sm:$0x1] %v2911_v51 }
 0x4b9   : > { %2959 = vxpose.xlu2.b32.cont [10/16] %v4222_v29, 128 }
 0x4c1   : > { %2960 = vxpose.xlu2.b32.cont [11/16] %v4224_v52, 128 }
 0x4c9   : > { %2961 = vxpose.xlu2.b32.cont [12/16] %v4226_v34, 128 }
 0x4d1   : > { %2962 = vxpose.xlu2.b32.cont [13/16] %v4228_v2, 128 }
 0x4d9   : > { %2963 = vxpose.xlu2.b32.cont [14/16] %v4230_v17, 128 }
 0x4e1   : > { %2964 = vxpose.xlu2.b32.cont [15/16] %v4232_v33, 128 }
 0x4e9   : > { %2965 = vxpose.xlu2.b32.end [16/16] %v4234_v41, 128 }
 0x50a   : > { %v2966_v6 = vpop.trf.xlu2 }
 0x50b   : > { %v6372_v37 = vand.u32 4294901760, %v2966_v6 }
 0x50d   : > { %v3015_v7 = vsub.f32 %v2966_v6, %v6372_v37  ;;  %3240 = vmatmul.f32.vlgmr.msra.gmra.mxu3 %v6372_v37 }
 0x50f   : > { %v3016_v23 = vand.u32 4294901760, %v3015_v7  ;;  %3354 = vmatmul.f32.vlgmr.msrb.gmra.mxu0 %v3015_v7 }
 0x511   : > { %v3017_v63 = vsub.f32 %v3015_v7, %v3016_v23  ;;  %3468 = vmatmul.f32.vlgmr.msrb.gmra.mxu1 %v3016_v23 }
 0x512   : > { %v2967_v50 = vpop.trf.xlu2 }
 0x513   : > { %v3018_v60 = vand.u32 4294901760, %v3017_v63  ;;  %v6376_v39 = vand.u32 4294901760, %v2967_v50 }
 0x515   : > { %v3023_v55 = vsub.f32 %v2967_v50, %v6376_v39  ;;  %3019 = vmatmul.f32.vlgmr.msra.gmra.mxu2 %v3018_v60  ;;  %3244 = vmatmul.f32.gmra.mxu3 %v6376_v39 }
 0x517   : > { %3359 = vmatmul.f32.gmra.mxu0 %v3023_v55  ;;  %v3024_v14 = vand.u32 4294901760, %v3023_v55 }
 0x519   : > { %3474 = vmatmul.f32.gmra.mxu1 %v3024_v14  ;;  %v3025_v62 = vsub.f32 %v3023_v55, %v3024_v14 }
 0x51a   : > { %v2968_v46 = vpop.trf.xlu2 }
 0x51b   : > { %v6380_v5 = vand.u32 4294901760, %v2968_v46  ;;  %v3026_v8 = vand.u32 4294901760, %v3025_v62 }
 0x51d   : > { %v3031_v58 = vsub.f32 %v2968_v46, %v6380_v5  ;;  %3027 = vmatmul.f32.gmra.mxu2 %v3026_v8  ;;  %3248 = vmatmul.f32.gmra.mxu3 %v6380_v5 }
 0x51f   : > { %3364 = vmatmul.f32.gmra.mxu0 %v3031_v58  ;;  %v3032_v28 = vand.u32 4294901760, %v3031_v58 }
 0x521   : > { %3480 = vmatmul.f32.gmra.mxu1 %v3032_v28  ;;  %v3033_v43 = vsub.f32 %v3031_v58, %v3032_v28 }
 0x522   : > { %v2969_v57 = vpop.trf.xlu2 }
 0x523   : > { %v6384_v35 = vand.u32 4294901760, %v2969_v57  ;;  %v3034_v42 = vand.u32 4294901760, %v3033_v43 }
 0x525   : > { %v3039_v61 = vsub.f32 %v2969_v57, %v6384_v35  ;;  %3035 = vmatmul.f32.gmra.mxu2 %v3034_v42  ;;  %3252 = vmatmul.f32.gmra.mxu3 %v6384_v35 }
 0x527   : > { %3369 = vmatmul.f32.gmra.mxu0 %v3039_v61  ;;  %v3040_v11 = vand.u32 4294901760, %v3039_v61 }
 0x529   : > { %3486 = vmatmul.f32.gmra.mxu1 %v3040_v11  ;;  %v3041_v21 = vsub.f32 %v3039_v61, %v3040_v11 }
 0x52a   : > { %v2970_v16 = vpop.trf.xlu2 }
 0x52b   : > { %v6388_v0 = vand.u32 4294901760, %v2970_v16  ;;  %v3042_v30 = vand.u32 4294901760, %v3041_v21 }
 0x52d   : > { %v3047_v25 = vsub.f32 %v2970_v16, %v6388_v0  ;;  %3043 = vmatmul.f32.gmra.mxu2 %v3042_v30  ;;  %3256 = vmatmul.f32.gmra.mxu3 %v6388_v0 }
 0x52f   : > { %3374 = vmatmul.f32.gmra.mxu0 %v3047_v25  ;;  %v3048_v12 = vand.u32 4294901760, %v3047_v25 }
 0x531   : > { %3492 = vmatmul.f32.gmra.mxu1 %v3048_v12  ;;  %v3049_v48 = vsub.f32 %v3047_v25, %v3048_v12 }
 0x532   : > { %v2971_v31 = vpop.trf.xlu2 }
 0x533   : > { %v6392_v15 = vand.u32 4294901760, %v2971_v31  ;;  %v3050_v29 = vand.u32 4294901760, %v3049_v48 }
 0x535   : > { %v3055_v19 = vsub.f32 %v2971_v31, %v6392_v15  ;;  %3051 = vmatmul.f32.gmra.mxu2 %v3050_v29  ;;  %3260 = vmatmul.f32.gmra.mxu3 %v6392_v15 }
 0x537   : > { %3379 = vmatmul.f32.gmra.mxu0 %v3055_v19  ;;  %v3056_v26 = vand.u32 4294901760, %v3055_v19 }
 0x539   : > { %3498 = vmatmul.f32.gmra.mxu1 %v3056_v26  ;;  %v3057_v36 = vsub.f32 %v3055_v19, %v3056_v26 }
 0x53a   : > { %v2972_v45 = vpop.trf.xlu2 }
 0x53b   : > { %v6396_v40 = vand.u32 4294901760, %v2972_v45  ;;  %v3058_v54 = vand.u32 4294901760, %v3057_v36 }
 0x53d   : > { %v3063_v53 = vsub.f32 %v2972_v45, %v6396_v40  ;;  %3059 = vmatmul.f32.gmra.mxu2 %v3058_v54  ;;  %3264 = vmatmul.f32.gmra.mxu3 %v6396_v40 }
 0x53f   : > { %3384 = vmatmul.f32.gmra.mxu0 %v3063_v53  ;;  %v3064_v52 = vand.u32 4294901760, %v3063_v53 }
 0x541   : > { %3504 = vmatmul.f32.gmra.mxu1 %v3064_v52  ;;  %v3065_v49 = vsub.f32 %v3063_v53, %v3064_v52 }
 0x542   : > { %v2973_v27 = vpop.trf.xlu2 }
 0x543   : > { %v6400_v56 = vand.u32 4294901760, %v2973_v27  ;;  %v3066_v34 = vand.u32 4294901760, %v3065_v49 }
 0x545   : > { %v3071_v24 = vsub.f32 %v2973_v27, %v6400_v56  ;;  %3067 = vmatmul.f32.gmra.mxu2 %v3066_v34  ;;  %3268 = vmatmul.f32.gmra.mxu3 %v6400_v56 }
 0x547   : > { %3389 = vmatmul.f32.gmra.mxu0 %v3071_v24  ;;  %v3072_v2 = vand.u32 4294901760, %v3071_v24 }
 0x549   : > { %3510 = vmatmul.f32.gmra.mxu1 %v3072_v2  ;;  %v3073_v20 = vsub.f32 %v3071_v24, %v3072_v2 }
 0x54a   : > { %v2974_v17 = vpop.trf.xlu2 }
 0x54b   : > { %v6404_v38 = vand.u32 4294901760, %v2974_v17  ;;  %v3074_v33 = vand.u32 4294901760, %v3073_v20 }
 0x54d   : > { %v3079_v18 = vsub.f32 %v2974_v17, %v6404_v38  ;;  %3075 = vmatmul.f32.gmra.mxu2 %v3074_v33  ;;  %3272 = vmatmul.f32.gmra.mxu3 %v6404_v38 }
 0x54f   : > { %3394 = vmatmul.f32.gmra.mxu0 %v3079_v18  ;;  %v3080_v41 = vand.u32 4294901760, %v3079_v18 }
 0x551   : > { %3516 = vmatmul.f32.gmra.mxu1 %v3080_v41  ;;  %v3081_v10 = vsub.f32 %v3079_v18, %v3080_v41 }
 0x552   : > { %v2975_v3 = vpop.trf.xlu2 }
 0x553   : > { %v6408_v13 = vand.u32 4294901760, %v2975_v3  ;;  %v3082_v32 = vand.u32 4294901760, %v3081_v10 }
 0x555   : > { %v3087_v44 = vsub.f32 %v2975_v3, %v6408_v13  ;;  %3083 = vmatmul.f32.gmra.mxu2 %v3082_v32  ;;  %3276 = vmatmul.f32.gmra.mxu3 %v6408_v13 }
 0x557   : > { %3399 = vmatmul.f32.gmra.mxu0 %v3087_v44  ;;  %v3088_v47 = vand.u32 4294901760, %v3087_v44 }
 0x559   : > { %3522 = vmatmul.f32.gmra.mxu1 %v3088_v47  ;;  %v3089_v9 = vsub.f32 %v3087_v44, %v3088_v47 }
 0x55a   : > { %v2976_v1 = vpop.trf.xlu2 }
 0x55b   : > { %v6412_v59 = vand.u32 4294901760, %v2976_v1  ;;  %v3090_v4 = vand.u32 4294901760, %v3089_v9 }
 0x55d   : > { %v3095_v22 = vsub.f32 %v2976_v1, %v6412_v59  ;;  %3091 = vmatmul.f32.gmra.mxu2 %v3090_v4  ;;  %3280 = vmatmul.f32.gmra.mxu3 %v6412_v59 }
 0x55f   : > { %3404 = vmatmul.f32.gmra.mxu0 %v3095_v22  ;;  %v3096_v51 = vand.u32 4294901760, %v3095_v22 }
 0x561   : > { %3528 = vmatmul.f32.gmra.mxu1 %v3096_v51  ;;  %v3097_v6 = vsub.f32 %v3095_v22, %v3096_v51 }
 0x562   : > { %v2977_v7 = vpop.trf.xlu2 }
 0x563   : > { %v6416_v23 = vand.u32 4294901760, %v2977_v7  ;;  %v3098_v63 = vand.u32 4294901760, %v3097_v6 }
 0x565   : > { %v3103_v50 = vsub.f32 %v2977_v7, %v6416_v23  ;;  %3099 = vmatmul.f32.gmra.mxu2 %v3098_v63  ;;  %3284 = vmatmul.f32.gmra.mxu3 %v6416_v23 }
 0x567   : > { %3409 = vmatmul.f32.gmra.mxu0 %v3103_v50  ;;  %v3104_v60 = vand.u32 4294901760, %v3103_v50 }
 0x569   : > { %3534 = vmatmul.f32.gmra.mxu1 %v3104_v60  ;;  %v3105_v55 = vsub.f32 %v3103_v50, %v3104_v60 }
 0x56a   : > { %v2978_v14 = vpop.trf.xlu2 }
 0x56b   : > { %v6420_v62 = vand.u32 4294901760, %v2978_v14  ;;  %v3106_v46 = vand.u32 4294901760, %v3105_v55 }
 0x56d   : > { %v3111_v8 = vsub.f32 %v2978_v14, %v6420_v62  ;;  %3107 = vmatmul.f32.gmra.mxu2 %v3106_v46  ;;  %3288 = vmatmul.f32.gmra.mxu3 %v6420_v62 }
 0x56f   : > { %3414 = vmatmul.f32.gmra.mxu0 %v3111_v8  ;;  %v3112_v58 = vand.u32 4294901760, %v3111_v8 }
 0x571   : > { %3540 = vmatmul.f32.gmra.mxu1 %v3112_v58  ;;  %v3113_v28 = vsub.f32 %v3111_v8, %v3112_v58 }
 0x572   : > { %v2979_v43 = vpop.trf.xlu2 }
 0x573   : > { %v6424_v57 = vand.u32 4294901760, %v2979_v43  ;;  %v3114_v42 = vand.u32 4294901760, %v3113_v28 }
 0x575   : > { %v3119_v61 = vsub.f32 %v2979_v43, %v6424_v57  ;;  %3115 = vmatmul.f32.gmra.mxu2 %v3114_v42  ;;  %3292 = vmatmul.f32.gmra.mxu3 %v6424_v57 }
 0x577   : > { %3419 = vmatmul.f32.gmra.mxu0 %v3119_v61  ;;  %v3120_v11 = vand.u32 4294901760, %v3119_v61 }
 0x579   : > { %3546 = vmatmul.f32.gmra.mxu1 %v3120_v11  ;;  %v3121_v21 = vsub.f32 %v3119_v61, %v3120_v11 }
 0x57a   : > { %v2980_v16 = vpop.trf.xlu2 }
 0x57b   : > { %v6428_v30 = vand.u32 4294901760, %v2980_v16  ;;  %v3122_v25 = vand.u32 4294901760, %v3121_v21 }
 0x57d   : > { %v3127_v12 = vsub.f32 %v2980_v16, %v6428_v30  ;;  %3123 = vmatmul.f32.gmra.mxu2 %v3122_v25  ;;  %3296 = vmatmul.f32.gmra.mxu3 %v6428_v30 }
 0x57f   : > { %3424 = vmatmul.f32.gmra.mxu0 %v3127_v12  ;;  %v3128_v48 = vand.u32 4294901760, %v3127_v12 }
 0x581   : > { %3552 = vmatmul.f32.gmra.mxu1 %v3128_v48  ;;  %v3129_v31 = vsub.f32 %v3127_v12, %v3128_v48 }
 0x582   : > { %v2981_v29 = vpop.trf.xlu2 }
 0x583   : > { %v6432_v19 = vand.u32 4294901760, %v2981_v29  ;;  %v3130_v26 = vand.u32 4294901760, %v3129_v31 }
 0x585   : > { %v3135_v36 = vsub.f32 %v2981_v29, %v6432_v19  ;;  %3131 = vmatmul.f32.gmra.mxu2 %v3130_v26  ;;  %3300 = vmatmul.f32.gmra.mxu3 %v6432_v19 }
 0x587   : > { %3429 = vmatmul.f32.gmra.mxu0 %v3135_v36  ;;  %v3136_v45 = vand.u32 4294901760, %v3135_v36 }
 0x589   : > { %3558 = vmatmul.f32.gmra.mxu1 %v3136_v45  ;;  %v3137_v54 = vsub.f32 %v3135_v36, %v3136_v45  ;;  %v6501_v36 = vpop.permute.xlu1 %2931  ;;  %v2913_v45 = vld [vmem:[#allocation4] sm:$0xff] }
 0x58b   : > { %v3138_v53 = vand.u32 4294901760, %v3137_v54 }
 0x58c   : > { %v3355_v14 = vpop.f32.mrf.mxu0 }
 0x58d   : > { %3139 = vmatmul.f32.gmra.mxu2 %v3138_v53  ;;  %3724 = vmatmul.f32.vlgmr.msrb.gmra.mxu3 %v6372_v37 }
 0x590   : > { %v3241_v52 = vpop.f32.mrf.mxu3 }
 0x594   : > { %v3360_v28 = vpop.f32.mrf.mxu0 }
 0x595   : > { %3627 = vmatmul.f32.vlgmr.msrb.gmra.mxu2 %v6372_v37  ;;  %3728 = vmatmul.f32.gmra.mxu3 %v6376_v39 }
 0x598   : > { %v3020_v49 = vpop.f32.mrf.mxu2  ;;  %v3245_v27 = vpop.f32.mrf.mxu3 }
 0x599   : > { %v6439_v34 = vadd.f32 %v3241_v52, %v3020_v49 }
 0x59b   : > { %v3356_v29 = vadd.f32 %v3355_v14, %v6439_v34  ;;  %v2914_v34 = vld [vmem:[#allocation4 + $0x8] sm:$0xff]  ;;  %v2916_v14 = vld [vmem:[#allocation4 + $0x18] sm:$0xff] }
 0x59d   : > { %3631 = vmatmul.f32.gmra.mxu2 %v6376_v39  ;;  %3732 = vmatmul.f32.gmra.mxu3 %v6380_v5 }
 0x5a0   : > { %v3028_v24 = vpop.f32.mrf.mxu2  ;;  %v3249_v2 = vpop.f32.mrf.mxu3 }
 0x5a1   : > { %v6443_v20 = vadd.f32 %v3245_v27, %v3028_v24 }
 0x5a3   : > { %v3361_v49 = vadd.f32 %v3360_v28, %v6443_v20 }
 0x5a5   : > { %3635 = vmatmul.f32.gmra.mxu2 %v6380_v5  ;;  %3736 = vmatmul.f32.gmra.mxu3 %v6384_v35 }
 0x5a8   : > { %v3036_v17 = vpop.f32.mrf.mxu2  ;;  %v3253_v37 = vpop.f32.mrf.mxu3 }
 0x5a9   : > { %v6447_v33 = vadd.f32 %v3249_v2, %v3036_v17 }
 0x5ad   : > { %3639 = vmatmul.f32.gmra.mxu2 %v6384_v35  ;;  %3740 = vmatmul.f32.gmra.mxu3 %v6388_v0 }
 0x5b0   : > { %v3044_v18 = vpop.f32.mrf.mxu2  ;;  %v3257_v39 = vpop.f32.mrf.mxu3 }
 0x5b1   : > { %v6451_v41 = vadd.f32 %v3253_v37, %v3044_v18 }
 0x5b5   : > { %3643 = vmatmul.f32.gmra.mxu2 %v6388_v0  ;;  %3744 = vmatmul.f32.gmra.mxu3 %v6392_v15 }
 0x5b8   : > { %v3052_v10 = vpop.f32.mrf.mxu2  ;;  %v3261_v5 = vpop.f32.mrf.mxu3 }
 0x5b9   : > { %v6455_v3 = vadd.f32 %v3257_v39, %v3052_v10 }
 0x5bd   : > { %3647 = vmatmul.f32.gmra.mxu2 %v6392_v15  ;;  %3748 = vmatmul.f32.gmra.mxu3 %v6396_v40 }
 0x5c0   : > { %v3060_v32 = vpop.f32.mrf.mxu2  ;;  %v3265_v35 = vpop.f32.mrf.mxu3 }
 0x5c1   : > { %v6459_v44 = vadd.f32 %v3261_v5, %v3060_v32  ;;  %v2935_v32 = vmul.f32 %v6501_v36, %v2914_v34  ;;  %v2919_v34 = vld [vmem:[#allocation4 + $0x30] sm:$0xff] }
 0x5c5   : > { %3651 = vmatmul.f32.gmra.mxu2 %v6396_v40  ;;  %3752 = vmatmul.f32.gmra.mxu3 %v6400_v56 }
 0x5c8   : > { %v3068_v47 = vpop.f32.mrf.mxu2  ;;  %v3269_v0 = vpop.f32.mrf.mxu3 }
 0x5c9   : > { %v6463_v9 = vadd.f32 %v3265_v35, %v3068_v47 }
 0x5cd   : > { %3655 = vmatmul.f32.gmra.mxu2 %v6400_v56  ;;  %3756 = vmatmul.f32.gmra.mxu3 %v6404_v38 }
 0x5d0   : > { %v3076_v1 = vpop.f32.mrf.mxu2  ;;  %v3273_v15 = vpop.f32.mrf.mxu3 }
 0x5d1   : > { %v6467_v4 = vadd.f32 %v3269_v0, %v3076_v1  ;;  %v2915_v1 = vld [vmem:[#allocation4 + $0x10] sm:$0xff] }
 0x5d5   : > { %3659 = vmatmul.f32.gmra.mxu2 %v6404_v38  ;;  %3760 = vmatmul.f32.gmra.mxu3 %v6408_v13 }
 0x5d8   : > { %v3084_v22 = vpop.f32.mrf.mxu2  ;;  %v3277_v40 = vpop.f32.mrf.mxu3 }
 0x5d9   : > { %v6471_v51 = vadd.f32 %v3273_v15, %v3084_v22 }
 0x5dd   : > { %3663 = vmatmul.f32.gmra.mxu2 %v6408_v13  ;;  %3764 = vmatmul.f32.gmra.mxu3 %v6412_v59 }
 0x5e0   : > { %v3092_v6 = vpop.f32.mrf.mxu2  ;;  %v3281_v56 = vpop.f32.mrf.mxu3 }
 0x5e1   : > { %v6475_v7 = vadd.f32 %v3277_v40, %v3092_v6 }
 0x5e5   : > { %3667 = vmatmul.f32.gmra.mxu2 %v6412_v59  ;;  %3768 = vmatmul.f32.gmra.mxu3 %v6416_v23  ;;  %v3469_v59 = vpop.f32.mrf.mxu1 }
 0x5e8   : > { %v3100_v63 = vpop.f32.mrf.mxu2  ;;  %v3285_v38 = vpop.f32.mrf.mxu3 }
 0x5e9   : > { %v6479_v50 = vadd.f32 %v3281_v56, %v3100_v63  ;;  %v2936_v63 = vmul.f32 %v6501_v36, %v2915_v1 }
 0x5ed   : > { %3671 = vmatmul.f32.gmra.mxu2 %v6416_v23  ;;  %3772 = vmatmul.f32.gmra.mxu3 %v6420_v62  ;;  %v3475_v42 = vpop.f32.mrf.mxu1 }
 0x5ee   : > { %v3476_v37 = vadd.f32 %v3475_v42, %v3361_v49 }
 0x5f0   : > { %v3108_v60 = vpop.f32.mrf.mxu2  ;;  %v3289_v13 = vpop.f32.mrf.mxu3 }
 0x5f1   : > { %v6483_v55 = vadd.f32 %v3285_v38, %v3108_v60 }
 0x5f5   : > { %3675 = vmatmul.f32.gmra.mxu2 %v6420_v62  ;;  %3776 = vmatmul.f32.gmra.mxu3 %v6424_v57  ;;  %v3365_v62 = vpop.f32.mrf.mxu0  ;;  %v3481_v25 = vpop.f32.mrf.mxu1 }
 0x5f6   : > { %v3366_v5 = vadd.f32 %v3365_v62, %v6447_v33 }
 0x5f8   : > { %v3116_v46 = vpop.f32.mrf.mxu2  ;;  %v3293_v8 = vpop.f32.mrf.mxu3  ;;  %v3482_v0 = vadd.f32 %v3481_v25, %v3366_v5 }
 0x5f9   : > { %v6487_v58 = vadd.f32 %v3289_v13, %v3116_v46 }
 0x5fd   : > { %3679 = vmatmul.f32.gmra.mxu2 %v6424_v57  ;;  %3780 = vmatmul.f32.gmra.mxu3 %v6428_v30  ;;  %v3370_v48 = vpop.f32.mrf.mxu0  ;;  %v3487_v26 = vpop.f32.mrf.mxu1 }
 0x5fe   : > { %v3371_v56 = vadd.f32 %v3370_v48, %v6451_v41 }
 0x600   : > { %v3124_v23 = vpop.f32.mrf.mxu2  ;;  %v3297_v43 = vpop.f32.mrf.mxu3  ;;  %v3488_v13 = vadd.f32 %v3487_v26, %v3371_v56 }
 0x601   : > { %v6491_v61 = vadd.f32 %v3293_v8, %v3124_v23 }
 0x605   : > { %3683 = vmatmul.f32.gmra.mxu2 %v6428_v30  ;;  %3784 = vmatmul.f32.gmra.mxu3 %v6432_v19  ;;  %v3470_v30 = vadd.f32 %v3469_v59, %v3356_v29  ;;  %v3375_v27 = vpop.f32.mrf.mxu0  ;;  %v3493_v17 = vpop.f32.mrf.mxu1 }
 0x606   : > { %v3376_v28 = vadd.f32 %v3375_v27, %v6455_v3 }
 0x608   : > { %v3132_v11 = vpop.f32.mrf.mxu2  ;;  %v3301_v21 = vpop.f32.mrf.mxu3  ;;  %v3494_v41 = vadd.f32 %v3493_v17, %v3376_v28 }
 0x609   : > { %v6495_v16 = vadd.f32 %v3297_v43, %v3132_v11  ;;  %v2937_v43 = vmul.f32 %v6501_v36, %v2916_v14  ;;  %v2917_v11 = vld [vmem:[#allocation4 + $0x20] sm:$0xff] }
 0x60a   : > { %v2938_v29 = vmul.f32 %v6501_v36, %v2917_v11 }
 0x60d   : > { %3687 = vmatmul.f32.gmra.mxu2 %v6432_v19  ;;  %v2934_v19 = vmul.f32 %v6501_v36, %v2913_v45  ;;  %v3380_v47 = vpop.f32.mrf.mxu0  ;;  %v3499_v40 = vpop.f32.mrf.mxu1 }
 0x60e   : > { %v3381_v48 = vadd.f32 %v3380_v47, %v6459_v44 }
 0x610   : > { %v3140_v57 = vpop.f32.mrf.mxu2  ;;  %v3725_v12 = vpop.f32.mrf.mxu3  ;;  %v3500_v45 = vadd.f32 %v3499_v40, %v3381_v48 }
 0x611   : > { %v6498_v31 = vadd.f32 %v3301_v21, %v3140_v57 }
 0x615   : > { %v3385_v33 = vpop.f32.mrf.mxu0  ;;  %v3505_v23 = vpop.f32.mrf.mxu1 }
 0x616   : > { %v3386_v27 = vadd.f32 %v3385_v33, %v6463_v9  ;;  %v2921_v33 = vld [vmem:[#allocation4 + $0x40] sm:$0xff] }
 0x618   : > { %v3628_v54 = vpop.f32.mrf.mxu2  ;;  %v3729_v53 = vpop.f32.mrf.mxu3 }
 0x619   : > { %v3629_v52 = vadd.f32 %v3628_v54, %v3470_v30  ;;  %v2918_v54 = vld [vmem:[#allocation4 + $0x28] sm:$0xff] }
 0x61b   : > { %v3726_v24 = vadd.f32 %v3725_v12, %v3629_v52 }
 0x61d   : > { %v3788_v2 = vadd.f32 %v3726_v24, %v2934_v19  ;;  %v3390_v57 = vpop.f32.mrf.mxu0  ;;  %v3511_v30 = vpop.f32.mrf.mxu1  ;;  %v2939_v24 = vmul.f32 %v6501_v36, %v2918_v54 }
 0x61e   : > { %v3391_v5 = vadd.f32 %v3390_v57, %v6467_v4 }
 0x61f   : > { %3804 = vst.msk [vmem:[#allocation4] sm:$0xff] %vm1975_vm3, %v3788_v2 }
 0x620   : > { %v3632_v18 = vpop.f32.mrf.mxu2  ;;  %v3733_v39 = vpop.f32.mrf.mxu3 }
 0x621   : > { %v3633_v10 = vadd.f32 %v3632_v18, %v3476_v37  ;;  %v3506_v37 = vadd.f32 %v3505_v23, %v3386_v27 }
 0x623   : > { %v3730_v35 = vadd.f32 %v3729_v53, %v3633_v10 }
 0x625   : > { %v3789_v20 = vadd.f32 %v3730_v35, %v2935_v32  ;;  %v3395_v19 = vpop.f32.mrf.mxu0  ;;  %v3517_v44 = vpop.f32.mrf.mxu1  ;;  %v2940_v32 = vmul.f32 %v6501_v36, %v2919_v34 }
 0x627   : > { %3805 = vst.msk [vmem:[#allocation4 + $0x8] sm:$0xff] %vm1975_vm3, %v3789_v20  ;;  %v3512_v20 = vadd.f32 %v3511_v30, %v3391_v5  ;;  %v2925_v5 = vld [vmem:[#allocation4 + $0x60] sm:$0xff] }
 0x628   : > { %v3636_v15 = vpop.f32.mrf.mxu2  ;;  %v3737_v22 = vpop.f32.mrf.mxu3 }
 0x629   : > { %v3637_v6 = vadd.f32 %v3636_v15, %v3482_v0  ;;  %v2920_v0 = vld [vmem:[#allocation4 + $0x38] sm:$0xff] }
 0x62a   : > { %v2941_v56 = vmul.f32 %v6501_v36, %v2920_v0 }
 0x62b   : > { %v3734_v38 = vadd.f32 %v3733_v39, %v3637_v6  ;;  %v3396_v6 = vadd.f32 %v3395_v19, %v6471_v51 }
 0x62d   : > { %v3790_v60 = vadd.f32 %v3734_v38, %v2936_v63  ;;  %v3400_v47 = vpop.f32.mrf.mxu0  ;;  %v3523_v40 = vpop.f32.mrf.mxu1 }
 0x62f   : > { %3806 = vst.msk [vmem:[#allocation4 + $0x10] sm:$0xff] %vm1975_vm3, %v3790_v60  ;;  %v3518_v60 = vadd.f32 %v3517_v44, %v3396_v6 }
 0x630   : > { %v3640_v59 = vpop.f32.mrf.mxu2  ;;  %v3741_v46 = vpop.f32.mrf.mxu3 }
 0x631   : > { %v3641_v8 = vadd.f32 %v3640_v59, %v3488_v13 }
 0x633   : > { %v3738_v42 = vadd.f32 %v3737_v22, %v3641_v8  ;;  %v2942_v8 = vmul.f32 %v6501_v36, %v2921_v33 }
 0x635   : > { %v3791_v62 = vadd.f32 %v3738_v42, %v2937_v43  ;;  %v3405_v4 = vpop.f32.mrf.mxu0  ;;  %v3529_v23 = vpop.f32.mrf.mxu1  ;;  %v2922_v42 = vld [vmem:[#allocation4 + $0x48] sm:$0xff] }
 0x636   : > { %v2943_v57 = vmul.f32 %v6501_v36, %v2922_v42 }
 0x637   : > { %3807 = vst.msk [vmem:[#allocation4 + $0x18] sm:$0xff] %vm1975_vm3, %v3791_v62 }
 0x638   : > { %v3644_v21 = vpop.f32.mrf.mxu2  ;;  %v3745_v25 = vpop.f32.mrf.mxu3 }
 0x639   : > { %v3645_v12 = vadd.f32 %v3644_v21, %v3494_v41 }
 0x63b   : > { %v3742_v26 = vadd.f32 %v3741_v46, %v3645_v12  ;;  %v3401_v46 = vadd.f32 %v3400_v47, %v6475_v7 }
 0x63d   : > { %v3792_v3 = vadd.f32 %v3742_v26, %v2938_v29  ;;  %v3524_v51 = vadd.f32 %v3523_v40, %v3401_v46  ;;  %v3410_v21 = vpop.f32.mrf.mxu0  ;;  %v3535_v7 = vpop.f32.mrf.mxu1  ;;  %v2923_v26 = vld [vmem:[#allocation4 + $0x50] sm:$0xff]  ;;  %v2926_v40 = vld [vmem:[#allocation4 + $0x68] sm:$0xff] }
 0x63e   : > { %v3411_v54 = vadd.f32 %v3410_v21, %v6483_v55 }
 0x63f   : > { %3808 = vst.msk [vmem:[#allocation4 + $0x20] sm:$0xff] %vm1975_vm3, %v3792_v3 }
 0x640   : > { %v3648_v53 = vpop.f32.mrf.mxu2  ;;  %v3749_v52 = vpop.f32.mrf.mxu3 }
 0x641   : > { %v3649_v49 = vadd.f32 %v3648_v53, %v3500_v45  ;;  %v2944_v53 = vmul.f32 %v6501_v36, %v2923_v26 }
 0x643   : > { %v3746_v2 = vadd.f32 %v3745_v25, %v3649_v49  ;;  %v3406_v25 = vadd.f32 %v3405_v4, %v6479_v50  ;;  %v3536_v50 = vadd.f32 %v3535_v7, %v3411_v54 }
 0x645   : > { %v3793_v17 = vadd.f32 %v3746_v2, %v2939_v24  ;;  %v3530_v29 = vadd.f32 %v3529_v23, %v3406_v25  ;;  %v3415_v49 = vpop.f32.mrf.mxu0  ;;  %v3541_v19 = vpop.f32.mrf.mxu1  ;;  %v2924_v24 = vld [vmem:[#allocation4 + $0x58] sm:$0xff] }
 0x646   : > { %v3416_v44 = vadd.f32 %v3415_v49, %v6487_v58 }
 0x647   : > { %3809 = vst.msk [vmem:[#allocation4 + $0x28] sm:$0xff] %vm1975_vm3, %v3793_v17 }
 0x648   : > { %v3652_v18 = vpop.f32.mrf.mxu2  ;;  %v3753_v39 = vpop.f32.mrf.mxu3 }
 0x649   : > { %v3653_v10 = vadd.f32 %v3652_v18, %v3506_v37  ;;  %v2945_v37 = vmul.f32 %v6501_v36, %v2924_v24 }
 0x64b   : > { %v3750_v35 = vadd.f32 %v3749_v52, %v3653_v10  ;;  %v3542_v10 = vadd.f32 %v3541_v19, %v3416_v44 }
 0x64d   : > { %v3794_v9 = vadd.f32 %v3750_v35, %v2940_v32  ;;  %v3420_v55 = vpop.f32.mrf.mxu0  ;;  %v3547_v47 = vpop.f32.mrf.mxu1 }
 0x64f   : > { %3810 = vst.msk [vmem:[#allocation4 + $0x30] sm:$0xff] %vm1975_vm3, %v3794_v9  ;;  %v3421_v9 = vadd.f32 %v3420_v55, %v6491_v61 }
 0x650   : > { %v3656_v1 = vpop.f32.mrf.mxu2  ;;  %v3757_v15 = vpop.f32.mrf.mxu3 }
 0x651   : > { %v3657_v22 = vadd.f32 %v3656_v1, %v3512_v20  ;;  %v2946_v20 = vmul.f32 %v6501_v36, %v2925_v5 }
 0x653   : > { %v3754_v63 = vadd.f32 %v3753_v39, %v3657_v22 }
 0x655   : > { %v3795_v38 = vadd.f32 %v3754_v63, %v2941_v56  ;;  %v3425_v22 = vpop.f32.mrf.mxu0 }
 0x656   : > { %v3426_v63 = vadd.f32 %v3425_v22, %v6495_v16 }
 0x657   : > { %3811 = vst.msk [vmem:[#allocation4 + $0x38] sm:$0xff] %vm1975_vm3, %v3795_v38  ;;  %v2947_v38 = vmul.f32 %v6501_v36, %v2926_v40 }
 0x658   : > { %v3660_v13 = vpop.f32.mrf.mxu2  ;;  %v3761_v14 = vpop.f32.mrf.mxu3 }
 0x659   : > { %v3661_v59 = vadd.f32 %v3660_v13, %v3518_v60  ;;  %v3553_v60 = vpop.f32.mrf.mxu1 }
 0x65a   : > { %v3554_v61 = vadd.f32 %v3553_v60, %v3426_v63 }
 0x65b   : > { %v3758_v28 = vadd.f32 %v3757_v15, %v3661_v59  ;;  %v3548_v15 = vadd.f32 %v3547_v47, %v3421_v9 }
 0x65d   : > { %v3796_v43 = vadd.f32 %v3758_v28, %v2942_v8  ;;  %v3430_v8 = vpop.f32.mrf.mxu0 }
 0x65e   : > { %v3431_v28 = vadd.f32 %v3430_v8, %v6498_v31 }
 0x65f   : > { %3812 = vst.msk [vmem:[#allocation4 + $0x40] sm:$0xff] %vm1975_vm3, %v3796_v43 }
 0x660   : > { %v3664_v62 = vpop.f32.mrf.mxu2  ;;  %v3765_v41 = vpop.f32.mrf.mxu3 }
 0x661   : > { %v3665_v11 = vadd.f32 %v3664_v62, %v3524_v51  ;;  %v3559_v16 = vpop.f32.mrf.mxu1  ;;  %v2928_v62 = vld [vmem:[#allocation4 + $0x78] sm:$0xff] }
 0x662   : > { %v3560_v42 = vadd.f32 %v3559_v16, %v3431_v28  ;;  %v2949_v25 = vmul.f32 %v6501_v36, %v2928_v62 }
 0x663   : > { %v3762_v12 = vadd.f32 %v3761_v14, %v3665_v11  ;;  %v2927_v14 = vld [vmem:[#allocation4 + $0x70] sm:$0xff] }
 0x664   : > { %v2948_v23 = vmul.f32 %v6501_v36, %v2927_v14 }
 0x665   : > { %v3797_v48 = vadd.f32 %v3762_v12, %v2943_v57 }
 0x667   : > { %3813 = vst.msk [vmem:[#allocation4 + $0x48] sm:$0xff] %vm1975_vm3, %v3797_v48 }
 0x668   : > { %v3668_v30 = vpop.f32.mrf.mxu2  ;;  %v3769_v45 = vpop.f32.mrf.mxu3 }
 0x669   : > { %v3669_v3 = vadd.f32 %v3668_v30, %v3530_v29 }
 0x66b   : > { %v3766_v52 = vadd.f32 %v3765_v41, %v3669_v3 }
 0x66d   : > { %v3798_v27 = vadd.f32 %v3766_v52, %v2944_v53 }
 0x66f   : > { %3814 = vst.msk [vmem:[#allocation4 + $0x50] sm:$0xff] %vm1975_vm3, %v3798_v27 }
 0x670   : > { %v3672_v2 = vpop.f32.mrf.mxu2  ;;  %v3773_v18 = vpop.f32.mrf.mxu3 }
 0x671   : > { %v3673_v17 = vadd.f32 %v3672_v2, %v3536_v50 }
 0x673   : > { %v3770_v34 = vadd.f32 %v3769_v45, %v3673_v17 }
 0x675   : > { %v3799_v39 = vadd.f32 %v3770_v34, %v2945_v37 }
 0x677   : > { %3815 = vst.msk [vmem:[#allocation4 + $0x58] sm:$0xff] %vm1975_vm3, %v3799_v39 }
 0x678   : > { %v3676_v32 = vpop.f32.mrf.mxu2  ;;  %v3777_v58 = vpop.f32.mrf.mxu3 }
 0x679   : > { %v3677_v35 = vadd.f32 %v3676_v32, %v3542_v10 }
 0x67b   : > { %v3774_v0 = vadd.f32 %v3773_v18, %v3677_v35 }
 0x67d   : > { %v3800_v1 = vadd.f32 %v3774_v0, %v2946_v20 }
 0x67f   : > { %3816 = vst.msk [vmem:[#allocation4 + $0x60] sm:$0xff] %vm1975_vm3, %v3800_v1 }
 0x680   : > { %v3680_v6 = vpop.f32.mrf.mxu2  ;;  %v3781_v13 = vpop.f32.mrf.mxu3 }
 0x681   : > { %v3681_v56 = vadd.f32 %v3680_v6, %v3548_v15 }
 0x683   : > { %v3778_v4 = vadd.f32 %v3777_v58, %v3681_v56 }
 0x685   : > { %v3801_v33 = vadd.f32 %v3778_v4, %v2947_v38 }
 0x687   : > { %3817 = vst.msk [vmem:[#allocation4 + $0x68] sm:$0xff] %vm1975_vm3, %v3801_v33 }
 0x688   : > { %v3684_v59 = vpop.f32.mrf.mxu2  ;;  %v3785_v21 = vpop.f32.mrf.mxu3 }
 0x689   : > { %v3685_v46 = vadd.f32 %v3684_v59, %v3554_v61 }
 0x68b   : > { %v3782_v43 = vadd.f32 %v3781_v13, %v3685_v46 }
 0x68d   : > { %v3802_v51 = vadd.f32 %v3782_v43, %v2948_v23 }
 0x68f   : > { %3818 = vst.msk [vmem:[#allocation4 + $0x70] sm:$0xff] %vm1975_vm3, %v3802_v51 }
 0x690   : > { %v3688_v41 = vpop.f32.mrf.mxu2 }
 0x691   : > { %v3689_v11 = vadd.f32 %v3688_v41, %v3560_v42 }
 0x693   : > { %v3786_v57 = vadd.f32 %v3785_v21, %v3689_v11  ;;  %3866 = sbr.rel (%p4105_p3) target bundleno = 1712 (0x6b0), region = 44 }
 0x695   : > { %v3803_v12 = vadd.f32 %v3786_v57, %v2949_v25 }
 0x697   : > { %3819 = vst.msk [vmem:[#allocation4 + $0x78] sm:$0xff] %vm1975_vm3, %v3803_v12 }
 0x698   : > { %v3867_v31 = vld [vmem:[#allocation3] sm:$0x1]  ;;  %v3871_v48 = vld [vmem:[#allocation4] sm:$0xff]  ;;  %v3872_v3 = vld [vmem:[#allocation4 + $0x8] sm:$0xff] }
 0x699   : > { %v3903_v7 = vld [vmem:[#allocation5] sm:$0x1]  ;;  %v3868_v29 = vadd.f32 0.0256, %v3867_v31  ;;  %v3887_v26 = vmul.f32 0.088388346, %v3871_v48 }
 0x69a   : > { %v3904_v30 = vmul.f32 8.838835e-06, %v3903_v7  ;;  %v3873_v45 = vld [vmem:[#allocation4 + $0x10] sm:$0xff]  ;;  %v3874_v54 = vld [vmem:[#allocation4 + $0x18] sm:$0xff]  ;;  %v3888_v36 = vmul.f32 0.088388346, %v3872_v3 }
 0x69b   : > { %v3869_v53 = vmul.f32 0.088388346, %v3868_v29  ;;  %v3875_v49 = vld [vmem:[#allocation4 + $0x20] sm:$0xff]  ;;  %v3889_v27 = vmul.f32 0.088388346, %v3873_v45  ;;  %v3876_v17 = vld [vmem:[#allocation4 + $0x28] sm:$0xff] }
 0x69c   : > { %v3906_v52 = vperm.slane %v3904_v30, 0  ;;  %v3890_v50 = vmul.f32 0.088388346, %v3874_v54  ;;  %v3891_v19 = vmul.f32 0.088388346, %v3875_v49  ;;  %v3877_v44 = vld [vmem:[#allocation4 + $0x30] sm:$0xff] }
 0x69d   : > { %3870 = vst [vmem:[%s4483_s9] sm:$0x1] %v3869_v53  ;;  %v3878_v37 = vld [vmem:[#allocation4 + $0x38] sm:$0xff]  ;;  %v3892_v39 = vmul.f32 0.088388346, %v3876_v17  ;;  %v3879_v55 = vld [vmem:[#allocation4 + $0x40] sm:$0xff]  ;;  %v3880_v10 = vld [vmem:[#allocation4 + $0x48] sm:$0xff] }
 0x69e   : > { %v3908_v24 = vadd.f32 %v3906_v52, %v3887_v26  ;;  %v3909_v2 = vadd.f32 %v3906_v52, %v3888_v36  ;;  %v3910_v34 = vadd.f32 %v3906_v52, %v3889_v27  ;;  %v3911_v18 = vadd.f32 %v3906_v52, %v3890_v50  ;;  %v3881_v5 = vld [vmem:[#allocation4 + $0x50] sm:$0xff]  ;;  %v3882_v9 = vld [vmem:[#allocation4 + $0x58] sm:$0xff]  ;;  %v3883_v58 = vld [vmem:[#allocation4 + $0x60] sm:$0xff] }
 0x69f   : > { %v3912_v32 = vadd.f32 %v3906_v52, %v3891_v19  ;;  %v3893_v35 = vmul.f32 0.088388346, %v3877_v44  ;;  %v3894_v47 = vmul.f32 0.088388346, %v3878_v37  ;;  %v3913_v20 = vadd.f32 %v3906_v52, %v3892_v39  ;;  %v3884_v40 = vld [vmem:[#allocation4 + $0x68] sm:$0xff]  ;;  %v3885_v63 = vld [vmem:[#allocation4 + $0x70] sm:$0xff] }
 0x6a0   : > { %3924 = vst.msk [vmem:[%s4479_s14] sm:$0xff] %vm1975_vm3, %v3908_v24  ;;  %v3895_v0 = vmul.f32 0.088388346, %v3879_v55  ;;  %v3896_v1 = vmul.f32 0.088388346, %v3880_v10  ;;  %v3886_v60 = vld [vmem:[#allocation4 + $0x78] sm:$0xff] }
 0x6a1   : > { %3925 = vst.msk [vmem:[%s4479_s14 + $0x8] sm:$0xff] %vm1975_vm3, %v3909_v2  ;;  %v3914_v15 = vadd.f32 %v3906_v52, %v3893_v35  ;;  %v3897_v22 = vmul.f32 0.088388346, %v3881_v5  ;;  %v3915_v6 = vadd.f32 %v3906_v52, %v3894_v47  ;;  %v3898_v56 = vmul.f32 0.088388346, %v3882_v9 }
 0x6a2   : > { %3926 = vst.msk [vmem:[%s4479_s14 + $0x10] sm:$0xff] %vm1975_vm3, %v3910_v34  ;;  %v3916_v38 = vadd.f32 %v3906_v52, %v3895_v0  ;;  %v3899_v4 = vmul.f32 0.088388346, %v3883_v58  ;;  %v3917_v33 = vadd.f32 %v3906_v52, %v3896_v1  ;;  %v3900_v61 = vmul.f32 0.088388346, %v3884_v40 }
 0x6a3   : > { %3927 = vst.msk [vmem:[%s4479_s14 + $0x18] sm:$0xff] %vm1975_vm3, %v3911_v18  ;;  %v3918_v13 = vadd.f32 %v3906_v52, %v3897_v22  ;;  %v3901_v14 = vmul.f32 0.088388346, %v3885_v63  ;;  %v3919_v59 = vadd.f32 %v3906_v52, %v3898_v56  ;;  %v3902_v46 = vmul.f32 0.088388346, %v3886_v60 }
 0x6a4   : > { %3928 = vst.msk [vmem:[%s4479_s14 + $0x20] sm:$0xff] %vm1975_vm3, %v3912_v32  ;;  %v3920_v8 = vadd.f32 %v3906_v52, %v3899_v4  ;;  %v3921_v28 = vadd.f32 %v3906_v52, %v3900_v61 }
 0x6a5   : > { %3929 = vst.msk [vmem:[%s4479_s14 + $0x28] sm:$0xff] %vm1975_vm3, %v3913_v20  ;;  %v3922_v23 = vadd.f32 %v3906_v52, %v3901_v14  ;;  %v3923_v43 = vadd.f32 %v3906_v52, %v3902_v46 }
 0x6a6   : > { %3930 = vst.msk [vmem:[%s4479_s14 + $0x30] sm:$0xff] %vm1975_vm3, %v3914_v15 }
 0x6a7   : > { %3931 = vst.msk [vmem:[%s4479_s14 + $0x38] sm:$0xff] %vm1975_vm3, %v3915_v6 }
 0x6a8   : > { %3932 = vst.msk [vmem:[%s4479_s14 + $0x40] sm:$0xff] %vm1975_vm3, %v3916_v38 }
 0x6a9   : > { %3933 = vst.msk [vmem:[%s4479_s14 + $0x48] sm:$0xff] %vm1975_vm3, %v3917_v33 }
 0x6aa   : > { %3934 = vst.msk [vmem:[%s4479_s14 + $0x50] sm:$0xff] %vm1975_vm3, %v3918_v13 }
 0x6ab   : > { %3935 = vst.msk [vmem:[%s4479_s14 + $0x58] sm:$0xff] %vm1975_vm3, %v3919_v59 }
 0x6ac   : > { %3936 = vst.msk [vmem:[%s4479_s14 + $0x60] sm:$0xff] %vm1975_vm3, %v3920_v8 }
 0x6ad   : > { %3937 = vst.msk [vmem:[%s4479_s14 + $0x68] sm:$0xff] %vm1975_vm3, %v3921_v28 }
 0x6ae   : > { %3938 = vst.msk [vmem:[%s4479_s14 + $0x70] sm:$0xff] %vm1975_vm3, %v3922_v23 }
 0x6af   : > { %3939 = vst.msk [vmem:[%s4479_s14 + $0x78] sm:$0xff] %vm1975_vm3, %v3923_v43 }
 0x6b0 PF: > { %s4106_s21 = sshll.u32 %s4329_s23, 2  ;;  %s3962_s20 = sshll.u32 %s4483_s9, 4  ;;  %s3963_s20 = int_to_ptr.vmem [resolvable:$true] %s3962_s20 }
 0x6b1   : > { %s3959_s13 = sadd.s32 %s4325_s22, %s4106_s21  ;;  %s6919_s6 = sand.u32 1, %s4313_s19  }
 0x6b2   : > { %s3960_s26 = scalar_lea.hbm %s6640_s4, %s3959_s13  ;;  %s3941_s7 = scalar_lea.sflag [#allocation7], %s6919_s6 }
 0x6b3   : > { %s3964_s30 = sshll.u32 %s3960_s26, 4  ;;  %s4255_s22 = scalar_lea.hbm %s6640_s4, 8  ;;  %s3965_s30 = int_to_ptr.hbm [resolvable:$true] %s3964_s30 }
 0x6b4   : > { %s4249_s15 = sshra.s32 %s3965_s30, 4  ;;  %s4250_s15 = int_to_ptr.hbm [resolvable:$true] %s4249_s15 }
 0x6b5   : > { %s4251_s14 = scalar_lea.hbm %s4250_s15, 1  ;;  %p4256_p9 = scmp.lt.s32.totalorder %s4250_s15, %s6640_s4 }
 0x6b6   : > { %p4252_p4 = scmp.ne.s32.totalorder %s4250_s15, %s4251_s14  ;;  %p4257_p10 = scmp.lt.s32.totalorder %s4255_s22, %s4251_s14 }
 0x6b8   : > { %p4253_p5 = pnand %p4252_p4, %p4442_p6  ;;  %p4258_p11 = por %p4257_p10, %p4256_p9 }
 0x6ba   : > { %p4254_p8 = pneg %p4253_p5 }
 0x6bc   : > { %p4259_p12 = pnand %p4258_p11, %p4254_p8 }
 0x6be   : > { %4262 = shalt.err (!%p4259_p12)
}
 0x6bf   : > { %4109 = dma.vmem_to_hbm [thread:$0]  (%p4442_p6), %s3963_s20, 16, %s3965_s30, %s3941_s7  }
 0x6c0 PF: > { %p4115_p13 = scmp.ge.s32.totalorder %s4345_s27, 2  ;;  %s3979_s29 = sand.u32 1, %s4309_s18  }
 0x6c1   : > { %s3980_s10 = scalar_lea.sflag [#allocation7], %s3979_s29 }
 0x6c2   : > { %p4112_p0 = pnand %p4115_p13, %p4449_p7 }
 0x6c4   : > { %p4113_p1 = pneg %p4112_p0 }
 0x6c6   : > { %4304 = dma.done.wait (%p4113_p1), %s3980_s10, 16  }
 0x6c7   : > { %4306 = vsyncadd (%p4113_p1), %s3980_s10, 4294967280  ;;  %s19_s27 = sadd.s32 1, %s4345_s27   ;;  %s6921_s11 = sld [smem:[#allocation9_spill]] }
 0x6c8   : > { %p16_p2 = scmp.ge.s32.totalorder %s19_s27, 18   ;;  %s6922_s20 = sld [smem:[#allocation17_spill]] }
 0x6c9   : > { %s6923_s21 = sld [smem:[#allocation10_spill]]  ;;  %s6929_s18 = smov %s4313_s19 }
 0x6ca   : > { %s6924_s22 = sld [smem:[#allocation11_spill]]  ;;  %18 = sbr.rel (!%p16_p2) target bundleno = 6 (0x6), region = 93 }
 0x6cb   : > { %s6925_s23 = sld [smem:[#allocation12_spill]] }
 0x6cc   : > { %s6926_s24 = sld [smem:[#allocation13_spill]] }
 0x6cd   : > { %s6927_s25 = sld [smem:[#allocation14_spill]]  ;;  %s6930_s19 = smov %s6921_s11 }
 0x6ce   : > { %s6928_s26 = sld [smem:[#allocation16_spill]] }
 0x6cf   :  { %3997 = vsyncpa [#allocation7], 1 }
 0x6d0   :  { %3999 = vsyncpa [#allocation7 + $0x1], 1 }

</bundles_post_ra>
